<compile_context>
chip_gen: v6e
topology: v6e:2x2x1
jax: 0.10.0
libtpu: 0.0.40
codegen_flags: <defaults>
</compile_context>

<pallas_src>
import math

import jax
import jax.numpy as jnp
from jax.experimental import pallas as pl
from jax.experimental.pallas import tpu as pltpu

D_MODEL = 32
N_TOK = 144                      # fixed by nn.Parameter(torch.randn((144, d_model, 1)))
BATCH = 2
SCALE = D_MODEL ** (-0.5)
ROW_BLK = 16                     # pos-bias row split -> grid=(9,), ~16 vregs of planes


# ----------------------------------------------------------------------------
# Plain-JAX glue: relative-position features (mirrors get_relative_position)
# ----------------------------------------------------------------------------
def get_relative_position(n_tok):
    g = int(math.sqrt(n_tok))
    ii = jnp.arange(g, dtype=jnp.float32)
    x_min = jnp.tile(ii, g) / g
    x_max = (jnp.tile(ii, g) + 1.0) / g
    y_min = jnp.repeat(ii, g) / g
    y_max = (jnp.repeat(ii, g) + 1.0) / g
    cx = (x_min + x_max) * 0.5
    cy = (y_min + y_max) * 0.5
    dx = cx[:, None] - cx[None, :]
    ax = jnp.sign(dx) * 0.5
    dx = jnp.abs(jnp.log(jnp.abs(dx) + 0.5))
    dy = cy[:, None] - cy[None, :]
    ay = jnp.sign(dy) * 0.5
    dy = jnp.abs(jnp.log(jnp.abs(dy) + 0.5))
    # == torch.cat((dx, dy, ax, ay), 0).permute(1, 2, 0)
    return jnp.stack([dx, dy, ax, ay], axis=-1)        # (N, N, 4)


# ----------------------------------------------------------------------------
# Kernel 1 (COLD path — run once per parameter set, result cached):
#   rela[i, j] = relu( sum_d relu( sum_c pos[i,j,c] * Wlin[d,c] ) * w_g[i, d] )
# Accumulation form: only one (ROW_BLK, N) tile is live per d-plane.  ROW_BLK=16
# keeps p0..p3 at ~4 vregs each (no spill); grid=(9,) row blocks.
# ----------------------------------------------------------------------------
def _pos_bias_kernel(wlin_ref, pos_ref, wg_ref, out_ref):
    # wlin_ref: SMEM (D, 4) scalar coeffs | pos_ref: (4, ROW_BLK, N)
    # wg_ref:   (ROW_BLK, D)              | out_ref: (ROW_BLK, N)
    p0 = pos_ref[0]
    p1 = pos_ref[1]
    p2 = pos_ref[2]
    p3 = pos_ref[3]
    wg = wg_ref[...]                                        # (ROW_BLK, D)
    acc = jnp.zeros((ROW_BLK, N_TOK), jnp.float32)
    # Static unroll over d (D=32): per iteration only (ROW_BLK, N) tiles live.
    for d in range(D_MODEL):
        lin = (wlin_ref[d, 0] * p0 + wlin_ref[d, 1] * p1
               + wlin_ref[d, 2] * p2 + wlin_ref[d, 3] * p3)
        acc = acc + wg[:, d:d + 1] * jnp.maximum(lin, 0.0)
    out_ref[...] = jnp.maximum(acc, 0.0)


def precompute_grid_bias(wlin, wg):
    """Parameter-only positional bias. Compute once (or whenever Wlin/w_g
    change) and reuse across forwards — NOT part of the per-forward hot path."""
    pos4 = jnp.transpose(get_relative_position(N_TOK), (2, 0, 1))   # (4, N, N)
    wg_nd = wg[:, :, 0]                                             # (N, D)
    return pl.pallas_call(
        _pos_bias_kernel,
        out_shape=jax.ShapeDtypeStruct((N_TOK, N_TOK), jnp.float32),
        grid=(N_TOK // ROW_BLK,),
        in_specs=[
            pl.BlockSpec(memory_space=pltpu.MemorySpace.SMEM),       # (D, 4)
            pl.BlockSpec((4, ROW_BLK, N_TOK), lambda r: (0, r, 0)),
            pl.BlockSpec((ROW_BLK, D_MODEL), lambda r: (r, 0)),
        ],
        out_specs=pl.BlockSpec((ROW_BLK, N_TOK), lambda r: (r, 0)),
        compiler_params=pltpu.CompilerParams(dimension_semantics=("parallel",)),
    )(wlin, pos4, wg_nd)


# ----------------------------------------------------------------------------
# Kernel 2 (HOT path): per-image projections + QK^T + bias + softmax + @V.
# SCALE is pre-folded into w_ref[0] / b_ref[0] (ReLU is positively homogeneous),
# so no `* SCALE` appears here.  No concat, no lane column-slicing: the packed
# weight is indexed on its leading axis only.
# ----------------------------------------------------------------------------
def _attn_kernel(q_ref, k_ref, v_ref, w_ref, b_ref, rela_ref, o_ref):
    bb = o_ref.shape[0]                       # static: batch_block (<= 8)
    rela = rela_ref[...]                      # (N, N)
    wq = w_ref[0]                             # (D, D), SCALE already folded in
    wk = w_ref[1]
    wv = w_ref[2]
    bq = b_ref[0]                             # (1, D), SCALE already folded in
    bk = b_ref[1]
    bv = b_ref[2]
    # Static unroll over images; bb is capped small so this == fori_loop(unroll=True).
    for i in range(bb):
        q = jnp.maximum(
            jnp.dot(q_ref[i], wq, preferred_element_type=jnp.float32) + bq, 0.0)
        k = jnp.maximum(
            jnp.dot(k_ref[i], wk, preferred_element_type=jnp.float32) + bk, 0.0)
        v = jnp.maximum(
            jnp.dot(v_ref[i], wv, preferred_element_type=jnp.float32) + bv, 0.0)
        att = jax.lax.dot_general(q, k, (((1,), (1,)), ((), ())),
                                  preferred_element_type=jnp.float32)
        att = att + rela
        # TODO(synk): `mask is not None` masked_fill branch not implemented.
        att = att - jnp.max(att, axis=-1, keepdims=True)
        e = jnp.exp(att)
        denom = jnp.sum(e, axis=-1, keepdims=True)
        p = e * pl.reciprocal(denom, approx=False)          # keeps f32 accuracy
        o_ref[i] = jnp.dot(p, v, preferred_element_type=jnp.float32)


def grid_attention(query, key_in, value, w_packed, b_packed, rela, *, batch_block=1):
    """Forward hot path: one pallas_call.
    batch_block=1      -> grid=(B,) parallel  (best on v7x: 2 TensorCores;
                          if the trace shows no cross-TC split, switch the
                          batch axis to pltpu.CORE_PARALLEL)
    batch_block=B (<=8)-> grid=(B/bb,) folded (best on single-TC v5e / v6e)"""
    b = query.shape[0]
    assert b % batch_block == 0
    assert batch_block <= 8, "cap batch_block to bound per-step live ranges"
    nsteps = b // batch_block
    x_spec = pl.BlockSpec((batch_block, N_TOK, D_MODEL), lambda g: (g, 0, 0))

    flops = b * (3 * 2 * N_TOK * D_MODEL * D_MODEL        # projections
                 + 2 * 2 * N_TOK * N_TOK * D_MODEL)       # QK^T and att@V
    transcendentals = b * (N_TOK * N_TOK + N_TOK)          # exp + reciprocal
    bytes_accessed = (4 * b * N_TOK * D_MODEL * 4          # 3 inputs + 1 output
                      + nsteps * (N_TOK * N_TOK * 4        # rela per step
                                  + 3 * D_MODEL * D_MODEL * 4
                                  + 3 * D_MODEL * 4))

    return pl.pallas_call(
        _attn_kernel,
        out_shape=jax.ShapeDtypeStruct((b, N_TOK, D_MODEL), jnp.float32),
        grid=(nsteps,),
        in_specs=[x_spec, x_spec, x_spec,
                  pl.BlockSpec((3, D_MODEL, D_MODEL), lambda g: (0, 0, 0)),
                  pl.BlockSpec((3, 1, D_MODEL), lambda g: (0, 0, 0)),
                  pl.BlockSpec((N_TOK, N_TOK), lambda g: (0, 0))],
        out_specs=x_spec,
        cost_estimate=pl.CostEstimate(flops=flops,
                                      transcendentals=transcendentals,
                                      bytes_accessed=bytes_accessed),
        compiler_params=pltpu.CompilerParams(dimension_semantics=("parallel",)),
    )(query, key_in, value, w_packed, b_packed, rela)


# ----------------------------------------------------------------------------
# Deterministic parameter init (mirrors the module's init(): xavier + zero bias)
# ----------------------------------------------------------------------------
def xavier_uniform(key, shape, fan_in, fan_out):
    bound = math.sqrt(6.0 / (fan_in + fan_out))
    return jax.random.uniform(key, shape, jnp.float32, -bound, bound)


def reference(query, key_in, value, Wq, bq, Wk, bk, Wv, bv, Wlin, wg):
    relu = lambda x: jnp.maximum(x, 0.0)
    q = relu(query @ Wq.T + bq)
    k = relu(key_in @ Wk.T + bk)
    v = relu(value @ Wv.T + bv)
    att = jnp.einsum('bnd,bmd->bnm', q, k) * SCALE
    pos = get_relative_position(N_TOK)
    rp = relu(jnp.einsum('ijc,dc->ijd', pos, Wlin))
    rp = relu(jnp.einsum('ijd,id->ij', rp, wg[:, :, 0]))
    att = att + rp[None]
    att = jax.nn.softmax(att, axis=-1)
    return jnp.einsum('bnm,bmd->bnd', att, v)


if __name__ == "__main__":
    root = jax.random.PRNGKey(0)
    ks = jax.random.split(root, 8)

    Wq = xavier_uniform(ks[0], (D_MODEL, D_MODEL), D_MODEL, D_MODEL)
    Wk = xavier_uniform(ks[1], (D_MODEL, D_MODEL), D_MODEL, D_MODEL)
    Wv = xavier_uniform(ks[2], (D_MODEL, D_MODEL), D_MODEL, D_MODEL)
    Wlin = xavier_uniform(ks[3], (D_MODEL, 4), 4, D_MODEL)   # Linear(4, d_model, bias=False)
    wg = xavier_uniform(ks[4], (N_TOK, D_MODEL, 1), D_MODEL, N_TOK)
    bq = jnp.zeros((1, D_MODEL), jnp.float32)
    bk = jnp.zeros((1, D_MODEL), jnp.float32)
    bv = jnp.zeros((1, D_MODEL), jnp.float32)

    query = jax.random.normal(ks[5], (BATCH, N_TOK, D_MODEL), jnp.float32)
    key_in = jax.random.normal(ks[6], (BATCH, N_TOK, D_MODEL), jnp.float32)
    value = jax.random.normal(ks[7], (BATCH, N_TOK, D_MODEL), jnp.float32)

    # --- One-time parameter preprocessing (cached, outside the hot path) ----
    # SCALE folded into the q projection: relu(x)*s == relu(x*s) for s>0 (ReLU).
    w_packed = jnp.stack([Wq.T * SCALE, Wk.T, Wv.T], axis=0)        # (3, D, D)
    b_packed = jnp.stack([bq * SCALE, bk, bv], axis=0)              # (3, 1, D)
    rela = jax.block_until_ready(precompute_grid_bias(Wlin, wg))    # (N, N)

    ref = reference(query, key_in, value, Wq, bq, Wk, bk, Wv, bv, Wlin, wg)

    # --- Hot path --------------------------------------------------------
    # Variant A: grid=(B,) parallel (v7x: one image per TensorCore).
    out_a = jax.block_until_ready(
        grid_attention(query, key_in, value, w_packed, b_packed, rela,
                       batch_block=1))
    # Variant B: batch folded into a single grid step (single-TC v5e/v6e).
    out_b = jax.block_until_ready(
        grid_attention(query, key_in, value, w_packed, b_packed, rela,
                       batch_block=BATCH))

    for out in (out_a, out_b):
        assert out.shape == (BATCH, N_TOK, D_MODEL)
        assert jnp.allclose(out, ref, rtol=1e-5, atol=1e-5), \
            float(jnp.max(jnp.abs(out - ref)))

    print("KERNEL_OK")
</pallas_src>

<mosaic_0001>
module attributes {stable_mosaic.version = 11 : i64} {
  func.func @_pos_bias_kernel(%arg0: i32, %arg1: memref<32x4xf32, #tpu.memory_space<smem>>, %arg2: memref<4x16x144xf32, #tpu.memory_space<vmem>>, %arg3: memref<16x32xf32, #tpu.memory_space<vmem>>, %arg4: memref<16x144xf32, #tpu.memory_space<vmem>>) attributes {dimension_semantics = [#tpu.dimension_semantics<parallel>], iteration_bounds = array<i64: 9>, scalar_prefetch = 0 : i64, scratch_operands = 0 : i64, tpu.core_type = #tpu.core_type<tc>, window_params = [{transform_indices = @transform_0, window_bounds = array<i64: 32, 4>}, {transform_indices = @transform_1, window_bounds = array<i64: 4, 16, 144>}, {transform_indices = @transform_2, window_bounds = array<i64: 16, 32>}, {transform_indices = @transform_3, window_bounds = array<i64: 16, 144>}]} {
    %c0 = arith.constant 0 : index
    %c0_0 = arith.constant 0 : index
    %c0_1 = arith.constant 0 : index
    %0 = vector.load %arg2[%c0, %c0_0, %c0_1] : memref<4x16x144xf32, #tpu.memory_space<vmem>>, vector<1x16x144xf32>
    %1 = vector.shape_cast %0 : vector<1x16x144xf32> to vector<16x144xf32>
    %c1 = arith.constant 1 : index
    %c0_2 = arith.constant 0 : index
    %c0_3 = arith.constant 0 : index
    %2 = vector.load %arg2[%c1, %c0_2, %c0_3] : memref<4x16x144xf32, #tpu.memory_space<vmem>>, vector<1x16x144xf32>
    %3 = vector.shape_cast %2 : vector<1x16x144xf32> to vector<16x144xf32>
    %c2 = arith.constant 2 : index
    %c0_4 = arith.constant 0 : index
    %c0_5 = arith.constant 0 : index
    %4 = vector.load %arg2[%c2, %c0_4, %c0_5] : memref<4x16x144xf32, #tpu.memory_space<vmem>>, vector<1x16x144xf32>
    %5 = vector.shape_cast %4 : vector<1x16x144xf32> to vector<16x144xf32>
    %c3 = arith.constant 3 : index
    %c0_6 = arith.constant 0 : index
    %c0_7 = arith.constant 0 : index
    %6 = vector.load %arg2[%c3, %c0_6, %c0_7] : memref<4x16x144xf32, #tpu.memory_space<vmem>>, vector<1x16x144xf32>
    %7 = vector.shape_cast %6 : vector<1x16x144xf32> to vector<16x144xf32>
    %c0_8 = arith.constant 0 : index
    %c0_9 = arith.constant 0 : index
    %8 = vector.load %arg3[%c0_8, %c0_9] : memref<16x32xf32, #tpu.memory_space<vmem>>, vector<16x32xf32>
    %cst = arith.constant 0.000000e+00 : f32
    %9 = vector.broadcast %cst : f32 to vector<16x144xf32>
    %c0_10 = arith.constant 0 : index
    %c0_11 = arith.constant 0 : index
    %10 = memref.load %arg1[%c0_10, %c0_11] : memref<32x4xf32, #tpu.memory_space<smem>>
    %11 = vector.broadcast %10 : f32 to vector<16x144xf32>
    %12 = arith.mulf %11, %1 : vector<16x144xf32>
    %c0_12 = arith.constant 0 : index
    %c1_13 = arith.constant 1 : index
    %13 = memref.load %arg1[%c0_12, %c1_13] : memref<32x4xf32, #tpu.memory_space<smem>>
    %14 = vector.broadcast %13 : f32 to vector<16x144xf32>
    %15 = arith.mulf %14, %3 : vector<16x144xf32>
    %16 = arith.addf %12, %15 : vector<16x144xf32>
    %c0_14 = arith.constant 0 : index
    %c2_15 = arith.constant 2 : index
    %17 = memref.load %arg1[%c0_14, %c2_15] : memref<32x4xf32, #tpu.memory_space<smem>>
    %18 = vector.broadcast %17 : f32 to vector<16x144xf32>
    %19 = arith.mulf %18, %5 : vector<16x144xf32>
    %20 = arith.addf %16, %19 : vector<16x144xf32>
    %c0_16 = arith.constant 0 : index
    %c3_17 = arith.constant 3 : index
    %21 = memref.load %arg1[%c0_16, %c3_17] : memref<32x4xf32, #tpu.memory_space<smem>>
    %22 = vector.broadcast %21 : f32 to vector<16x144xf32>
    %23 = arith.mulf %22, %7 : vector<16x144xf32>
    %24 = arith.addf %20, %23 : vector<16x144xf32>
    %25 = vector.extract_strided_slice %8 {offsets = [0, 0], sizes = [16, 1], strides = [1, 1]} : vector<16x32xf32> to vector<16x1xf32>
    %cst_18 = arith.constant 0.000000e+00 : f32
    %26 = vector.broadcast %cst_18 : f32 to vector<16x144xf32>
    %27 = arith.maximumf %24, %26 : vector<16x144xf32>
    %28 = vector.broadcast %25 : vector<16x1xf32> to vector<16x144xf32>
    %29 = arith.mulf %28, %27 : vector<16x144xf32>
    %30 = arith.addf %9, %29 : vector<16x144xf32>
    %c1_19 = arith.constant 1 : index
    %c0_20 = arith.constant 0 : index
    %31 = memref.load %arg1[%c1_19, %c0_20] : memref<32x4xf32, #tpu.memory_space<smem>>
    %32 = vector.broadcast %31 : f32 to vector<16x144xf32>
    %33 = arith.mulf %32, %1 : vector<16x144xf32>
    %c1_21 = arith.constant 1 : index
    %c1_22 = arith.constant 1 : index
    %34 = memref.load %arg1[%c1_21, %c1_22] : memref<32x4xf32, #tpu.memory_space<smem>>
    %35 = vector.broadcast %34 : f32 to vector<16x144xf32>
    %36 = arith.mulf %35, %3 : vector<16x144xf32>
    %37 = arith.addf %33, %36 : vector<16x144xf32>
    %c1_23 = arith.constant 1 : index
    %c2_24 = arith.constant 2 : index
    %38 = memref.load %arg1[%c1_23, %c2_24] : memref<32x4xf32, #tpu.memory_space<smem>>
    %39 = vector.broadcast %38 : f32 to vector<16x144xf32>
    %40 = arith.mulf %39, %5 : vector<16x144xf32>
    %41 = arith.addf %37, %40 : vector<16x144xf32>
    %c1_25 = arith.constant 1 : index
    %c3_26 = arith.constant 3 : index
    %42 = memref.load %arg1[%c1_25, %c3_26] : memref<32x4xf32, #tpu.memory_space<smem>>
    %43 = vector.broadcast %42 : f32 to vector<16x144xf32>
    %44 = arith.mulf %43, %7 : vector<16x144xf32>
    %45 = arith.addf %41, %44 : vector<16x144xf32>
    %46 = vector.extract_strided_slice %8 {offsets = [0, 1], sizes = [16, 1], strides = [1, 1]} : vector<16x32xf32> to vector<16x1xf32>
    %cst_27 = arith.constant 0.000000e+00 : f32
    %47 = vector.broadcast %cst_27 : f32 to vector<16x144xf32>
    %48 = arith.maximumf %45, %47 : vector<16x144xf32>
    %49 = vector.broadcast %46 : vector<16x1xf32> to vector<16x144xf32>
    %50 = arith.mulf %49, %48 : vector<16x144xf32>
    %51 = arith.addf %30, %50 : vector<16x144xf32>
    %c2_28 = arith.constant 2 : index
    %c0_29 = arith.constant 0 : index
    %52 = memref.load %arg1[%c2_28, %c0_29] : memref<32x4xf32, #tpu.memory_space<smem>>
    %53 = vector.broadcast %52 : f32 to vector<16x144xf32>
    %54 = arith.mulf %53, %1 : vector<16x144xf32>
    %c2_30 = arith.constant 2 : index
    %c1_31 = arith.constant 1 : index
    %55 = memref.load %arg1[%c2_30, %c1_31] : memref<32x4xf32, #tpu.memory_space<smem>>
    %56 = vector.broadcast %55 : f32 to vector<16x144xf32>
    %57 = arith.mulf %56, %3 : vector<16x144xf32>
    %58 = arith.addf %54, %57 : vector<16x144xf32>
    %c2_32 = arith.constant 2 : index
    %c2_33 = arith.constant 2 : index
    %59 = memref.load %arg1[%c2_32, %c2_33] : memref<32x4xf32, #tpu.memory_space<smem>>
    %60 = vector.broadcast %59 : f32 to vector<16x144xf32>
    %61 = arith.mulf %60, %5 : vector<16x144xf32>
    %62 = arith.addf %58, %61 : vector<16x144xf32>
    %c2_34 = arith.constant 2 : index
    %c3_35 = arith.constant 3 : index
    %63 = memref.load %arg1[%c2_34, %c3_35] : memref<32x4xf32, #tpu.memory_space<smem>>
    %64 = vector.broadcast %63 : f32 to vector<16x144xf32>
    %65 = arith.mulf %64, %7 : vector<16x144xf32>
    %66 = arith.addf %62, %65 : vector<16x144xf32>
    %67 = vector.extract_strided_slice %8 {offsets = [0, 2], sizes = [16, 1], strides = [1, 1]} : vector<16x32xf32> to vector<16x1xf32>
    %cst_36 = arith.constant 0.000000e+00 : f32
    %68 = vector.broadcast %cst_36 : f32 to vector<16x144xf32>
    %69 = arith.maximumf %66, %68 : vector<16x144xf32>
    %70 = vector.broadcast %67 : vector<16x1xf32> to vector<16x144xf32>
    %71 = arith.mulf %70, %69 : vector<16x144xf32>
    %72 = arith.addf %51, %71 : vector<16x144xf32>
    %c3_37 = arith.constant 3 : index
    %c0_38 = arith.constant 0 : index
    %73 = memref.load %arg1[%c3_37, %c0_38] : memref<32x4xf32, #tpu.memory_space<smem>>
    %74 = vector.broadcast %73 : f32 to vector<16x144xf32>
    %75 = arith.mulf %74, %1 : vector<16x144xf32>
    %c3_39 = arith.constant 3 : index
    %c1_40 = arith.constant 1 : index
    %76 = memref.load %arg1[%c3_39, %c1_40] : memref<32x4xf32, #tpu.memory_space<smem>>
    %77 = vector.broadcast %76 : f32 to vector<16x144xf32>
    %78 = arith.mulf %77, %3 : vector<16x144xf32>
    %79 = arith.addf %75, %78 : vector<16x144xf32>
    %c3_41 = arith.constant 3 : index
    %c2_42 = arith.constant 2 : index
    %80 = memref.load %arg1[%c3_41, %c2_42] : memref<32x4xf32, #tpu.memory_space<smem>>
    %81 = vector.broadcast %80 : f32 to vector<16x144xf32>
    %82 = arith.mulf %81, %5 : vector<16x144xf32>
    %83 = arith.addf %79, %82 : vector<16x144xf32>
    %c3_43 = arith.constant 3 : index
    %c3_44 = arith.constant 3 : index
    %84 = memref.load %arg1[%c3_43, %c3_44] : memref<32x4xf32, #tpu.memory_space<smem>>
    %85 = vector.broadcast %84 : f32 to vector<16x144xf32>
    %86 = arith.mulf %85, %7 : vector<16x144xf32>
    %87 = arith.addf %83, %86 : vector<16x144xf32>
    %88 = vector.extract_strided_slice %8 {offsets = [0, 3], sizes = [16, 1], strides = [1, 1]} : vector<16x32xf32> to vector<16x1xf32>
    %cst_45 = arith.constant 0.000000e+00 : f32
    %89 = vector.broadcast %cst_45 : f32 to vector<16x144xf32>
    %90 = arith.maximumf %87, %89 : vector<16x144xf32>
    %91 = vector.broadcast %88 : vector<16x1xf32> to vector<16x144xf32>
    %92 = arith.mulf %91, %90 : vector<16x144xf32>
    %93 = arith.addf %72, %92 : vector<16x144xf32>
    %c4 = arith.constant 4 : index
    %c0_46 = arith.constant 0 : index
    %94 = memref.load %arg1[%c4, %c0_46] : memref<32x4xf32, #tpu.memory_space<smem>>
    %95 = vector.broadcast %94 : f32 to vector<16x144xf32>
    %96 = arith.mulf %95, %1 : vector<16x144xf32>
    %c4_47 = arith.constant 4 : index
    %c1_48 = arith.constant 1 : index
    %97 = memref.load %arg1[%c4_47, %c1_48] : memref<32x4xf32, #tpu.memory_space<smem>>
    %98 = vector.broadcast %97 : f32 to vector<16x144xf32>
    %99 = arith.mulf %98, %3 : vector<16x144xf32>
    %100 = arith.addf %96, %99 : vector<16x144xf32>
    %c4_49 = arith.constant 4 : index
    %c2_50 = arith.constant 2 : index
    %101 = memref.load %arg1[%c4_49, %c2_50] : memref<32x4xf32, #tpu.memory_space<smem>>
    %102 = vector.broadcast %101 : f32 to vector<16x144xf32>
    %103 = arith.mulf %102, %5 : vector<16x144xf32>
    %104 = arith.addf %100, %103 : vector<16x144xf32>
    %c4_51 = arith.constant 4 : index
    %c3_52 = arith.constant 3 : index
    %105 = memref.load %arg1[%c4_51, %c3_52] : memref<32x4xf32, #tpu.memory_space<smem>>
    %106 = vector.broadcast %105 : f32 to vector<16x144xf32>
    %107 = arith.mulf %106, %7 : vector<16x144xf32>
    %108 = arith.addf %104, %107 : vector<16x144xf32>
    %109 = vector.extract_strided_slice %8 {offsets = [0, 4], sizes = [16, 1], strides = [1, 1]} : vector<16x32xf32> to vector<16x1xf32>
    %cst_53 = arith.constant 0.000000e+00 : f32
    %110 = vector.broadcast %cst_53 : f32 to vector<16x144xf32>
    %111 = arith.maximumf %108, %110 : vector<16x144xf32>
    %112 = vector.broadcast %109 : vector<16x1xf32> to vector<16x144xf32>
    %113 = arith.mulf %112, %111 : vector<16x144xf32>
    %114 = arith.addf %93, %113 : vector<16x144xf32>
    %c5 = arith.constant 5 : index
    %c0_54 = arith.constant 0 : index
    %115 = memref.load %arg1[%c5, %c0_54] : memref<32x4xf32, #tpu.memory_space<smem>>
    %116 = vector.broadcast %115 : f32 to vector<16x144xf32>
    %117 = arith.mulf %116, %1 : vector<16x144xf32>
    %c5_55 = arith.constant 5 : index
    %c1_56 = arith.constant 1 : index
    %118 = memref.load %arg1[%c5_55, %c1_56] : memref<32x4xf32, #tpu.memory_space<smem>>
    %119 = vector.broadcast %118 : f32 to vector<16x144xf32>
    %120 = arith.mulf %119, %3 : vector<16x144xf32>
    %121 = arith.addf %117, %120 : vector<16x144xf32>
    %c5_57 = arith.constant 5 : index
    %c2_58 = arith.constant 2 : index
    %122 = memref.load %arg1[%c5_57, %c2_58] : memref<32x4xf32, #tpu.memory_space<smem>>
    %123 = vector.broadcast %122 : f32 to vector<16x144xf32>
    %124 = arith.mulf %123, %5 : vector<16x144xf32>
    %125 = arith.addf %121, %124 : vector<16x144xf32>
    %c5_59 = arith.constant 5 : index
    %c3_60 = arith.constant 3 : index
    %126 = memref.load %arg1[%c5_59, %c3_60] : memref<32x4xf32, #tpu.memory_space<smem>>
    %127 = vector.broadcast %126 : f32 to vector<16x144xf32>
    %128 = arith.mulf %127, %7 : vector<16x144xf32>
    %129 = arith.addf %125, %128 : vector<16x144xf32>
    %130 = vector.extract_strided_slice %8 {offsets = [0, 5], sizes = [16, 1], strides = [1, 1]} : vector<16x32xf32> to vector<16x1xf32>
    %cst_61 = arith.constant 0.000000e+00 : f32
    %131 = vector.broadcast %cst_61 : f32 to vector<16x144xf32>
    %132 = arith.maximumf %129, %131 : vector<16x144xf32>
    %133 = vector.broadcast %130 : vector<16x1xf32> to vector<16x144xf32>
    %134 = arith.mulf %133, %132 : vector<16x144xf32>
    %135 = arith.addf %114, %134 : vector<16x144xf32>
    %c6 = arith.constant 6 : index
    %c0_62 = arith.constant 0 : index
    %136 = memref.load %arg1[%c6, %c0_62] : memref<32x4xf32, #tpu.memory_space<smem>>
    %137 = vector.broadcast %136 : f32 to vector<16x144xf32>
    %138 = arith.mulf %137, %1 : vector<16x144xf32>
    %c6_63 = arith.constant 6 : index
    %c1_64 = arith.constant 1 : index
    %139 = memref.load %arg1[%c6_63, %c1_64] : memref<32x4xf32, #tpu.memory_space<smem>>
    %140 = vector.broadcast %139 : f32 to vector<16x144xf32>
    %141 = arith.mulf %140, %3 : vector<16x144xf32>
    %142 = arith.addf %138, %141 : vector<16x144xf32>
    %c6_65 = arith.constant 6 : index
    %c2_66 = arith.constant 2 : index
    %143 = memref.load %arg1[%c6_65, %c2_66] : memref<32x4xf32, #tpu.memory_space<smem>>
    %144 = vector.broadcast %143 : f32 to vector<16x144xf32>
    %145 = arith.mulf %144, %5 : vector<16x144xf32>
    %146 = arith.addf %142, %145 : vector<16x144xf32>
    %c6_67 = arith.constant 6 : index
    %c3_68 = arith.constant 3 : index
    %147 = memref.load %arg1[%c6_67, %c3_68] : memref<32x4xf32, #tpu.memory_space<smem>>
    %148 = vector.broadcast %147 : f32 to vector<16x144xf32>
    %149 = arith.mulf %148, %7 : vector<16x144xf32>
    %150 = arith.addf %146, %149 : vector<16x144xf32>
    %151 = vector.extract_strided_slice %8 {offsets = [0, 6], sizes = [16, 1], strides = [1, 1]} : vector<16x32xf32> to vector<16x1xf32>
    %cst_69 = arith.constant 0.000000e+00 : f32
    %152 = vector.broadcast %cst_69 : f32 to vector<16x144xf32>
    %153 = arith.maximumf %150, %152 : vector<16x144xf32>
    %154 = vector.broadcast %151 : vector<16x1xf32> to vector<16x144xf32>
    %155 = arith.mulf %154, %153 : vector<16x144xf32>
    %156 = arith.addf %135, %155 : vector<16x144xf32>
    %c7 = arith.constant 7 : index
    %c0_70 = arith.constant 0 : index
    %157 = memref.load %arg1[%c7, %c0_70] : memref<32x4xf32, #tpu.memory_space<smem>>
    %158 = vector.broadcast %157 : f32 to vector<16x144xf32>
    %159 = arith.mulf %158, %1 : vector<16x144xf32>
    %c7_71 = arith.constant 7 : index
    %c1_72 = arith.constant 1 : index
    %160 = memref.load %arg1[%c7_71, %c1_72] : memref<32x4xf32, #tpu.memory_space<smem>>
    %161 = vector.broadcast %160 : f32 to vector<16x144xf32>
    %162 = arith.mulf %161, %3 : vector<16x144xf32>
    %163 = arith.addf %159, %162 : vector<16x144xf32>
    %c7_73 = arith.constant 7 : index
    %c2_74 = arith.constant 2 : index
    %164 = memref.load %arg1[%c7_73, %c2_74] : memref<32x4xf32, #tpu.memory_space<smem>>
    %165 = vector.broadcast %164 : f32 to vector<16x144xf32>
    %166 = arith.mulf %165, %5 : vector<16x144xf32>
    %167 = arith.addf %163, %166 : vector<16x144xf32>
    %c7_75 = arith.constant 7 : index
    %c3_76 = arith.constant 3 : index
    %168 = memref.load %arg1[%c7_75, %c3_76] : memref<32x4xf32, #tpu.memory_space<smem>>
    %169 = vector.broadcast %168 : f32 to vector<16x144xf32>
    %170 = arith.mulf %169, %7 : vector<16x144xf32>
    %171 = arith.addf %167, %170 : vector<16x144xf32>
    %172 = vector.extract_strided_slice %8 {offsets = [0, 7], sizes = [16, 1], strides = [1, 1]} : vector<16x32xf32> to vector<16x1xf32>
    %cst_77 = arith.constant 0.000000e+00 : f32
    %173 = vector.broadcast %cst_77 : f32 to vector<16x144xf32>
    %174 = arith.maximumf %171, %173 : vector<16x144xf32>
    %175 = vector.broadcast %172 : vector<16x1xf32> to vector<16x144xf32>
    %176 = arith.mulf %175, %174 : vector<16x144xf32>
    %177 = arith.addf %156, %176 : vector<16x144xf32>
    %c8 = arith.constant 8 : index
    %c0_78 = arith.constant 0 : index
    %178 = memref.load %arg1[%c8, %c0_78] : memref<32x4xf32, #tpu.memory_space<smem>>
    %179 = vector.broadcast %178 : f32 to vector<16x144xf32>
    %180 = arith.mulf %179, %1 : vector<16x144xf32>
    %c8_79 = arith.constant 8 : index
    %c1_80 = arith.constant 1 : index
    %181 = memref.load %arg1[%c8_79, %c1_80] : memref<32x4xf32, #tpu.memory_space<smem>>
    %182 = vector.broadcast %181 : f32 to vector<16x144xf32>
    %183 = arith.mulf %182, %3 : vector<16x144xf32>
    %184 = arith.addf %180, %183 : vector<16x144xf32>
    %c8_81 = arith.constant 8 : index
    %c2_82 = arith.constant 2 : index
    %185 = memref.load %arg1[%c8_81, %c2_82] : memref<32x4xf32, #tpu.memory_space<smem>>
    %186 = vector.broadcast %185 : f32 to vector<16x144xf32>
    %187 = arith.mulf %186, %5 : vector<16x144xf32>
    %188 = arith.addf %184, %187 : vector<16x144xf32>
    %c8_83 = arith.constant 8 : index
    %c3_84 = arith.constant 3 : index
    %189 = memref.load %arg1[%c8_83, %c3_84] : memref<32x4xf32, #tpu.memory_space<smem>>
    %190 = vector.broadcast %189 : f32 to vector<16x144xf32>
    %191 = arith.mulf %190, %7 : vector<16x144xf32>
    %192 = arith.addf %188, %191 : vector<16x144xf32>
    %193 = vector.extract_strided_slice %8 {offsets = [0, 8], sizes = [16, 1], strides = [1, 1]} : vector<16x32xf32> to vector<16x1xf32>
    %cst_85 = arith.constant 0.000000e+00 : f32
    %194 = vector.broadcast %cst_85 : f32 to vector<16x144xf32>
    %195 = arith.maximumf %192, %194 : vector<16x144xf32>
    %196 = vector.broadcast %193 : vector<16x1xf32> to vector<16x144xf32>
    %197 = arith.mulf %196, %195 : vector<16x144xf32>
    %198 = arith.addf %177, %197 : vector<16x144xf32>
    %c9 = arith.constant 9 : index
    %c0_86 = arith.constant 0 : index
    %199 = memref.load %arg1[%c9, %c0_86] : memref<32x4xf32, #tpu.memory_space<smem>>
    %200 = vector.broadcast %199 : f32 to vector<16x144xf32>
    %201 = arith.mulf %200, %1 : vector<16x144xf32>
    %c9_87 = arith.constant 9 : index
    %c1_88 = arith.constant 1 : index
    %202 = memref.load %arg1[%c9_87, %c1_88] : memref<32x4xf32, #tpu.memory_space<smem>>
    %203 = vector.broadcast %202 : f32 to vector<16x144xf32>
    %204 = arith.mulf %203, %3 : vector<16x144xf32>
    %205 = arith.addf %201, %204 : vector<16x144xf32>
    %c9_89 = arith.constant 9 : index
    %c2_90 = arith.constant 2 : index
    %206 = memref.load %arg1[%c9_89, %c2_90] : memref<32x4xf32, #tpu.memory_space<smem>>
    %207 = vector.broadcast %206 : f32 to vector<16x144xf32>
    %208 = arith.mulf %207, %5 : vector<16x144xf32>
    %209 = arith.addf %205, %208 : vector<16x144xf32>
    %c9_91 = arith.constant 9 : index
    %c3_92 = arith.constant 3 : index
    %210 = memref.load %arg1[%c9_91, %c3_92] : memref<32x4xf32, #tpu.memory_space<smem>>
    %211 = vector.broadcast %210 : f32 to vector<16x144xf32>
    %212 = arith.mulf %211, %7 : vector<16x144xf32>
    %213 = arith.addf %209, %212 : vector<16x144xf32>
    %214 = vector.extract_strided_slice %8 {offsets = [0, 9], sizes = [16, 1], strides = [1, 1]} : vector<16x32xf32> to vector<16x1xf32>
    %cst_93 = arith.constant 0.000000e+00 : f32
    %215 = vector.broadcast %cst_93 : f32 to vector<16x144xf32>
    %216 = arith.maximumf %213, %215 : vector<16x144xf32>
    %217 = vector.broadcast %214 : vector<16x1xf32> to vector<16x144xf32>
    %218 = arith.mulf %217, %216 : vector<16x144xf32>
    %219 = arith.addf %198, %218 : vector<16x144xf32>
    %c10 = arith.constant 10 : index
    %c0_94 = arith.constant 0 : index
    %220 = memref.load %arg1[%c10, %c0_94] : memref<32x4xf32, #tpu.memory_space<smem>>
    %221 = vector.broadcast %220 : f32 to vector<16x144xf32>
    %222 = arith.mulf %221, %1 : vector<16x144xf32>
    %c10_95 = arith.constant 10 : index
    %c1_96 = arith.constant 1 : index
    %223 = memref.load %arg1[%c10_95, %c1_96] : memref<32x4xf32, #tpu.memory_space<smem>>
    %224 = vector.broadcast %223 : f32 to vector<16x144xf32>
    %225 = arith.mulf %224, %3 : vector<16x144xf32>
    %226 = arith.addf %222, %225 : vector<16x144xf32>
    %c10_97 = arith.constant 10 : index
    %c2_98 = arith.constant 2 : index
    %227 = memref.load %arg1[%c10_97, %c2_98] : memref<32x4xf32, #tpu.memory_space<smem>>
    %228 = vector.broadcast %227 : f32 to vector<16x144xf32>
    %229 = arith.mulf %228, %5 : vector<16x144xf32>
    %230 = arith.addf %226, %229 : vector<16x144xf32>
    %c10_99 = arith.constant 10 : index
    %c3_100 = arith.constant 3 : index
    %231 = memref.load %arg1[%c10_99, %c3_100] : memref<32x4xf32, #tpu.memory_space<smem>>
    %232 = vector.broadcast %231 : f32 to vector<16x144xf32>
    %233 = arith.mulf %232, %7 : vector<16x144xf32>
    %234 = arith.addf %230, %233 : vector<16x144xf32>
    %235 = vector.extract_strided_slice %8 {offsets = [0, 10], sizes = [16, 1], strides = [1, 1]} : vector<16x32xf32> to vector<16x1xf32>
    %cst_101 = arith.constant 0.000000e+00 : f32
    %236 = vector.broadcast %cst_101 : f32 to vector<16x144xf32>
    %237 = arith.maximumf %234, %236 : vector<16x144xf32>
    %238 = vector.broadcast %235 : vector<16x1xf32> to vector<16x144xf32>
    %239 = arith.mulf %238, %237 : vector<16x144xf32>
    %240 = arith.addf %219, %239 : vector<16x144xf32>
    %c11 = arith.constant 11 : index
    %c0_102 = arith.constant 0 : index
    %241 = memref.load %arg1[%c11, %c0_102] : memref<32x4xf32, #tpu.memory_space<smem>>
    %242 = vector.broadcast %241 : f32 to vector<16x144xf32>
    %243 = arith.mulf %242, %1 : vector<16x144xf32>
    %c11_103 = arith.constant 11 : index
    %c1_104 = arith.constant 1 : index
    %244 = memref.load %arg1[%c11_103, %c1_104] : memref<32x4xf32, #tpu.memory_space<smem>>
    %245 = vector.broadcast %244 : f32 to vector<16x144xf32>
    %246 = arith.mulf %245, %3 : vector<16x144xf32>
    %247 = arith.addf %243, %246 : vector<16x144xf32>
    %c11_105 = arith.constant 11 : index
    %c2_106 = arith.constant 2 : index
    %248 = memref.load %arg1[%c11_105, %c2_106] : memref<32x4xf32, #tpu.memory_space<smem>>
    %249 = vector.broadcast %248 : f32 to vector<16x144xf32>
    %250 = arith.mulf %249, %5 : vector<16x144xf32>
    %251 = arith.addf %247, %250 : vector<16x144xf32>
    %c11_107 = arith.constant 11 : index
    %c3_108 = arith.constant 3 : index
    %252 = memref.load %arg1[%c11_107, %c3_108] : memref<32x4xf32, #tpu.memory_space<smem>>
    %253 = vector.broadcast %252 : f32 to vector<16x144xf32>
    %254 = arith.mulf %253, %7 : vector<16x144xf32>
    %255 = arith.addf %251, %254 : vector<16x144xf32>
    %256 = vector.extract_strided_slice %8 {offsets = [0, 11], sizes = [16, 1], strides = [1, 1]} : vector<16x32xf32> to vector<16x1xf32>
    %cst_109 = arith.constant 0.000000e+00 : f32
    %257 = vector.broadcast %cst_109 : f32 to vector<16x144xf32>
    %258 = arith.maximumf %255, %257 : vector<16x144xf32>
    %259 = vector.broadcast %256 : vector<16x1xf32> to vector<16x144xf32>
    %260 = arith.mulf %259, %258 : vector<16x144xf32>
    %261 = arith.addf %240, %260 : vector<16x144xf32>
    %c12 = arith.constant 12 : index
    %c0_110 = arith.constant 0 : index
    %262 = memref.load %arg1[%c12, %c0_110] : memref<32x4xf32, #tpu.memory_space<smem>>
    %263 = vector.broadcast %262 : f32 to vector<16x144xf32>
    %264 = arith.mulf %263, %1 : vector<16x144xf32>
    %c12_111 = arith.constant 12 : index
    %c1_112 = arith.constant 1 : index
    %265 = memref.load %arg1[%c12_111, %c1_112] : memref<32x4xf32, #tpu.memory_space<smem>>
    %266 = vector.broadcast %265 : f32 to vector<16x144xf32>
    %267 = arith.mulf %266, %3 : vector<16x144xf32>
    %268 = arith.addf %264, %267 : vector<16x144xf32>
    %c12_113 = arith.constant 12 : index
    %c2_114 = arith.constant 2 : index
    %269 = memref.load %arg1[%c12_113, %c2_114] : memref<32x4xf32, #tpu.memory_space<smem>>
    %270 = vector.broadcast %269 : f32 to vector<16x144xf32>
    %271 = arith.mulf %270, %5 : vector<16x144xf32>
    %272 = arith.addf %268, %271 : vector<16x144xf32>
    %c12_115 = arith.constant 12 : index
    %c3_116 = arith.constant 3 : index
    %273 = memref.load %arg1[%c12_115, %c3_116] : memref<32x4xf32, #tpu.memory_space<smem>>
    %274 = vector.broadcast %273 : f32 to vector<16x144xf32>
    %275 = arith.mulf %274, %7 : vector<16x144xf32>
    %276 = arith.addf %272, %275 : vector<16x144xf32>
    %277 = vector.extract_strided_slice %8 {offsets = [0, 12], sizes = [16, 1], strides = [1, 1]} : vector<16x32xf32> to vector<16x1xf32>
    %cst_117 = arith.constant 0.000000e+00 : f32
    %278 = vector.broadcast %cst_117 : f32 to vector<16x144xf32>
    %279 = arith.maximumf %276, %278 : vector<16x144xf32>
    %280 = vector.broadcast %277 : vector<16x1xf32> to vector<16x144xf32>
    %281 = arith.mulf %280, %279 : vector<16x144xf32>
    %282 = arith.addf %261, %281 : vector<16x144xf32>
    %c13 = arith.constant 13 : index
    %c0_118 = arith.constant 0 : index
    %283 = memref.load %arg1[%c13, %c0_118] : memref<32x4xf32, #tpu.memory_space<smem>>
    %284 = vector.broadcast %283 : f32 to vector<16x144xf32>
    %285 = arith.mulf %284, %1 : vector<16x144xf32>
    %c13_119 = arith.constant 13 : index
    %c1_120 = arith.constant 1 : index
    %286 = memref.load %arg1[%c13_119, %c1_120] : memref<32x4xf32, #tpu.memory_space<smem>>
    %287 = vector.broadcast %286 : f32 to vector<16x144xf32>
    %288 = arith.mulf %287, %3 : vector<16x144xf32>
    %289 = arith.addf %285, %288 : vector<16x144xf32>
    %c13_121 = arith.constant 13 : index
    %c2_122 = arith.constant 2 : index
    %290 = memref.load %arg1[%c13_121, %c2_122] : memref<32x4xf32, #tpu.memory_space<smem>>
    %291 = vector.broadcast %290 : f32 to vector<16x144xf32>
    %292 = arith.mulf %291, %5 : vector<16x144xf32>
    %293 = arith.addf %289, %292 : vector<16x144xf32>
    %c13_123 = arith.constant 13 : index
    %c3_124 = arith.constant 3 : index
    %294 = memref.load %arg1[%c13_123, %c3_124] : memref<32x4xf32, #tpu.memory_space<smem>>
    %295 = vector.broadcast %294 : f32 to vector<16x144xf32>
    %296 = arith.mulf %295, %7 : vector<16x144xf32>
    %297 = arith.addf %293, %296 : vector<16x144xf32>
    %298 = vector.extract_strided_slice %8 {offsets = [0, 13], sizes = [16, 1], strides = [1, 1]} : vector<16x32xf32> to vector<16x1xf32>
    %cst_125 = arith.constant 0.000000e+00 : f32
    %299 = vector.broadcast %cst_125 : f32 to vector<16x144xf32>
    %300 = arith.maximumf %297, %299 : vector<16x144xf32>
    %301 = vector.broadcast %298 : vector<16x1xf32> to vector<16x144xf32>
    %302 = arith.mulf %301, %300 : vector<16x144xf32>
    %303 = arith.addf %282, %302 : vector<16x144xf32>
    %c14 = arith.constant 14 : index
    %c0_126 = arith.constant 0 : index
    %304 = memref.load %arg1[%c14, %c0_126] : memref<32x4xf32, #tpu.memory_space<smem>>
    %305 = vector.broadcast %304 : f32 to vector<16x144xf32>
    %306 = arith.mulf %305, %1 : vector<16x144xf32>
    %c14_127 = arith.constant 14 : index
    %c1_128 = arith.constant 1 : index
    %307 = memref.load %arg1[%c14_127, %c1_128] : memref<32x4xf32, #tpu.memory_space<smem>>
    %308 = vector.broadcast %307 : f32 to vector<16x144xf32>
    %309 = arith.mulf %308, %3 : vector<16x144xf32>
    %310 = arith.addf %306, %309 : vector<16x144xf32>
    %c14_129 = arith.constant 14 : index
    %c2_130 = arith.constant 2 : index
    %311 = memref.load %arg1[%c14_129, %c2_130] : memref<32x4xf32, #tpu.memory_space<smem>>
    %312 = vector.broadcast %311 : f32 to vector<16x144xf32>
    %313 = arith.mulf %312, %5 : vector<16x144xf32>
    %314 = arith.addf %310, %313 : vector<16x144xf32>
    %c14_131 = arith.constant 14 : index
    %c3_132 = arith.constant 3 : index
    %315 = memref.load %arg1[%c14_131, %c3_132] : memref<32x4xf32, #tpu.memory_space<smem>>
    %316 = vector.broadcast %315 : f32 to vector<16x144xf32>
    %317 = arith.mulf %316, %7 : vector<16x144xf32>
    %318 = arith.addf %314, %317 : vector<16x144xf32>
    %319 = vector.extract_strided_slice %8 {offsets = [0, 14], sizes = [16, 1], strides = [1, 1]} : vector<16x32xf32> to vector<16x1xf32>
    %cst_133 = arith.constant 0.000000e+00 : f32
    %320 = vector.broadcast %cst_133 : f32 to vector<16x144xf32>
    %321 = arith.maximumf %318, %320 : vector<16x144xf32>
    %322 = vector.broadcast %319 : vector<16x1xf32> to vector<16x144xf32>
    %323 = arith.mulf %322, %321 : vector<16x144xf32>
    %324 = arith.addf %303, %323 : vector<16x144xf32>
    %c15 = arith.constant 15 : index
    %c0_134 = arith.constant 0 : index
    %325 = memref.load %arg1[%c15, %c0_134] : memref<32x4xf32, #tpu.memory_space<smem>>
    %326 = vector.broadcast %325 : f32 to vector<16x144xf32>
    %327 = arith.mulf %326, %1 : vector<16x144xf32>
    %c15_135 = arith.constant 15 : index
    %c1_136 = arith.constant 1 : index
    %328 = memref.load %arg1[%c15_135, %c1_136] : memref<32x4xf32, #tpu.memory_space<smem>>
    %329 = vector.broadcast %328 : f32 to vector<16x144xf32>
    %330 = arith.mulf %329, %3 : vector<16x144xf32>
    %331 = arith.addf %327, %330 : vector<16x144xf32>
    %c15_137 = arith.constant 15 : index
    %c2_138 = arith.constant 2 : index
    %332 = memref.load %arg1[%c15_137, %c2_138] : memref<32x4xf32, #tpu.memory_space<smem>>
    %333 = vector.broadcast %332 : f32 to vector<16x144xf32>
    %334 = arith.mulf %333, %5 : vector<16x144xf32>
    %335 = arith.addf %331, %334 : vector<16x144xf32>
    %c15_139 = arith.constant 15 : index
    %c3_140 = arith.constant 3 : index
    %336 = memref.load %arg1[%c15_139, %c3_140] : memref<32x4xf32, #tpu.memory_space<smem>>
    %337 = vector.broadcast %336 : f32 to vector<16x144xf32>
    %338 = arith.mulf %337, %7 : vector<16x144xf32>
    %339 = arith.addf %335, %338 : vector<16x144xf32>
    %340 = vector.extract_strided_slice %8 {offsets = [0, 15], sizes = [16, 1], strides = [1, 1]} : vector<16x32xf32> to vector<16x1xf32>
    %cst_141 = arith.constant 0.000000e+00 : f32
    %341 = vector.broadcast %cst_141 : f32 to vector<16x144xf32>
    %342 = arith.maximumf %339, %341 : vector<16x144xf32>
    %343 = vector.broadcast %340 : vector<16x1xf32> to vector<16x144xf32>
    %344 = arith.mulf %343, %342 : vector<16x144xf32>
    %345 = arith.addf %324, %344 : vector<16x144xf32>
    %c16 = arith.constant 16 : index
    %c0_142 = arith.constant 0 : index
    %346 = memref.load %arg1[%c16, %c0_142] : memref<32x4xf32, #tpu.memory_space<smem>>
    %347 = vector.broadcast %346 : f32 to vector<16x144xf32>
    %348 = arith.mulf %347, %1 : vector<16x144xf32>
    %c16_143 = arith.constant 16 : index
    %c1_144 = arith.constant 1 : index
    %349 = memref.load %arg1[%c16_143, %c1_144] : memref<32x4xf32, #tpu.memory_space<smem>>
    %350 = vector.broadcast %349 : f32 to vector<16x144xf32>
    %351 = arith.mulf %350, %3 : vector<16x144xf32>
    %352 = arith.addf %348, %351 : vector<16x144xf32>
    %c16_145 = arith.constant 16 : index
    %c2_146 = arith.constant 2 : index
    %353 = memref.load %arg1[%c16_145, %c2_146] : memref<32x4xf32, #tpu.memory_space<smem>>
    %354 = vector.broadcast %353 : f32 to vector<16x144xf32>
    %355 = arith.mulf %354, %5 : vector<16x144xf32>
    %356 = arith.addf %352, %355 : vector<16x144xf32>
    %c16_147 = arith.constant 16 : index
    %c3_148 = arith.constant 3 : index
    %357 = memref.load %arg1[%c16_147, %c3_148] : memref<32x4xf32, #tpu.memory_space<smem>>
    %358 = vector.broadcast %357 : f32 to vector<16x144xf32>
    %359 = arith.mulf %358, %7 : vector<16x144xf32>
    %360 = arith.addf %356, %359 : vector<16x144xf32>
    %361 = vector.extract_strided_slice %8 {offsets = [0, 16], sizes = [16, 1], strides = [1, 1]} : vector<16x32xf32> to vector<16x1xf32>
    %cst_149 = arith.constant 0.000000e+00 : f32
    %362 = vector.broadcast %cst_149 : f32 to vector<16x144xf32>
    %363 = arith.maximumf %360, %362 : vector<16x144xf32>
    %364 = vector.broadcast %361 : vector<16x1xf32> to vector<16x144xf32>
    %365 = arith.mulf %364, %363 : vector<16x144xf32>
    %366 = arith.addf %345, %365 : vector<16x144xf32>
    %c17 = arith.constant 17 : index
    %c0_150 = arith.constant 0 : index
    %367 = memref.load %arg1[%c17, %c0_150] : memref<32x4xf32, #tpu.memory_space<smem>>
    %368 = vector.broadcast %367 : f32 to vector<16x144xf32>
    %369 = arith.mulf %368, %1 : vector<16x144xf32>
    %c17_151 = arith.constant 17 : index
    %c1_152 = arith.constant 1 : index
    %370 = memref.load %arg1[%c17_151, %c1_152] : memref<32x4xf32, #tpu.memory_space<smem>>
    %371 = vector.broadcast %370 : f32 to vector<16x144xf32>
    %372 = arith.mulf %371, %3 : vector<16x144xf32>
    %373 = arith.addf %369, %372 : vector<16x144xf32>
    %c17_153 = arith.constant 17 : index
    %c2_154 = arith.constant 2 : index
    %374 = memref.load %arg1[%c17_153, %c2_154] : memref<32x4xf32, #tpu.memory_space<smem>>
    %375 = vector.broadcast %374 : f32 to vector<16x144xf32>
    %376 = arith.mulf %375, %5 : vector<16x144xf32>
    %377 = arith.addf %373, %376 : vector<16x144xf32>
    %c17_155 = arith.constant 17 : index
    %c3_156 = arith.constant 3 : index
    %378 = memref.load %arg1[%c17_155, %c3_156] : memref<32x4xf32, #tpu.memory_space<smem>>
    %379 = vector.broadcast %378 : f32 to vector<16x144xf32>
    %380 = arith.mulf %379, %7 : vector<16x144xf32>
    %381 = arith.addf %377, %380 : vector<16x144xf32>
    %382 = vector.extract_strided_slice %8 {offsets = [0, 17], sizes = [16, 1], strides = [1, 1]} : vector<16x32xf32> to vector<16x1xf32>
    %cst_157 = arith.constant 0.000000e+00 : f32
    %383 = vector.broadcast %cst_157 : f32 to vector<16x144xf32>
    %384 = arith.maximumf %381, %383 : vector<16x144xf32>
    %385 = vector.broadcast %382 : vector<16x1xf32> to vector<16x144xf32>
    %386 = arith.mulf %385, %384 : vector<16x144xf32>
    %387 = arith.addf %366, %386 : vector<16x144xf32>
    %c18 = arith.constant 18 : index
    %c0_158 = arith.constant 0 : index
    %388 = memref.load %arg1[%c18, %c0_158] : memref<32x4xf32, #tpu.memory_space<smem>>
    %389 = vector.broadcast %388 : f32 to vector<16x144xf32>
    %390 = arith.mulf %389, %1 : vector<16x144xf32>
    %c18_159 = arith.constant 18 : index
    %c1_160 = arith.constant 1 : index
    %391 = memref.load %arg1[%c18_159, %c1_160] : memref<32x4xf32, #tpu.memory_space<smem>>
    %392 = vector.broadcast %391 : f32 to vector<16x144xf32>
    %393 = arith.mulf %392, %3 : vector<16x144xf32>
    %394 = arith.addf %390, %393 : vector<16x144xf32>
    %c18_161 = arith.constant 18 : index
    %c2_162 = arith.constant 2 : index
    %395 = memref.load %arg1[%c18_161, %c2_162] : memref<32x4xf32, #tpu.memory_space<smem>>
    %396 = vector.broadcast %395 : f32 to vector<16x144xf32>
    %397 = arith.mulf %396, %5 : vector<16x144xf32>
    %398 = arith.addf %394, %397 : vector<16x144xf32>
    %c18_163 = arith.constant 18 : index
    %c3_164 = arith.constant 3 : index
    %399 = memref.load %arg1[%c18_163, %c3_164] : memref<32x4xf32, #tpu.memory_space<smem>>
    %400 = vector.broadcast %399 : f32 to vector<16x144xf32>
    %401 = arith.mulf %400, %7 : vector<16x144xf32>
    %402 = arith.addf %398, %401 : vector<16x144xf32>
    %403 = vector.extract_strided_slice %8 {offsets = [0, 18], sizes = [16, 1], strides = [1, 1]} : vector<16x32xf32> to vector<16x1xf32>
    %cst_165 = arith.constant 0.000000e+00 : f32
    %404 = vector.broadcast %cst_165 : f32 to vector<16x144xf32>
    %405 = arith.maximumf %402, %404 : vector<16x144xf32>
    %406 = vector.broadcast %403 : vector<16x1xf32> to vector<16x144xf32>
    %407 = arith.mulf %406, %405 : vector<16x144xf32>
    %408 = arith.addf %387, %407 : vector<16x144xf32>
    %c19 = arith.constant 19 : index
    %c0_166 = arith.constant 0 : index
    %409 = memref.load %arg1[%c19, %c0_166] : memref<32x4xf32, #tpu.memory_space<smem>>
    %410 = vector.broadcast %409 : f32 to vector<16x144xf32>
    %411 = arith.mulf %410, %1 : vector<16x144xf32>
    %c19_167 = arith.constant 19 : index
    %c1_168 = arith.constant 1 : index
    %412 = memref.load %arg1[%c19_167, %c1_168] : memref<32x4xf32, #tpu.memory_space<smem>>
    %413 = vector.broadcast %412 : f32 to vector<16x144xf32>
    %414 = arith.mulf %413, %3 : vector<16x144xf32>
    %415 = arith.addf %411, %414 : vector<16x144xf32>
    %c19_169 = arith.constant 19 : index
    %c2_170 = arith.constant 2 : index
    %416 = memref.load %arg1[%c19_169, %c2_170] : memref<32x4xf32, #tpu.memory_space<smem>>
    %417 = vector.broadcast %416 : f32 to vector<16x144xf32>
    %418 = arith.mulf %417, %5 : vector<16x144xf32>
    %419 = arith.addf %415, %418 : vector<16x144xf32>
    %c19_171 = arith.constant 19 : index
    %c3_172 = arith.constant 3 : index
    %420 = memref.load %arg1[%c19_171, %c3_172] : memref<32x4xf32, #tpu.memory_space<smem>>
    %421 = vector.broadcast %420 : f32 to vector<16x144xf32>
    %422 = arith.mulf %421, %7 : vector<16x144xf32>
    %423 = arith.addf %419, %422 : vector<16x144xf32>
    %424 = vector.extract_strided_slice %8 {offsets = [0, 19], sizes = [16, 1], strides = [1, 1]} : vector<16x32xf32> to vector<16x1xf32>
    %cst_173 = arith.constant 0.000000e+00 : f32
    %425 = vector.broadcast %cst_173 : f32 to vector<16x144xf32>
    %426 = arith.maximumf %423, %425 : vector<16x144xf32>
    %427 = vector.broadcast %424 : vector<16x1xf32> to vector<16x144xf32>
    %428 = arith.mulf %427, %426 : vector<16x144xf32>
    %429 = arith.addf %408, %428 : vector<16x144xf32>
    %c20 = arith.constant 20 : index
    %c0_174 = arith.constant 0 : index
    %430 = memref.load %arg1[%c20, %c0_174] : memref<32x4xf32, #tpu.memory_space<smem>>
    %431 = vector.broadcast %430 : f32 to vector<16x144xf32>
    %432 = arith.mulf %431, %1 : vector<16x144xf32>
    %c20_175 = arith.constant 20 : index
    %c1_176 = arith.constant 1 : index
    %433 = memref.load %arg1[%c20_175, %c1_176] : memref<32x4xf32, #tpu.memory_space<smem>>
    %434 = vector.broadcast %433 : f32 to vector<16x144xf32>
    %435 = arith.mulf %434, %3 : vector<16x144xf32>
    %436 = arith.addf %432, %435 : vector<16x144xf32>
    %c20_177 = arith.constant 20 : index
    %c2_178 = arith.constant 2 : index
    %437 = memref.load %arg1[%c20_177, %c2_178] : memref<32x4xf32, #tpu.memory_space<smem>>
    %438 = vector.broadcast %437 : f32 to vector<16x144xf32>
    %439 = arith.mulf %438, %5 : vector<16x144xf32>
    %440 = arith.addf %436, %439 : vector<16x144xf32>
    %c20_179 = arith.constant 20 : index
    %c3_180 = arith.constant 3 : index
    %441 = memref.load %arg1[%c20_179, %c3_180] : memref<32x4xf32, #tpu.memory_space<smem>>
    %442 = vector.broadcast %441 : f32 to vector<16x144xf32>
    %443 = arith.mulf %442, %7 : vector<16x144xf32>
    %444 = arith.addf %440, %443 : vector<16x144xf32>
    %445 = vector.extract_strided_slice %8 {offsets = [0, 20], sizes = [16, 1], strides = [1, 1]} : vector<16x32xf32> to vector<16x1xf32>
    %cst_181 = arith.constant 0.000000e+00 : f32
    %446 = vector.broadcast %cst_181 : f32 to vector<16x144xf32>
    %447 = arith.maximumf %444, %446 : vector<16x144xf32>
    %448 = vector.broadcast %445 : vector<16x1xf32> to vector<16x144xf32>
    %449 = arith.mulf %448, %447 : vector<16x144xf32>
    %450 = arith.addf %429, %449 : vector<16x144xf32>
    %c21 = arith.constant 21 : index
    %c0_182 = arith.constant 0 : index
    %451 = memref.load %arg1[%c21, %c0_182] : memref<32x4xf32, #tpu.memory_space<smem>>
    %452 = vector.broadcast %451 : f32 to vector<16x144xf32>
    %453 = arith.mulf %452, %1 : vector<16x144xf32>
    %c21_183 = arith.constant 21 : index
    %c1_184 = arith.constant 1 : index
    %454 = memref.load %arg1[%c21_183, %c1_184] : memref<32x4xf32, #tpu.memory_space<smem>>
    %455 = vector.broadcast %454 : f32 to vector<16x144xf32>
    %456 = arith.mulf %455, %3 : vector<16x144xf32>
    %457 = arith.addf %453, %456 : vector<16x144xf32>
    %c21_185 = arith.constant 21 : index
    %c2_186 = arith.constant 2 : index
    %458 = memref.load %arg1[%c21_185, %c2_186] : memref<32x4xf32, #tpu.memory_space<smem>>
    %459 = vector.broadcast %458 : f32 to vector<16x144xf32>
    %460 = arith.mulf %459, %5 : vector<16x144xf32>
    %461 = arith.addf %457, %460 : vector<16x144xf32>
    %c21_187 = arith.constant 21 : index
    %c3_188 = arith.constant 3 : index
    %462 = memref.load %arg1[%c21_187, %c3_188] : memref<32x4xf32, #tpu.memory_space<smem>>
    %463 = vector.broadcast %462 : f32 to vector<16x144xf32>
    %464 = arith.mulf %463, %7 : vector<16x144xf32>
    %465 = arith.addf %461, %464 : vector<16x144xf32>
    %466 = vector.extract_strided_slice %8 {offsets = [0, 21], sizes = [16, 1], strides = [1, 1]} : vector<16x32xf32> to vector<16x1xf32>
    %cst_189 = arith.constant 0.000000e+00 : f32
    %467 = vector.broadcast %cst_189 : f32 to vector<16x144xf32>
    %468 = arith.maximumf %465, %467 : vector<16x144xf32>
    %469 = vector.broadcast %466 : vector<16x1xf32> to vector<16x144xf32>
    %470 = arith.mulf %469, %468 : vector<16x144xf32>
    %471 = arith.addf %450, %470 : vector<16x144xf32>
    %c22 = arith.constant 22 : index
    %c0_190 = arith.constant 0 : index
    %472 = memref.load %arg1[%c22, %c0_190] : memref<32x4xf32, #tpu.memory_space<smem>>
    %473 = vector.broadcast %472 : f32 to vector<16x144xf32>
    %474 = arith.mulf %473, %1 : vector<16x144xf32>
    %c22_191 = arith.constant 22 : index
    %c1_192 = arith.constant 1 : index
    %475 = memref.load %arg1[%c22_191, %c1_192] : memref<32x4xf32, #tpu.memory_space<smem>>
    %476 = vector.broadcast %475 : f32 to vector<16x144xf32>
    %477 = arith.mulf %476, %3 : vector<16x144xf32>
    %478 = arith.addf %474, %477 : vector<16x144xf32>
    %c22_193 = arith.constant 22 : index
    %c2_194 = arith.constant 2 : index
    %479 = memref.load %arg1[%c22_193, %c2_194] : memref<32x4xf32, #tpu.memory_space<smem>>
    %480 = vector.broadcast %479 : f32 to vector<16x144xf32>
    %481 = arith.mulf %480, %5 : vector<16x144xf32>
    %482 = arith.addf %478, %481 : vector<16x144xf32>
    %c22_195 = arith.constant 22 : index
    %c3_196 = arith.constant 3 : index
    %483 = memref.load %arg1[%c22_195, %c3_196] : memref<32x4xf32, #tpu.memory_space<smem>>
    %484 = vector.broadcast %483 : f32 to vector<16x144xf32>
    %485 = arith.mulf %484, %7 : vector<16x144xf32>
    %486 = arith.addf %482, %485 : vector<16x144xf32>
    %487 = vector.extract_strided_slice %8 {offsets = [0, 22], sizes = [16, 1], strides = [1, 1]} : vector<16x32xf32> to vector<16x1xf32>
    %cst_197 = arith.constant 0.000000e+00 : f32
    %488 = vector.broadcast %cst_197 : f32 to vector<16x144xf32>
    %489 = arith.maximumf %486, %488 : vector<16x144xf32>
    %490 = vector.broadcast %487 : vector<16x1xf32> to vector<16x144xf32>
    %491 = arith.mulf %490, %489 : vector<16x144xf32>
    %492 = arith.addf %471, %491 : vector<16x144xf32>
    %c23 = arith.constant 23 : index
    %c0_198 = arith.constant 0 : index
    %493 = memref.load %arg1[%c23, %c0_198] : memref<32x4xf32, #tpu.memory_space<smem>>
    %494 = vector.broadcast %493 : f32 to vector<16x144xf32>
    %495 = arith.mulf %494, %1 : vector<16x144xf32>
    %c23_199 = arith.constant 23 : index
    %c1_200 = arith.constant 1 : index
    %496 = memref.load %arg1[%c23_199, %c1_200] : memref<32x4xf32, #tpu.memory_space<smem>>
    %497 = vector.broadcast %496 : f32 to vector<16x144xf32>
    %498 = arith.mulf %497, %3 : vector<16x144xf32>
    %499 = arith.addf %495, %498 : vector<16x144xf32>
    %c23_201 = arith.constant 23 : index
    %c2_202 = arith.constant 2 : index
    %500 = memref.load %arg1[%c23_201, %c2_202] : memref<32x4xf32, #tpu.memory_space<smem>>
    %501 = vector.broadcast %500 : f32 to vector<16x144xf32>
    %502 = arith.mulf %501, %5 : vector<16x144xf32>
    %503 = arith.addf %499, %502 : vector<16x144xf32>
    %c23_203 = arith.constant 23 : index
    %c3_204 = arith.constant 3 : index
    %504 = memref.load %arg1[%c23_203, %c3_204] : memref<32x4xf32, #tpu.memory_space<smem>>
    %505 = vector.broadcast %504 : f32 to vector<16x144xf32>
    %506 = arith.mulf %505, %7 : vector<16x144xf32>
    %507 = arith.addf %503, %506 : vector<16x144xf32>
    %508 = vector.extract_strided_slice %8 {offsets = [0, 23], sizes = [16, 1], strides = [1, 1]} : vector<16x32xf32> to vector<16x1xf32>
    %cst_205 = arith.constant 0.000000e+00 : f32
    %509 = vector.broadcast %cst_205 : f32 to vector<16x144xf32>
    %510 = arith.maximumf %507, %509 : vector<16x144xf32>
    %511 = vector.broadcast %508 : vector<16x1xf32> to vector<16x144xf32>
    %512 = arith.mulf %511, %510 : vector<16x144xf32>
    %513 = arith.addf %492, %512 : vector<16x144xf32>
    %c24 = arith.constant 24 : index
    %c0_206 = arith.constant 0 : index
    %514 = memref.load %arg1[%c24, %c0_206] : memref<32x4xf32, #tpu.memory_space<smem>>
    %515 = vector.broadcast %514 : f32 to vector<16x144xf32>
    %516 = arith.mulf %515, %1 : vector<16x144xf32>
    %c24_207 = arith.constant 24 : index
    %c1_208 = arith.constant 1 : index
    %517 = memref.load %arg1[%c24_207, %c1_208] : memref<32x4xf32, #tpu.memory_space<smem>>
    %518 = vector.broadcast %517 : f32 to vector<16x144xf32>
    %519 = arith.mulf %518, %3 : vector<16x144xf32>
    %520 = arith.addf %516, %519 : vector<16x144xf32>
    %c24_209 = arith.constant 24 : index
    %c2_210 = arith.constant 2 : index
    %521 = memref.load %arg1[%c24_209, %c2_210] : memref<32x4xf32, #tpu.memory_space<smem>>
    %522 = vector.broadcast %521 : f32 to vector<16x144xf32>
    %523 = arith.mulf %522, %5 : vector<16x144xf32>
    %524 = arith.addf %520, %523 : vector<16x144xf32>
    %c24_211 = arith.constant 24 : index
    %c3_212 = arith.constant 3 : index
    %525 = memref.load %arg1[%c24_211, %c3_212] : memref<32x4xf32, #tpu.memory_space<smem>>
    %526 = vector.broadcast %525 : f32 to vector<16x144xf32>
    %527 = arith.mulf %526, %7 : vector<16x144xf32>
    %528 = arith.addf %524, %527 : vector<16x144xf32>
    %529 = vector.extract_strided_slice %8 {offsets = [0, 24], sizes = [16, 1], strides = [1, 1]} : vector<16x32xf32> to vector<16x1xf32>
    %cst_213 = arith.constant 0.000000e+00 : f32
    %530 = vector.broadcast %cst_213 : f32 to vector<16x144xf32>
    %531 = arith.maximumf %528, %530 : vector<16x144xf32>
    %532 = vector.broadcast %529 : vector<16x1xf32> to vector<16x144xf32>
    %533 = arith.mulf %532, %531 : vector<16x144xf32>
    %534 = arith.addf %513, %533 : vector<16x144xf32>
    %c25 = arith.constant 25 : index
    %c0_214 = arith.constant 0 : index
    %535 = memref.load %arg1[%c25, %c0_214] : memref<32x4xf32, #tpu.memory_space<smem>>
    %536 = vector.broadcast %535 : f32 to vector<16x144xf32>
    %537 = arith.mulf %536, %1 : vector<16x144xf32>
    %c25_215 = arith.constant 25 : index
    %c1_216 = arith.constant 1 : index
    %538 = memref.load %arg1[%c25_215, %c1_216] : memref<32x4xf32, #tpu.memory_space<smem>>
    %539 = vector.broadcast %538 : f32 to vector<16x144xf32>
    %540 = arith.mulf %539, %3 : vector<16x144xf32>
    %541 = arith.addf %537, %540 : vector<16x144xf32>
    %c25_217 = arith.constant 25 : index
    %c2_218 = arith.constant 2 : index
    %542 = memref.load %arg1[%c25_217, %c2_218] : memref<32x4xf32, #tpu.memory_space<smem>>
    %543 = vector.broadcast %542 : f32 to vector<16x144xf32>
    %544 = arith.mulf %543, %5 : vector<16x144xf32>
    %545 = arith.addf %541, %544 : vector<16x144xf32>
    %c25_219 = arith.constant 25 : index
    %c3_220 = arith.constant 3 : index
    %546 = memref.load %arg1[%c25_219, %c3_220] : memref<32x4xf32, #tpu.memory_space<smem>>
    %547 = vector.broadcast %546 : f32 to vector<16x144xf32>
    %548 = arith.mulf %547, %7 : vector<16x144xf32>
    %549 = arith.addf %545, %548 : vector<16x144xf32>
    %550 = vector.extract_strided_slice %8 {offsets = [0, 25], sizes = [16, 1], strides = [1, 1]} : vector<16x32xf32> to vector<16x1xf32>
    %cst_221 = arith.constant 0.000000e+00 : f32
    %551 = vector.broadcast %cst_221 : f32 to vector<16x144xf32>
    %552 = arith.maximumf %549, %551 : vector<16x144xf32>
    %553 = vector.broadcast %550 : vector<16x1xf32> to vector<16x144xf32>
    %554 = arith.mulf %553, %552 : vector<16x144xf32>
    %555 = arith.addf %534, %554 : vector<16x144xf32>
    %c26 = arith.constant 26 : index
    %c0_222 = arith.constant 0 : index
    %556 = memref.load %arg1[%c26, %c0_222] : memref<32x4xf32, #tpu.memory_space<smem>>
    %557 = vector.broadcast %556 : f32 to vector<16x144xf32>
    %558 = arith.mulf %557, %1 : vector<16x144xf32>
    %c26_223 = arith.constant 26 : index
    %c1_224 = arith.constant 1 : index
    %559 = memref.load %arg1[%c26_223, %c1_224] : memref<32x4xf32, #tpu.memory_space<smem>>
    %560 = vector.broadcast %559 : f32 to vector<16x144xf32>
    %561 = arith.mulf %560, %3 : vector<16x144xf32>
    %562 = arith.addf %558, %561 : vector<16x144xf32>
    %c26_225 = arith.constant 26 : index
    %c2_226 = arith.constant 2 : index
    %563 = memref.load %arg1[%c26_225, %c2_226] : memref<32x4xf32, #tpu.memory_space<smem>>
    %564 = vector.broadcast %563 : f32 to vector<16x144xf32>
    %565 = arith.mulf %564, %5 : vector<16x144xf32>
    %566 = arith.addf %562, %565 : vector<16x144xf32>
    %c26_227 = arith.constant 26 : index
    %c3_228 = arith.constant 3 : index
    %567 = memref.load %arg1[%c26_227, %c3_228] : memref<32x4xf32, #tpu.memory_space<smem>>
    %568 = vector.broadcast %567 : f32 to vector<16x144xf32>
    %569 = arith.mulf %568, %7 : vector<16x144xf32>
    %570 = arith.addf %566, %569 : vector<16x144xf32>
    %571 = vector.extract_strided_slice %8 {offsets = [0, 26], sizes = [16, 1], strides = [1, 1]} : vector<16x32xf32> to vector<16x1xf32>
    %cst_229 = arith.constant 0.000000e+00 : f32
    %572 = vector.broadcast %cst_229 : f32 to vector<16x144xf32>
    %573 = arith.maximumf %570, %572 : vector<16x144xf32>
    %574 = vector.broadcast %571 : vector<16x1xf32> to vector<16x144xf32>
    %575 = arith.mulf %574, %573 : vector<16x144xf32>
    %576 = arith.addf %555, %575 : vector<16x144xf32>
    %c27 = arith.constant 27 : index
    %c0_230 = arith.constant 0 : index
    %577 = memref.load %arg1[%c27, %c0_230] : memref<32x4xf32, #tpu.memory_space<smem>>
    %578 = vector.broadcast %577 : f32 to vector<16x144xf32>
    %579 = arith.mulf %578, %1 : vector<16x144xf32>
    %c27_231 = arith.constant 27 : index
    %c1_232 = arith.constant 1 : index
    %580 = memref.load %arg1[%c27_231, %c1_232] : memref<32x4xf32, #tpu.memory_space<smem>>
    %581 = vector.broadcast %580 : f32 to vector<16x144xf32>
    %582 = arith.mulf %581, %3 : vector<16x144xf32>
    %583 = arith.addf %579, %582 : vector<16x144xf32>
    %c27_233 = arith.constant 27 : index
    %c2_234 = arith.constant 2 : index
    %584 = memref.load %arg1[%c27_233, %c2_234] : memref<32x4xf32, #tpu.memory_space<smem>>
    %585 = vector.broadcast %584 : f32 to vector<16x144xf32>
    %586 = arith.mulf %585, %5 : vector<16x144xf32>
    %587 = arith.addf %583, %586 : vector<16x144xf32>
    %c27_235 = arith.constant 27 : index
    %c3_236 = arith.constant 3 : index
    %588 = memref.load %arg1[%c27_235, %c3_236] : memref<32x4xf32, #tpu.memory_space<smem>>
    %589 = vector.broadcast %588 : f32 to vector<16x144xf32>
    %590 = arith.mulf %589, %7 : vector<16x144xf32>
    %591 = arith.addf %587, %590 : vector<16x144xf32>
    %592 = vector.extract_strided_slice %8 {offsets = [0, 27], sizes = [16, 1], strides = [1, 1]} : vector<16x32xf32> to vector<16x1xf32>
    %cst_237 = arith.constant 0.000000e+00 : f32
    %593 = vector.broadcast %cst_237 : f32 to vector<16x144xf32>
    %594 = arith.maximumf %591, %593 : vector<16x144xf32>
    %595 = vector.broadcast %592 : vector<16x1xf32> to vector<16x144xf32>
    %596 = arith.mulf %595, %594 : vector<16x144xf32>
    %597 = arith.addf %576, %596 : vector<16x144xf32>
    %c28 = arith.constant 28 : index
    %c0_238 = arith.constant 0 : index
    %598 = memref.load %arg1[%c28, %c0_238] : memref<32x4xf32, #tpu.memory_space<smem>>
    %599 = vector.broadcast %598 : f32 to vector<16x144xf32>
    %600 = arith.mulf %599, %1 : vector<16x144xf32>
    %c28_239 = arith.constant 28 : index
    %c1_240 = arith.constant 1 : index
    %601 = memref.load %arg1[%c28_239, %c1_240] : memref<32x4xf32, #tpu.memory_space<smem>>
    %602 = vector.broadcast %601 : f32 to vector<16x144xf32>
    %603 = arith.mulf %602, %3 : vector<16x144xf32>
    %604 = arith.addf %600, %603 : vector<16x144xf32>
    %c28_241 = arith.constant 28 : index
    %c2_242 = arith.constant 2 : index
    %605 = memref.load %arg1[%c28_241, %c2_242] : memref<32x4xf32, #tpu.memory_space<smem>>
    %606 = vector.broadcast %605 : f32 to vector<16x144xf32>
    %607 = arith.mulf %606, %5 : vector<16x144xf32>
    %608 = arith.addf %604, %607 : vector<16x144xf32>
    %c28_243 = arith.constant 28 : index
    %c3_244 = arith.constant 3 : index
    %609 = memref.load %arg1[%c28_243, %c3_244] : memref<32x4xf32, #tpu.memory_space<smem>>
    %610 = vector.broadcast %609 : f32 to vector<16x144xf32>
    %611 = arith.mulf %610, %7 : vector<16x144xf32>
    %612 = arith.addf %608, %611 : vector<16x144xf32>
    %613 = vector.extract_strided_slice %8 {offsets = [0, 28], sizes = [16, 1], strides = [1, 1]} : vector<16x32xf32> to vector<16x1xf32>
    %cst_245 = arith.constant 0.000000e+00 : f32
    %614 = vector.broadcast %cst_245 : f32 to vector<16x144xf32>
    %615 = arith.maximumf %612, %614 : vector<16x144xf32>
    %616 = vector.broadcast %613 : vector<16x1xf32> to vector<16x144xf32>
    %617 = arith.mulf %616, %615 : vector<16x144xf32>
    %618 = arith.addf %597, %617 : vector<16x144xf32>
    %c29 = arith.constant 29 : index
    %c0_246 = arith.constant 0 : index
    %619 = memref.load %arg1[%c29, %c0_246] : memref<32x4xf32, #tpu.memory_space<smem>>
    %620 = vector.broadcast %619 : f32 to vector<16x144xf32>
    %621 = arith.mulf %620, %1 : vector<16x144xf32>
    %c29_247 = arith.constant 29 : index
    %c1_248 = arith.constant 1 : index
    %622 = memref.load %arg1[%c29_247, %c1_248] : memref<32x4xf32, #tpu.memory_space<smem>>
    %623 = vector.broadcast %622 : f32 to vector<16x144xf32>
    %624 = arith.mulf %623, %3 : vector<16x144xf32>
    %625 = arith.addf %621, %624 : vector<16x144xf32>
    %c29_249 = arith.constant 29 : index
    %c2_250 = arith.constant 2 : index
    %626 = memref.load %arg1[%c29_249, %c2_250] : memref<32x4xf32, #tpu.memory_space<smem>>
    %627 = vector.broadcast %626 : f32 to vector<16x144xf32>
    %628 = arith.mulf %627, %5 : vector<16x144xf32>
    %629 = arith.addf %625, %628 : vector<16x144xf32>
    %c29_251 = arith.constant 29 : index
    %c3_252 = arith.constant 3 : index
    %630 = memref.load %arg1[%c29_251, %c3_252] : memref<32x4xf32, #tpu.memory_space<smem>>
    %631 = vector.broadcast %630 : f32 to vector<16x144xf32>
    %632 = arith.mulf %631, %7 : vector<16x144xf32>
    %633 = arith.addf %629, %632 : vector<16x144xf32>
    %634 = vector.extract_strided_slice %8 {offsets = [0, 29], sizes = [16, 1], strides = [1, 1]} : vector<16x32xf32> to vector<16x1xf32>
    %cst_253 = arith.constant 0.000000e+00 : f32
    %635 = vector.broadcast %cst_253 : f32 to vector<16x144xf32>
    %636 = arith.maximumf %633, %635 : vector<16x144xf32>
    %637 = vector.broadcast %634 : vector<16x1xf32> to vector<16x144xf32>
    %638 = arith.mulf %637, %636 : vector<16x144xf32>
    %639 = arith.addf %618, %638 : vector<16x144xf32>
    %c30 = arith.constant 30 : index
    %c0_254 = arith.constant 0 : index
    %640 = memref.load %arg1[%c30, %c0_254] : memref<32x4xf32, #tpu.memory_space<smem>>
    %641 = vector.broadcast %640 : f32 to vector<16x144xf32>
    %642 = arith.mulf %641, %1 : vector<16x144xf32>
    %c30_255 = arith.constant 30 : index
    %c1_256 = arith.constant 1 : index
    %643 = memref.load %arg1[%c30_255, %c1_256] : memref<32x4xf32, #tpu.memory_space<smem>>
    %644 = vector.broadcast %643 : f32 to vector<16x144xf32>
    %645 = arith.mulf %644, %3 : vector<16x144xf32>
    %646 = arith.addf %642, %645 : vector<16x144xf32>
    %c30_257 = arith.constant 30 : index
    %c2_258 = arith.constant 2 : index
    %647 = memref.load %arg1[%c30_257, %c2_258] : memref<32x4xf32, #tpu.memory_space<smem>>
    %648 = vector.broadcast %647 : f32 to vector<16x144xf32>
    %649 = arith.mulf %648, %5 : vector<16x144xf32>
    %650 = arith.addf %646, %649 : vector<16x144xf32>
    %c30_259 = arith.constant 30 : index
    %c3_260 = arith.constant 3 : index
    %651 = memref.load %arg1[%c30_259, %c3_260] : memref<32x4xf32, #tpu.memory_space<smem>>
    %652 = vector.broadcast %651 : f32 to vector<16x144xf32>
    %653 = arith.mulf %652, %7 : vector<16x144xf32>
    %654 = arith.addf %650, %653 : vector<16x144xf32>
    %655 = vector.extract_strided_slice %8 {offsets = [0, 30], sizes = [16, 1], strides = [1, 1]} : vector<16x32xf32> to vector<16x1xf32>
    %cst_261 = arith.constant 0.000000e+00 : f32
    %656 = vector.broadcast %cst_261 : f32 to vector<16x144xf32>
    %657 = arith.maximumf %654, %656 : vector<16x144xf32>
    %658 = vector.broadcast %655 : vector<16x1xf32> to vector<16x144xf32>
    %659 = arith.mulf %658, %657 : vector<16x144xf32>
    %660 = arith.addf %639, %659 : vector<16x144xf32>
    %c31 = arith.constant 31 : index
    %c0_262 = arith.constant 0 : index
    %661 = memref.load %arg1[%c31, %c0_262] : memref<32x4xf32, #tpu.memory_space<smem>>
    %662 = vector.broadcast %661 : f32 to vector<16x144xf32>
    %663 = arith.mulf %662, %1 : vector<16x144xf32>
    %c31_263 = arith.constant 31 : index
    %c1_264 = arith.constant 1 : index
    %664 = memref.load %arg1[%c31_263, %c1_264] : memref<32x4xf32, #tpu.memory_space<smem>>
    %665 = vector.broadcast %664 : f32 to vector<16x144xf32>
    %666 = arith.mulf %665, %3 : vector<16x144xf32>
    %667 = arith.addf %663, %666 : vector<16x144xf32>
    %c31_265 = arith.constant 31 : index
    %c2_266 = arith.constant 2 : index
    %668 = memref.load %arg1[%c31_265, %c2_266] : memref<32x4xf32, #tpu.memory_space<smem>>
    %669 = vector.broadcast %668 : f32 to vector<16x144xf32>
    %670 = arith.mulf %669, %5 : vector<16x144xf32>
    %671 = arith.addf %667, %670 : vector<16x144xf32>
    %c31_267 = arith.constant 31 : index
    %c3_268 = arith.constant 3 : index
    %672 = memref.load %arg1[%c31_267, %c3_268] : memref<32x4xf32, #tpu.memory_space<smem>>
    %673 = vector.broadcast %672 : f32 to vector<16x144xf32>
    %674 = arith.mulf %673, %7 : vector<16x144xf32>
    %675 = arith.addf %671, %674 : vector<16x144xf32>
    %676 = vector.extract_strided_slice %8 {offsets = [0, 31], sizes = [16, 1], strides = [1, 1]} : vector<16x32xf32> to vector<16x1xf32>
    %cst_269 = arith.constant 0.000000e+00 : f32
    %677 = vector.broadcast %cst_269 : f32 to vector<16x144xf32>
    %678 = arith.maximumf %675, %677 : vector<16x144xf32>
    %679 = vector.broadcast %676 : vector<16x1xf32> to vector<16x144xf32>
    %680 = arith.mulf %679, %678 : vector<16x144xf32>
    %681 = arith.addf %660, %680 : vector<16x144xf32>
    %cst_270 = arith.constant 0.000000e+00 : f32
    %682 = vector.broadcast %cst_270 : f32 to vector<16x144xf32>
    %683 = arith.maximumf %681, %682 : vector<16x144xf32>
    %c0_271 = arith.constant 0 : index
    %c0_272 = arith.constant 0 : index
    %684 = vector.load %arg4[%c0_271, %c0_272] : memref<16x144xf32, #tpu.memory_space<vmem>>, vector<16x144xf32>
    tpu.vector_store %arg4[%c0_271, %c0_272], %683 {strides = array<i32>} : memref<16x144xf32, #tpu.memory_space<vmem>>, vector<16x144xf32>,
    return
  }
  func.func @transform_0(%arg0: i32) -> (i32, i32) {
    %c0_i32 = arith.constant 0 : i32
    %c0_i32_0 = arith.constant 0 : i32
    %c0_i32_1 = arith.constant 0 : i32
    return %c0_i32, %c0_i32_0 : i32, i32
  }
  func.func @transform_1(%arg0: i32) -> (i32, i32, i32) {
    %c0_i32 = arith.constant 0 : i32
    %c0_i32_0 = arith.constant 0 : i32
    %c0_i32_1 = arith.constant 0 : i32
    return %c0_i32, %arg0, %c0_i32_0 : i32, i32, i32
  }
  func.func @transform_2(%arg0: i32) -> (i32, i32) {
    %c0_i32 = arith.constant 0 : i32
    %c0_i32_0 = arith.constant 0 : i32
    return %arg0, %c0_i32 : i32, i32
  }
  func.func @transform_3(%arg0: i32) -> (i32, i32) {
    %c0_i32 = arith.constant 0 : i32
    %c0_i32_0 = arith.constant 0 : i32
    return %arg0, %c0_i32 : i32, i32
  }
}

</mosaic_0001>

<bundles_post_ra>
// kernel: tpu_custom_call.1
= control target key start
LH: loop header
LB: loop body
LE: loop exit
PB: predicated region body
PF: predicated region fallthrough
CT: control target
= control target key end

     0   :  { %8 = vsyncpa [#allocation5], 0  ;;  %s4762_s0 = inlined_call_operand.vmem [shape: f32[32,4], index: 0, kind: input, shape index: {}]   ;;  %s4763_s1 = inlined_call_operand.hbm [shape: f32[4,144,144], index: 1, kind: input, shape index: {}]   ;;  %s4764_s2 = inlined_call_operand.vmem [shape: f32[144,32], index: 2, kind: input, shape index: {}]   ;;  %s4765_s3 = inlined_call_operand.hbm [shape: f32[144,144], index: 3, kind: output, shape index: {}]  }
   0x1   :  { %9 = vsyncpa [#allocation3], 0 }
   0x2   :  { %11 = vsyncpa [#allocation3 + $0x1], 0 }
   0x3   :  { %12 = vsyncpa [#allocation4], 0 }
   0x4   :  { %14 = vsyncpa [#allocation4 + $0x1], 0  ;;  %s2709_s12 = smov 0   ;;  %s2711_s13 = smov 0  }
   0x5   :  { %s2713_s14 = smov 0   ;;  %s2715_s15 = smov 0  }
   0x6 LB: > { %s2730_s16 = sadd.s32 4294967295, %s2643_s15   ;;  %s2191_s17 = sadd.s32 4294967294, %s2643_s15   ;;  %s2643_s15 = sphi %s2715_s15, %s5008_s15   ;;  %s2639_s14 = sphi %s2713_s14, %s5007_s14   ;;  %s2635_s13 = sphi %s2711_s13, %s5006_s13   ;;  %s2631_s12 = sphi %s2709_s12, %s5005_s12  }
   0x7   : > { %s2734_s18 = sadd.s32 1, %s2643_s15   ;;  %s48_s19 = sadd.s32 1, %s2639_s14 }
   0x8   : > { %s45_s20 = ssub.s32 %s2643_s15, %s2734_s18  ;;  %p55_p0 = scmp.ne.s32.totalorder %s2639_s14, %s2635_s13 }
   0x9   : > { %p46_p1 = scmp.eq.s32.totalorder %s45_s20, 0  ;;  %p56_p2 = scmp.eq.s32.totalorder %s2643_s15, 0 }
   0xa   : > { %p61_p3 = scmp.ne.s32.totalorder %s2635_s13, %s2631_s12  ;;  %p62_p4 = scmp.eq.s32.totalorder %s2730_s16, 0 }
   0xb   : > { %s2746_s21 = scalar_select %p46_p1, %s2639_s14, %s48_s19  }
   0xc   : > { %p2748_p5 = por %p56_p2, %p55_p0  ;;  %p2754_p6 = por %p62_p4, %p61_p3 }
   0xd   : > { %p111_p7 = scmp.eq.s32.totalorder %s2730_s16, 8  ;;  %p117_p8 = scmp.eq.s32.totalorder %s2191_s17, 8 }
   0xe   : > { %p2192_p9 = scmp.ge.s32.totalorder %s2643_s15, 1  ;;  %p124_p10 = scmp.lt.s32.totalorder %s2643_s15, 10 }
   0xf   : > { %p2761_p11 = por %p111_p7, %p55_p0  ;;  %p2765_p12 = por %p117_p8, %p61_p3 }
  0x10   : > { %p2769_p13 = pnand %p2192_p9, %p124_p10  ;;  %s136_s29 = sshll.u32 %s4762_s0, 4  ;;  %s137_s29 = int_to_ptr.vmem [resolvable:$true] %s136_s29 }
  0x11   : > { %s4827_s24 = scalar_select %p2761_p11, 1, 0 }
  0x12   : > { %s4828_s25 = scalar_select %p2765_p12, 1, 0 }
  0x13   : > { %p2371_p1 = pneg %p2769_p13  ;;  %s2560_s4 = scalar_lea.vmem %s137_s29, 512 }
  0x14   : > { %p2561_p2 = scmp.ne.s32.totalorder %s137_s29, %s2560_s4  ;;  %p2568_p9 = scmp.lt.s32.totalorder %s137_s29, %s137_s29 }
  0x15   : > { %p2780_p0 = pnand %p2371_p1, %p62_p4  ;;  %p2569_p10 = scmp.lt.s32.totalorder %s2560_s4, %s2560_s4 }
  0x17   : > { %p2562_p3 = pneg %p2780_p0  ;;  %p2570_p12 = por %p2569_p10, %p2568_p9 }
  0x19   : > { %p2563_p7 = pnand %p2562_p3, %p2561_p2 }
  0x1b   : > { %p2564_p8 = pneg %p2563_p7 }
  0x1d   : > { %p2571_p11 = pnand %p2570_p12, %p2564_p8 }
  0x1f   : > { %2574 = shalt.err (!%p2571_p11)
}
  0x20   : > { %s2645_s5 = smov [#allocation2]   ;;  %s2646_s6 = smov 128  }
  0x21   : > { %s2647_s7 = smov 8   ;;  %p2194_p1 = scmp.ge.s32.totalorder %s2643_s15, 9 }
  0x22   : > { %2374 = dma.vmem_to_smem (!%p2780_p0), %s137_s29, 512, %s2645_s5, [#allocation5], %s2646_s6, %s2646_s6, %s2647_s7  }
  0x23   : > { %146 = sbr.rel (%p2194_p1) target bundleno = 53 (0x35), region = 20 }
  0x28   : > { %s150_s8 = sand.u32 1, %s2639_s14   ;;  %s2353_s9 = sshll.u32 %s2643_s15, 9 }
  0x29   : > { %s2195_s10 = sshll.u32 %s150_s8, 7  ;;  %s161_s19 = scalar_lea.hbm %s4763_s1, %s2353_s9 }
  0x2a   : > { %s2358_s20 = scalar_select %p2748_p5, [#allocation0], [#allocation10] }
  0x2b   : > { %s154_s27 = scalar_lea.vmem [#allocation6], %s2195_s10  ;;  %s2648_s30 = smov 4608  }
  0x2c   : > { %s174_s28 = sshll.u32 %s154_s27, 4  ;;  %s166_s29 = sld [smem:[%s2358_s20]]   ;;  %s175_s28 = int_to_ptr.vmem [resolvable:$true] %s174_s28 }
  0x2d   : > { %2359 = sst [smem:[#allocation9]] (%p2748_p5), %s2648_s30  ;;  %s2649_s4 = smov 512  }
  0x2e   : > { %2360 = sst [smem:[#allocation9 + $0x1]] (%p2748_p5), %s2649_s4  ;;  %s2650_s5 = smov 2  }
  0x2f   : > { %2361 = sst [smem:[#allocation9 + $0x2]] (%p2748_p5), %s2650_s5  ;;  %s2651_s6 = smov 256  }
  0x30   : > { %2362 = sst [smem:[#allocation9 + $0x3]] (%p2748_p5), %s2651_s6  ;;  %s2652_s9 = smov 16  }
  0x31   : > { %2363 = sst [smem:[#allocation9 + $0x4]] (%p2748_p5), %s2651_s6  ;;  %s151_s11 = scalar_lea.sflag [#allocation3], %s150_s8 }
  0x32   : > { %s2199_s7 = sshll.u32 %s166_s29, 26  ;;  %2364 = sst [smem:[#allocation9 + $0x5]] (%p2748_p5), %s2652_s9 }
  0x33   : > { %s2200_s10 = sadd.s32 134217728, %s2199_s7  ;;  %s2653_s17 = smov 131072  }
  0x34   : > { %2365 = dma.general (%p2748_p5), %s161_s19, 2048, %s175_s28, %s151_s11, %s2653_s17, [#allocation9], %s2200_s10, 0  }
  0x35 PF: > { %208 = sbr.rel (%p2769_p13) target bundleno = 462 (0x1ce), region = 32 }
  0x3a   : > { %2618 = dma.done.wait (%p62_p4), [#allocation5], 512  }
  0x3b   : > { %2620 = vsyncadd (%p62_p4), [#allocation5], 4294966784  ;;  %s2817_s20 = sand.u32 1, %s2635_s13  }
  0x3c   : > { %s2203_s8 = sshll.u32 %s2817_s20, 7  ;;  %s215_s27 = scalar_lea.sflag [#allocation3], %s2817_s20 }
  0x3d   : > { %s2821_s22 = scalar_lea.vmem [#allocation6], %s2203_s8 }
  0x3e   : > { %2622 = dma.done.wait (%p2754_p6), %s215_s27, 2048  }
  0x3f   : > { %2624 = vsyncadd (%p2754_p6), %s215_s27, 4294965248 }
  0x40   : > { %223 = sfence }
  0x41   : > { %s2205_s26 = sshll.u32 %s2730_s16, 1  ;;  %v2654_v0 = vmov 1   ;;  %v2655_v1 = vmov 0   ;;  %s2222_s28 = sld [smem:[#allocation2 + $0x80]]  ;;  %v2837_v3 = vld [vmem:[%s2821_s22] sm:$0xff]  ;;  %v2842_v4 = vld [vmem:[%s2821_s22 + $0x8] sm:$0xff] }
  0x42   : > { %2458 = vset.pattern.permute.xlu1 %v2654_v0  ;;  %2457 = vset.pattern.permute.xlu0 %v2655_v1  ;;  %p249_p4 = scmp.lt.s32.totalorder %s2205_s26, 17  ;;  %s2223_s4 = sld [smem:[#allocation2 + $0x81]]  ;;  %v2850_v6 = vld [vmem:[%s2821_s22 + $0x20] sm:$0xff]  ;;  %v2853_v7 = vld [vmem:[%s2821_s22 + $0x28] sm:$0xff]  ;;  %v2870_v14 = vld [vmem:[%s2821_s22 + $0x10] sm:$0xff]  ;;  %v2656_v27 = vmov 2  }
  0x43   : > { %s2224_s5 = sld [smem:[#allocation2 + $0x82]]  ;;  %v2856_v8 = vld [vmem:[%s2821_s22 + $0x40] sm:$0xff]  ;;  %v2859_v9 = vld [vmem:[%s2821_s22 + $0x48] sm:$0xff]  ;;  %v2878_v19 = vld [vmem:[%s2821_s22 + $0x30] sm:$0xff]  ;;  %v2657_v51 = vmov 3   ;;  %vm2075_vm0 = vcmask 130048  }
  0x44   : > { %s5010_s26 = smov (!%p249_p4, %s2205_s26), 17  ;;  %s2225_s6 = sld [smem:[#allocation2 + $0x83]]  ;;  %v2873_v15 = vld [vmem:[%s2821_s22 + $0x60] sm:$0xff]  ;;  %v2881_v20 = vld [vmem:[%s2821_s22 + $0x68] sm:$0xff]  ;;  %v2892_v31 = vld [vmem:[%s2821_s22 + $0x18] sm:$0xff] }
  0x45   : > { %s2206_s19 = sshll.u32 %s5010_s26, 3  ;;  %s2847_s7 = sld [smem:[#allocation2]]  ;;  %v2902_v37 = vld [vmem:[%s2821_s22 + $0x38] sm:$0xff]  ;;  %v2910_v42 = vld [vmem:[%s2821_s22 + $0x50] sm:$0xff] }
  0x46   : > { %s2831_s23 = scalar_lea.vmem %s4764_s2, %s2206_s19  ;;  %s2219_s9 = sld [smem:[#allocation2 + $0x1]]  ;;  %v2922_v52 = vld [vmem:[%s2821_s22 + $0x58] sm:$0xff]  ;;  %v2925_v53 = vld [vmem:[%s2821_s22 + $0x70] sm:$0xff] }
  0x47   : > { %v2834_v2 = vld [vmem:[%s2831_s23] sm:$0xff]  ;;  %v2845_v5 = vld [vmem:[%s2831_s23 + $0x8] sm:$0xff]  ;;  %v335_v10 = vstv %s2222_s28  ;;  %s2861_s10 = sld [smem:[#allocation2 + $0x2]]  ;;  %v2941_v61 = vld [vmem:[%s2821_s22 + $0x78] sm:$0xff]  ;;  %p5003_p6 = scmp.ne.s32.totalorder %s4827_s24, 0 }
  0x48   : > { %375 = vperm.xlu1 %2458, %v2834_v2   ;;  %318 = vperm.xlu0 %2457, %v2834_v2   ;;  %v336_v11 = vmul.f32 %v335_v10, %v2837_v3  ;;  %v337_v12 = vmul.f32 %v335_v10, %v2842_v4  ;;  %v341_v13 = vstv %s2223_s4  ;;  %s2867_s11 = sld [smem:[#allocation2 + $0x3]]  ;;  %v338_v26 = vmul.f32 %v335_v10, %v2870_v14 }
  0x49   : > { %v342_v16 = vmul.f32 %v2850_v6, %v341_v13  ;;  %v343_v17 = vmul.f32 %v2853_v7, %v341_v13  ;;  %v351_v18 = vstv %s2224_s5  ;;  %v344_v32 = vmul.f32 %v2878_v19, %v341_v13  ;;  %s2904_s17 = sld [smem:[#allocation2 + $0x100]] }
  0x4a   : > { %v352_v21 = vmul.f32 %v2856_v8, %v351_v18  ;;  %v353_v22 = vmul.f32 %v2859_v9, %v351_v18  ;;  %v2885_v23 = vstv %s2225_s6  ;;  %v339_v46 = vmul.f32 %v335_v10, %v2892_v31  ;;  %s2919_s8 = sld [smem:[#allocation2 + $0x101]] }
  0x4b   : > { %v346_v24 = vadd.f32 %v342_v16, %v336_v11  ;;  %v347_v25 = vadd.f32 %v343_v17, %v337_v12  ;;  %v362_v28 = vmul.f32 %v2873_v15, %v2885_v23  ;;  %v277_v29 = vstv %s2847_s7  ;;  %s2928_s27 = sld [smem:[#allocation2 + $0x102]] }
  0x4c   : > { %379 = vperm.xlu1 %2458, %v2845_v5   ;;  %323 = vperm.xlu0 %2457, %v2845_v5   ;;  %v283_v30 = vstv %s2219_s9  ;;  %v363_v34 = vmul.f32 %v2881_v20, %v2885_v23  ;;  %v278_v35 = vmul.f32 %v277_v29, %v2837_v3  ;;  %v279_v39 = vmul.f32 %v277_v29, %v2842_v4  ;;  %s2944_s26 = sld [smem:[#allocation2 + $0x103]] }
  0x4d   : > { %v356_v33 = vadd.f32 %v352_v21, %v346_v24  ;;  %v293_v36 = vstv %s2861_s10  ;;  %v357_v38 = vadd.f32 %v353_v22, %v347_v25  ;;  %v284_v40 = vmul.f32 %v2850_v6, %v283_v30  ;;  %s2968_s19 = sld [smem:[#allocation2 + $0x180]] }
  0x4e   : > { %v285_v41 = vmul.f32 %v2853_v7, %v283_v30  ;;  %v294_v43 = vmul.f32 %v2856_v8, %v293_v36  ;;  %v295_v44 = vmul.f32 %v2859_v9, %v293_v36  ;;  %v2915_v45 = vstv %s2867_s11  ;;  %s2973_s28 = sld [smem:[#allocation2 + $0x181]] }
  0x4f   : > { %v288_v47 = vadd.f32 %v284_v40, %v278_v35  ;;  %v345_v49 = vmul.f32 %v2902_v37, %v341_v13  ;;  %v348_v50 = vadd.f32 %v344_v32, %v338_v26  ;;  %v354_v54 = vmul.f32 %v2910_v42, %v351_v18  ;;  %s2979_s29 = sld [smem:[#allocation2 + $0x182]] }
  0x50   : > { %2460 = vset.pattern.permute.xlu1 %v2656_v27  ;;  %2459 = vset.pattern.permute.xlu0 %v2656_v27  ;;  %v289_v48 = vadd.f32 %v285_v41, %v279_v39  ;;  %v2932_v55 = vadd.f32 %v362_v28, %v356_v33  ;;  %v2934_v56 = vadd.f32 %v363_v34, %v357_v38  ;;  %v391_v16 = vstv %s2904_s17  ;;  %s2999_s30 = sld [smem:[#allocation2 + $0x183]] }
  0x51   : > { %435 = vperm.xlu1 %2460, %v2845_v5   ;;  %431 = vperm.xlu0 %2459, %v2834_v2   ;;  %v304_v57 = vmul.f32 %v2873_v15, %v2915_v45  ;;  %v298_v58 = vadd.f32 %v294_v43, %v288_v47  ;;  %v305_v60 = vmul.f32 %v2881_v20, %v2915_v45  ;;  %v2658_v17 = vmov 4   ;;  %s3007_s4 = sld [smem:[#allocation2 + $0x200]] }
  0x52   : > { %v299_v59 = vadd.f32 %v295_v44, %v289_v48  ;;  %v280_v62 = vmul.f32 %v277_v29, %v2870_v14  ;;  %v349_v63 = vadd.f32 %v345_v49, %v339_v46  ;;  %v355_v0 = vmul.f32 %v2922_v52, %v351_v18  ;;  %s3014_s5 = sld [smem:[#allocation2 + $0x201]] }
  0x53   : > { %v358_v1 = vadd.f32 %v354_v54, %v348_v50  ;;  %v364_v10 = vmul.f32 %v2925_v53, %v2885_v23  ;;  %v281_v11 = vmul.f32 %v277_v29, %v2892_v31  ;;  %v286_v12 = vmul.f32 %v2878_v19, %v283_v30  ;;  %s3020_s6 = sld [smem:[#allocation2 + $0x202]] }
  0x54   : > { %v287_v13 = vmul.f32 %v2902_v37, %v283_v30  ;;  %v2659_v21 = vmov 5   ;;  %v365_v18 = vmul.f32 %v2941_v61, %v2885_v23  ;;  %v296_v24 = vmul.f32 %v2910_v42, %v293_v36  ;;  %s3037_s7 = sld [smem:[#allocation2 + $0x203]] }
  0x55   : > { %2461 = vset.pattern.permute.xlu1 %v2657_v51  ;;  %2462 = vset.pattern.permute.xlu0 %v2657_v51  ;;  %v2960_v26 = vadd.f32 %v304_v57, %v298_v58  ;;  %v2962_v27 = vadd.f32 %v305_v60, %v299_v59  ;;  %v290_v28 = vadd.f32 %v286_v12, %v280_v62  ;;  %v397_v35 = vstv %s2919_s8  ;;  %s3046_s9 = sld [smem:[#allocation2 + $0x280]] }
  0x56   : > { %487 = vperm.xlu1 %2461, %v2834_v2   ;;  %491 = vperm.xlu0 %2462, %v2845_v5   ;;  %v359_v29 = vadd.f32 %v355_v0, %v349_v63  ;;  %v2964_v30 = vadd.f32 %v364_v10, %v358_v1  ;;  %v394_v32 = vmul.f32 %v391_v16, %v2870_v14  ;;  %v407_v38 = vstv %s2928_s27  ;;  %s3053_s10 = sld [smem:[#allocation2 + $0x281]] }
  0x57   : > { %v395_v23 = vmul.f32 %v391_v16, %v2892_v31  ;;  %v291_v33 = vadd.f32 %v287_v13, %v281_v11  ;;  %v297_v34 = vmul.f32 %v2922_v52, %v293_v36  ;;  %v300_v39 = vadd.f32 %v296_v24, %v290_v28  ;;  %s3057_s11 = sld [smem:[#allocation2 + $0x282]] }
  0x58   : > { %v306_v40 = vmul.f32 %v2925_v53, %v2915_v45  ;;  %v400_v41 = vmul.f32 %v2878_v19, %v397_v35  ;;  %v401_v43 = vmul.f32 %v2902_v37, %v397_v35  ;;  %v2660_v44 = vmov 6   ;;  %s3068_s17 = sld [smem:[#allocation2 + $0x283]] }
  0x59   : > { %v410_v36 = vmul.f32 %v2910_v42, %v407_v38  ;;  %v411_v46 = vmul.f32 %v2922_v52, %v407_v38  ;;  %v417_v47 = vstv %s2944_s26  ;;  %v392_v48 = vmul.f32 %v391_v16, %v2837_v3  ;;  %s3111_s8 = sld [smem:[#allocation2 + $0x300]] }
  0x5a   : > { %2463 = vset.pattern.permute.xlu1 %v2658_v17  ;;  %2464 = vset.pattern.permute.xlu0 %v2659_v21  ;;  %v2988_v50 = vadd.f32 %v365_v18, %v359_v29  ;;  %v404_v51 = vadd.f32 %v400_v41, %v394_v32  ;;  %v405_v54 = vadd.f32 %v401_v43, %v395_v23  ;;  %v2661_v13 = vmov 8   ;;  %s3118_s27 = sld [smem:[#allocation2 + $0x301]] }
  0x5b   : > { %543 = vperm.xlu1 %2463, %v2834_v2   ;;  %599 = vperm.xlu0 %2464, %v2834_v2   ;;  %v301_v57 = vadd.f32 %v297_v34, %v291_v33  ;;  %v307_v58 = vmul.f32 %v2941_v61, %v2915_v45  ;;  %v393_v59 = vmul.f32 %v391_v16, %v2842_v4  ;;  %v447_v29 = vstv %s2968_s19  ;;  %s3127_s26 = sld [smem:[#allocation2 + $0x302]] }
  0x5c   : > { %v398_v60 = vmul.f32 %v2850_v6, %v397_v35  ;;  %v2994_v62 = vadd.f32 %v306_v40, %v300_v39  ;;  %v420_v63 = vmul.f32 %v2925_v53, %v417_v47  ;;  %v399_v0 = vmul.f32 %v2853_v7, %v397_v35  ;;  %s3135_s19 = sld [smem:[#allocation2 + $0x303]] }
  0x5d   : > { %v408_v1 = vmul.f32 %v2856_v8, %v407_v38  ;;  %v414_v10 = vadd.f32 %v410_v36, %v404_v51  ;;  %v415_v11 = vadd.f32 %v411_v46, %v405_v54  ;;  %v421_v45 = vmul.f32 %v2941_v61, %v417_v47 }
  0x5e   : > { %v402_v12 = vadd.f32 %v398_v60, %v392_v48  ;;  %v403_v17 = vadd.f32 %v399_v0, %v393_v59  ;;  %v409_v18 = vmul.f32 %v2859_v9, %v407_v38  ;;  %v3010_v24 = vadd.f32 %v307_v58, %v301_v57 }
  0x5f   : > { %547 = vperm.xlu1 %2463, %v2845_v5   ;;  %2467 = vset.pattern.permute.xlu0 %v2660_v44  ;;  %v453_v32 = vstv %s2973_s28  ;;  %v448_v34 = vmul.f32 %v447_v29, %v2837_v3  ;;  %v463_v35 = vstv %s2979_s29  ;;  %v419_v38 = vmul.f32 %v2881_v20, %v417_v47  ;;  %s3158_s28 = sld [smem:[#allocation2 + $0x380]] }
  0x60   : > { %659 = vperm.xlu0 %2467, %v2845_v5   ;;  %v412_v28 = vadd.f32 %v408_v1, %v402_v12  ;;  %v449_v39 = vmul.f32 %v447_v29, %v2842_v4  ;;  %v454_v40 = vmul.f32 %v2850_v6, %v453_v32  ;;  %v455_v41 = vmul.f32 %v2853_v7, %v453_v32  ;;  %s3165_s29 = sld [smem:[#allocation2 + $0x381]] }
  0x61   : > { %v3026_v43 = vadd.f32 %v420_v63, %v414_v10  ;;  %v3028_v36 = vadd.f32 %v421_v45, %v415_v11  ;;  %v413_v46 = vadd.f32 %v409_v18, %v403_v17  ;;  %v2662_v51 = vmov 9  }
  0x62   : > { %v458_v57 = vadd.f32 %v454_v40, %v448_v34  ;;  %v464_v58 = vmul.f32 %v2856_v8, %v463_v35  ;;  %v473_v59 = vstv %s2999_s30  ;;  %v450_v60 = vmul.f32 %v447_v29, %v2870_v14  ;;  %s3176_s30 = sld [smem:[#allocation2 + $0x382]] }
  0x63   : > { %2465 = vset.pattern.permute.xlu1 %v2659_v21  ;;  %v418_v21 = vmul.f32 %v2873_v15, %v417_v47  ;;  %v459_v63 = vadd.f32 %v455_v41, %v449_v39  ;;  %v451_v0 = vmul.f32 %v447_v29, %v2892_v31  ;;  %v456_v1 = vmul.f32 %v2878_v19, %v453_v32 }
  0x64   : > { %603 = vperm.xlu1 %2465, %v2845_v5   ;;  %2469 = vset.pattern.permute.xlu0 %v2661_v13  ;;  %v457_v10 = vmul.f32 %v2902_v37, %v453_v32  ;;  %v3050_v12 = vadd.f32 %v419_v38, %v413_v46  ;;  %v2663_v18 = vmov 7   ;;  %v466_v32 = vmul.f32 %v2910_v42, %v463_v35 }
  0x65   : > { %767 = vperm.xlu0 %2469, %v2834_v2   ;;  %v3030_v48 = vadd.f32 %v418_v21, %v412_v28  ;;  %v468_v21 = vadd.f32 %v464_v58, %v458_v57  ;;  %v474_v28 = vmul.f32 %v2873_v15, %v473_v59  ;;  %v460_v29 = vadd.f32 %v456_v1, %v450_v60 }
  0x66   : > { %v4768_v34 = vmov 11   ;;  %v475_v38 = vmul.f32 %v2881_v20, %v473_v59  ;;  %v503_v39 = vstv %s3007_s4  ;;  %v509_v40 = vstv %s3014_s5  ;;  %s3181_s4 = sld [smem:[#allocation2 + $0x383]] }
  0x67   : > { %v519_v41 = vstv %s3020_s6  ;;  %v461_v57 = vadd.f32 %v457_v10, %v451_v0  ;;  %v467_v58 = vmul.f32 %v2922_v52, %v463_v35  ;;  %v476_v60 = vmul.f32 %v2925_v53, %v473_v59  ;;  %s3190_s5 = sld [smem:[#allocation2 + $0x400]] }
  0x68   : > { %2466 = vset.pattern.permute.xlu1 %v2660_v44  ;;  %v465_v44 = vmul.f32 %v2859_v9, %v463_v35  ;;  %v504_v1 = vmul.f32 %v503_v39, %v2837_v3  ;;  %v510_v17 = vmul.f32 %v2850_v6, %v509_v40  ;;  %v511_v45 = vmul.f32 %v2853_v7, %v509_v40  ;;  %s3199_s6 = sld [smem:[#allocation2 + $0x401]] }
  0x69   : > { %655 = vperm.xlu1 %2466, %v2834_v2   ;;  %2472 = vset.pattern.permute.xlu0 %v2662_v51  ;;  %v3074_v11 = vadd.f32 %v474_v28, %v468_v21  ;;  %v470_v54 = vadd.f32 %v466_v32, %v460_v29  ;;  %v521_v47 = vmul.f32 %v2859_v9, %v519_v41  ;;  %v4767_v33 = vmov 12  }
  0x6a   : > { %827 = vperm.xlu0 %2472, %v2845_v5   ;;  %v469_v46 = vadd.f32 %v465_v44, %v459_v63  ;;  %v520_v44 = vmul.f32 %v2856_v8, %v519_v41  ;;  %v529_v63 = vstv %s3037_s7  ;;  %v514_v0 = vadd.f32 %v510_v17, %v504_v1  ;;  %s3205_s7 = sld [smem:[#allocation2 + $0x402]] }
  0x6b   : > { %v471_v21 = vadd.f32 %v467_v58, %v461_v57  ;;  %v477_v28 = vmul.f32 %v2941_v61, %v473_v59  ;;  %v559_v29 = vstv %s3046_s9  ;;  %v530_v17 = vmul.f32 %v2873_v15, %v529_v63  ;;  %s3211_s9 = sld [smem:[#allocation2 + $0x403]] }
  0x6c   : > { %v3082_v23 = vadd.f32 %v475_v38, %v469_v46  ;;  %v524_v32 = vadd.f32 %v520_v44, %v514_v0  ;;  %v561_v1 = vmul.f32 %v559_v29, %v2842_v4  ;;  %v3091_v35 = vadd.f32 %v476_v60, %v470_v54 }
  0x6d   : > { %2468 = vset.pattern.permute.xlu1 %v2663_v18  ;;  %v505_v18 = vmul.f32 %v503_v39, %v2842_v4  ;;  %v565_v38 = vstv %s3053_s10  ;;  %v575_v46 = vstv %s3057_s11  ;;  %v531_v57 = vmul.f32 %v2881_v20, %v529_v63  ;;  %s3261_s10 = sld [smem:[#allocation2 + $0x480]] }
  0x6e   : > { %711 = vperm.xlu1 %2468, %v2834_v2   ;;  %2474 = vset.pattern.permute.xlu0 %v4768_v34  ;;  %4831 = vst [vmem:[#allocation14_spill] sm:$0xff] %v3091_v35  ;;  %v566_v58 = vmul.f32 %v2850_v6, %v565_v38  ;;  %v567_v44 = vmul.f32 %v2853_v7, %v565_v38  ;;  %v4772_v60 = vmov 14   ;;  %s3267_s11 = sld [smem:[#allocation2 + $0x481]] }
  0x6f   : > { %935 = vperm.xlu0 %2474, %v2834_v2   ;;  %v515_v10 = vadd.f32 %v511_v45, %v505_v18  ;;  %v560_v45 = vmul.f32 %v559_v29, %v2837_v3  ;;  %v576_v0 = vmul.f32 %v2856_v8, %v575_v46  ;;  %v577_v16 = vmul.f32 %v2859_v9, %v575_v46 }
  0x70   : > { %v3103_v18 = vstv %s3068_s17  ;;  %v506_v54 = vmul.f32 %v503_v39, %v2870_v14  ;;  %v571_v25 = vadd.f32 %v567_v44, %v561_v1  ;;  %v507_v49 = vmul.f32 %v503_v39, %v2892_v31  ;;  %s3276_s17 = sld [smem:[#allocation2 + $0x482]] }
  0x71   : > { %v525_v59 = vadd.f32 %v521_v47, %v515_v10  ;;  %v3109_v47 = vadd.f32 %v530_v17, %v524_v32  ;;  %v570_v10 = vadd.f32 %v566_v58, %v560_v45  ;;  %v512_v22 = vmul.f32 %v2878_v19, %v509_v40 }
  0x72   : > { %715 = vperm.xlu1 %2468, %v2845_v5   ;;  %v522_v34 = vmul.f32 %v2910_v42, %v519_v41  ;;  %v587_v32 = vmul.f32 %v2881_v20, %v3103_v18  ;;  %v523_v17 = vmul.f32 %v2922_v52, %v519_v41  ;;  %v562_v58 = vmul.f32 %v559_v29, %v2870_v14 }
  0x73   : > { %2477 = vset.pattern.permute.xlu0 %v4767_v33  ;;  %4833 = vst [vmem:[#allocation16_spill] sm:$0xff] %v3109_v47  ;;  %v513_v33 = vmul.f32 %v2902_v37, %v509_v40  ;;  %v580_v39 = vadd.f32 %v576_v0, %v570_v10  ;;  %v581_v40 = vadd.f32 %v577_v16, %v571_v25  ;;  %v4770_v41 = vmov 15  }
  0x74   : > { %995 = vperm.xlu0 %2477, %v2845_v5   ;;  %v516_v45 = vadd.f32 %v512_v22, %v506_v54  ;;  %v563_v44 = vmul.f32 %v559_v29, %v2892_v31  ;;  %v568_v22 = vmul.f32 %v2878_v19, %v565_v38  ;;  %v2668_v54 = vmov 10  }
  0x75   : > { %v517_v1 = vadd.f32 %v513_v33, %v507_v49  ;;  %v569_v49 = vmul.f32 %v2902_v37, %v565_v38 }
  0x76   : > { %2470 = vset.pattern.permute.xlu1 %v2661_v13  ;;  %v3107_v13 = vadd.f32 %v477_v28, %v471_v21  ;;  %v3120_v21 = vadd.f32 %v531_v57, %v525_v59  ;;  %v586_v28 = vmul.f32 %v2873_v15, %v3103_v18  ;;  %v532_v59 = vmul.f32 %v2925_v53, %v529_v63 }
  0x77   : > { %771 = vperm.xlu1 %2470, %v2845_v5   ;;  %v533_v57 = vmul.f32 %v2941_v61, %v529_v63  ;;  %v527_v25 = vadd.f32 %v523_v17, %v517_v1  ;;  %v572_v10 = vadd.f32 %v568_v22, %v562_v58  ;;  %v573_v38 = vadd.f32 %v569_v49, %v563_v44 }
  0x78   : > { %2479 = vset.pattern.permute.xlu0 %v4772_v60  ;;  %4832 = vst [vmem:[#allocation15_spill] sm:$0xff] %v3107_v13  ;;  %4834 = vst [vmem:[#allocation17_spill] sm:$0xff] %v3120_v21  ;;  %v579_v17 = vmul.f32 %v2922_v52, %v575_v46  ;;  %v3150_v1 = vadd.f32 %v586_v28, %v580_v39  ;;  %v3152_v63 = vadd.f32 %v587_v32, %v581_v40 }
  0x79   : > { %1103 = vperm.xlu0 %2479, %v2834_v2   ;;  %v3156_v0 = vadd.f32 %v533_v57, %v527_v25  ;;  %v621_v44 = vstv %s3118_s27  ;;  %v631_v22 = vstv %s3127_s26  ;;  %v588_v28 = vmul.f32 %v2925_v53, %v3103_v18  ;;  %s3296_s27 = sld [smem:[#allocation2 + $0x500]] }
  0x7a   : > { %4835 = vst [vmem:[#allocation18_spill] sm:$0xff] %v3150_v1  ;;  %4836 = vst [vmem:[#allocation19_spill] sm:$0xff] %v3152_v63  ;;  %v589_v32 = vmul.f32 %v2941_v61, %v3103_v18  ;;  %v624_v39 = vmul.f32 %v2878_v19, %v621_v44  ;;  %v625_v40 = vmul.f32 %v2902_v37, %v621_v44  ;;  %v641_v25 = vstv %s3135_s19  ;;  %s3314_s26 = sld [smem:[#allocation2 + $0x501]] }
  0x7b   : > { %2471 = vset.pattern.permute.xlu1 %v2662_v51  ;;  %v526_v51 = vadd.f32 %v522_v34, %v516_v45  ;;  %v578_v34 = vmul.f32 %v2910_v42, %v575_v46  ;;  %v615_v45 = vstv %s3111_s8  ;;  %4838 = vst [vmem:[#allocation21_spill] sm:$0xff] %v3156_v0  ;;  %v583_v57 = vadd.f32 %v579_v17, %v573_v38  ;;  %s3287_s8 = sld [smem:[#allocation2 + $0x483]] }
  0x7c   : > { %823 = vperm.xlu1 %2471, %v2834_v2   ;;  %v618_v58 = vmul.f32 %v615_v45, %v2870_v14  ;;  %v619_v46 = vmul.f32 %v615_v45, %v2892_v31  ;;  %v4771_v38 = vmov 18   ;;  %v687_v0 = vstv %s3176_s30  ;;  %s3322_s19 = sld [smem:[#allocation2 + $0x502]] }
  0x7d   : > { %2482 = vset.pattern.permute.xlu0 %v4770_v41  ;;  %v3154_v29 = vadd.f32 %v532_v59, %v526_v51  ;;  %v582_v59 = vadd.f32 %v578_v34, %v572_v10  ;;  %v634_v51 = vmul.f32 %v2910_v42, %v631_v22  ;;  %v616_v34 = vmul.f32 %v615_v45, %v2837_v3  ;;  %s3349_s30 = sld [smem:[#allocation2 + $0x581]] }
  0x7e   : > { %1163 = vperm.xlu0 %2482, %v2845_v5   ;;  %v628_v33 = vadd.f32 %v624_v39, %v618_v58  ;;  %v629_v16 = vadd.f32 %v625_v40, %v619_v46  ;;  %v622_v10 = vmul.f32 %v2850_v6, %v621_v44  ;;  %v644_v41 = vmul.f32 %v2925_v53, %v641_v25 }
  0x7f   : > { %4837 = vst [vmem:[#allocation20_spill] sm:$0xff] %v3154_v29  ;;  %v617_v58 = vmul.f32 %v615_v45, %v2842_v4  ;;  %v623_v46 = vmul.f32 %v2853_v7, %v621_v44  ;;  %v3195_v18 = vadd.f32 %v588_v28, %v582_v59  ;;  %v3197_v49 = vadd.f32 %v589_v32, %v583_v57 }
  0x80   : > { %2473 = vset.pattern.permute.xlu1 %v2668_v54  ;;  %v4769_v54 = vmov 17   ;;  %v638_v17 = vadd.f32 %v634_v51, %v628_v33  ;;  %v4841_v33 = vmov 11   ;;  %v645_v44 = vmul.f32 %v2941_v61, %v641_v25 }
  0x81   : > { %879 = vperm.xlu1 %2473, %v2834_v2   ;;  %4839 = vst [vmem:[#allocation22_spill] sm:$0xff] %v3195_v18  ;;  %4840 = vst [vmem:[#allocation23_spill] sm:$0xff] %v3197_v49  ;;  %v632_v51 = vmul.f32 %v2856_v8, %v631_v22  ;;  %v626_v40 = vadd.f32 %v622_v10, %v616_v34  ;;  %v677_v59 = vstv %s3165_s29  ;;  %v4774_v39 = vmov 20   ;;  %s3344_s29 = sld [smem:[#allocation2 + $0x580]] }
  0x82   : > { %2484 = vset.pattern.permute.xlu0 %v4769_v54  ;;  %v635_v54 = vmul.f32 %v2922_v52, %v631_v22  ;;  %v633_v57 = vmul.f32 %v2859_v9, %v631_v22  ;;  %v679_v60 = vmul.f32 %v2853_v7, %v677_v59  ;;  %v643_v22 = vmul.f32 %v2881_v20, %v641_v25 }
  0x83   : > { %1271 = vperm.xlu0 %2484, %v2834_v2   ;;  %v688_v10 = vmul.f32 %v2856_v8, %v687_v0  ;;  %v689_v49 = vmul.f32 %v2859_v9, %v687_v0  ;;  %v727_v29 = vstv %s3190_s5  ;;  %v3250_v63 = vstv %s3211_s9  ;;  %s3378_s5 = sld [smem:[#allocation2 + $0x583]] }
  0x84   : > { %v639_v45 = vadd.f32 %v635_v54, %v629_v16  ;;  %v3213_v16 = vadd.f32 %v644_v41, %v638_v17  ;;  %v627_v54 = vadd.f32 %v623_v46, %v617_v58  ;;  %v642_v17 = vmul.f32 %v2873_v15, %v641_v25  ;;  %s3490_s9 = sld [smem:[#allocation2 + $0x603]] }
  0x85   : > { %883 = vperm.xlu1 %2473, %v2845_v5   ;;  %v3228_v58 = vstv %s3181_s4  ;;  %v4843_v46 = vmov 12   ;;  %v2673_v1 = vmov 13   ;;  %s3357_s4 = sld [smem:[#allocation2 + $0x582]] }
  0x86   : > { %4842 = vst [vmem:[#allocation24_spill] sm:$0xff] %v3213_v16  ;;  %v3223_v41 = vadd.f32 %v645_v44, %v639_v45  ;;  %v636_v44 = vadd.f32 %v632_v51, %v626_v40  ;;  %v637_v18 = vadd.f32 %v633_v57, %v627_v54  ;;  %v698_v25 = vmul.f32 %v2873_v15, %v3228_v58 }
  0x87   : > { %2487 = vset.pattern.permute.xlu0 %v4771_v38  ;;  %v671_v38 = vstv %s3158_s28  ;;  %v743_v51 = vstv %s3205_s7  ;;  %s3336_s28 = sld [smem:[#allocation2 + $0x503]] }
  0x88   : > { %1331 = vperm.xlu0 %2487, %v2845_v5   ;;  %v672_v28 = vmul.f32 %v671_v38, %v2837_v3  ;;  %v673_v32 = vmul.f32 %v671_v38, %v2842_v4  ;;  %v744_v16 = vmul.f32 %v2856_v8, %v743_v51  ;;  %v745_v13 = vmul.f32 %v2859_v9, %v743_v51  ;;  %s3459_s7 = sld [smem:[#allocation2 + $0x602]] }
  0x89   : > { %2475 = vset.pattern.permute.xlu1 %v4841_v33  ;;  %v678_v33 = vmul.f32 %v2850_v6, %v677_v59  ;;  %v3255_v35 = vadd.f32 %v642_v17, %v636_v44  ;;  %v4788_v17 = vmov 23  }
  0x8a   : > { %939 = vperm.xlu1 %2475, %v2845_v5  }
  0x8b   : > { %v682_v34 = vadd.f32 %v678_v33, %v672_v28  ;;  %v733_v28 = vstv %s3199_s6  ;;  %v699_v33 = vmul.f32 %v2881_v20, %v3228_v58  ;;  %s3450_s6 = sld [smem:[#allocation2 + $0x601]] }
  0x8c   : > { %2489 = vset.pattern.permute.xlu0 %v4774_v39  ;;  %v683_v39 = vadd.f32 %v679_v60, %v673_v32  ;;  %v729_v60 = vmul.f32 %v727_v29, %v2842_v4  ;;  %v4781_v32 = vmov 21   ;;  %v734_v45 = vmul.f32 %v2850_v6, %v733_v28 }
  0x8d   : > { %1439 = vperm.xlu0 %2489, %v2834_v2   ;;  %v735_v40 = vmul.f32 %v2853_v7, %v733_v28  ;;  %v692_v54 = vadd.f32 %v688_v10, %v682_v34  ;;  %v754_v34 = vmul.f32 %v2873_v15, %v3250_v63 }
  0x8e   : > { %2476 = vset.pattern.permute.xlu1 %v4843_v46  ;;  %v728_v46 = vmul.f32 %v727_v29, %v2837_v3  ;;  %v693_v57 = vadd.f32 %v689_v49, %v683_v39  ;;  %v674_v49 = vmul.f32 %v671_v38, %v2870_v14  ;;  %v675_v39 = vmul.f32 %v671_v38, %v2892_v31 }
  0x8f   : > { %991 = vperm.xlu1 %2476, %v2834_v2   ;;  %v739_v47 = vadd.f32 %v735_v40, %v729_v60  ;;  %v3270_v44 = vadd.f32 %v698_v25, %v692_v54  ;;  %v690_v38 = vmul.f32 %v2910_v42, %v687_v0  ;;  %v691_v40 = vmul.f32 %v2922_v52, %v687_v0 }
  0x90   : > { %v738_v21 = vadd.f32 %v734_v45, %v728_v46  ;;  %v680_v45 = vmul.f32 %v2878_v19, %v677_v59  ;;  %v681_v46 = vmul.f32 %v2902_v37, %v677_v59  ;;  %v3272_v60 = vadd.f32 %v699_v33, %v693_v57 }
  0x91   : > { %2492 = vset.pattern.permute.xlu0 %v4781_v32  ;;  %4844 = vst [vmem:[#allocation25_spill] sm:$0xff] %v3270_v44  ;;  %v730_v33 = vmul.f32 %v727_v29, %v2870_v14  ;;  %v736_v0 = vmul.f32 %v2878_v19, %v733_v28  ;;  %v799_v57 = vstv %s3276_s17  ;;  %v809_v32 = vstv %s3287_s8  ;;  %s3541_s17 = sld [smem:[#allocation2 + $0x682]] }
  0x92   : > { %1499 = vperm.xlu0 %2492, %v2845_v5   ;;  %v748_v10 = vadd.f32 %v744_v16, %v738_v21  ;;  %4845 = vst [vmem:[#allocation26_spill] sm:$0xff] %v3272_v60  ;;  %v749_v21 = vadd.f32 %v745_v13, %v739_v47  ;;  %v684_v59 = vadd.f32 %v680_v45, %v674_v49  ;;  %v783_v49 = vstv %s3261_s10  ;;  %s3527_s10 = sld [smem:[#allocation2 + $0x680]] }
  0x93   : > { %2478 = vset.pattern.permute.xlu1 %v2673_v1  ;;  %v3263_v1 = vadd.f32 %v643_v22, %v637_v18  ;;  %v755_v18 = vmul.f32 %v2881_v20, %v3250_v63  ;;  %v685_v16 = vadd.f32 %v681_v46, %v675_v39  ;;  %v700_v47 = vmul.f32 %v2925_v53, %v3228_v58  ;;  %s3561_s8 = sld [smem:[#allocation2 + $0x683]] }
  0x94   : > { %1047 = vperm.xlu1 %2478, %v2834_v2   ;;  %v3283_v25 = vadd.f32 %v754_v34, %v748_v10  ;;  %v694_v13 = vadd.f32 %v690_v38, %v684_v59  ;;  %v701_v34 = vmul.f32 %v2941_v61, %v3228_v58  ;;  %v4787_v10 = vmov 24  }
  0x95   : > { %v695_v39 = vadd.f32 %v691_v40, %v685_v16  ;;  %v3299_v45 = vadd.f32 %v755_v18, %v749_v21  ;;  %v731_v46 = vmul.f32 %v727_v29, %v2892_v31  ;;  %v737_v38 = vmul.f32 %v2902_v37, %v733_v28 }
  0x96   : > { %2494 = vset.pattern.permute.xlu0 %v4788_v17  ;;  %4846 = vst [vmem:[#allocation27_spill] sm:$0xff] %v3283_v25  ;;  %v4848_v59 = vmov 14   ;;  %v740_v58 = vadd.f32 %v736_v0, %v730_v33  ;;  %v746_v16 = vmul.f32 %v2910_v42, %v743_v51  ;;  %v3309_v21 = vadd.f32 %v700_v47, %v694_v13 }
  0x97   : > { %1607 = vperm.xlu0 %2494, %v2834_v2   ;;  %4847 = vst [vmem:[#allocation28_spill] sm:$0xff] %v3299_v45  ;;  %v747_v29 = vmul.f32 %v2922_v52, %v743_v51  ;;  %v786_v18 = vmul.f32 %v783_v49, %v2870_v14  ;;  %v787_v28 = vmul.f32 %v783_v49, %v2892_v31  ;;  %v789_v0 = vstv %s3267_s11  ;;  %s3535_s11 = sld [smem:[#allocation2 + $0x681]] }
  0x98   : > { %1051 = vperm.xlu1 %2478, %v2845_v5   ;;  %4849 = vst [vmem:[#allocation29_spill] sm:$0xff] %v3309_v21  ;;  %v756_v33 = vmul.f32 %v2925_v53, %v3250_v63  ;;  %v741_v13 = vadd.f32 %v737_v38, %v731_v46  ;;  %v757_v51 = vmul.f32 %v2941_v61, %v3250_v63  ;;  %v4786_v40 = vmov 26   ;;  %v3514_v21 = vld [vmem:[%s2821_s22 + $0x50] sm:$0xff] }
  0x99   : > { %v792_v14 = vmul.f32 %v2878_v19, %v789_v0  ;;  %v793_v47 = vmul.f32 %v2902_v37, %v789_v0  ;;  %v784_v54 = vmul.f32 %v783_v49, %v2837_v3  ;;  %v4851_v22 = vmov 15  }
  0x9a   : > { %v750_v19 = vadd.f32 %v746_v16, %v740_v58  ;;  %v3342_v17 = vstv %s3296_s27  ;;  %v812_v60 = vmul.f32 %v2925_v53, %v809_v32  ;;  %v791_v63 = vmul.f32 %v2853_v7, %v789_v0  ;;  %s3577_s27 = sld [smem:[#allocation2 + $0x700]] }
  0x9b   : > { %2497 = vset.pattern.permute.xlu0 %v4787_v10  ;;  %v796_v46 = vadd.f32 %v792_v14, %v786_v18  ;;  %v797_v38 = vadd.f32 %v793_v47, %v787_v28  ;;  %v790_v10 = vmul.f32 %v2850_v6, %v789_v0  ;;  %v800_v58 = vmul.f32 %v2856_v8, %v799_v57 }
  0x9c   : > { %2480 = vset.pattern.permute.xlu1 %v4848_v59  ;;  %1667 = vperm.xlu0 %2497, %v2845_v5   ;;  %v3316_v59 = vadd.f32 %v701_v34, %v695_v39  ;;  %v802_v39 = vmul.f32 %v2910_v42, %v799_v57  ;;  %v803_v34 = vmul.f32 %v2922_v52, %v799_v57  ;;  %v4791_v28 = vmov 27  }
  0x9d   : > { %1107 = vperm.xlu1 %2480, %v2845_v5   ;;  %v794_v18 = vadd.f32 %v790_v10, %v784_v54  ;;  %v810_v0 = vmul.f32 %v2873_v15, %v809_v32  ;;  %v840_v14 = vmul.f32 %v3342_v17, %v2837_v3  ;;  %v2678_v47 = vmov 16   ;;  %v3435_v3 = vld [vmem:[%s2821_s22 + $0x40] sm:$0xff] }
  0x9e   : > { %4850 = vst [vmem:[#allocation30_spill] sm:$0xff] %v3316_v59  ;;  %v806_v16 = vadd.f32 %v802_v39, %v796_v46  ;;  %v841_v54 = vmul.f32 %v3342_v17, %v2842_v4  ;;  %v3363_v10 = vstv %s3314_s26  ;;  %v811_v46 = vmul.f32 %v2881_v20, %v809_v32  ;;  %s3585_s26 = sld [smem:[#allocation2 + $0x701]] }
  0x9f   : > { %v804_v39 = vadd.f32 %v800_v58, %v794_v18  ;;  %v3390_v18 = vstv %s3336_s28  ;;  %v4873_v25 = vmax.f32 %v2960_v26, 0.0  ;;  %s3620_s28 = sld [smem:[#allocation2 + $0x703]] }
  0xa0   : > { %2499 = vset.pattern.permute.xlu0 %v4786_v40  ;;  %v785_v40 = vmul.f32 %v783_v49, %v2842_v4  ;;  %v813_v49 = vmul.f32 %v2941_v61, %v809_v32 }
  0xa1   : > { %2481 = vset.pattern.permute.xlu1 %v4851_v22  ;;  %1775 = vperm.xlu0 %2499, %v2834_v2   ;;  %v751_v22 = vadd.f32 %v747_v29, %v741_v13  ;;  %v801_v13 = vmul.f32 %v2859_v9, %v799_v57  ;;  %v3369_v57 = vld [vmem:[%s2831_s23] sm:$0xff] }
  0xa2   : > { %1159 = vperm.xlu1 %2481, %v2834_v2   ;;  %v807_v2 = vadd.f32 %v803_v34, %v797_v38  ;;  %v795_v29 = vadd.f32 %v791_v63, %v785_v40  ;;  %v3366_v40 = vstv %s3322_s19  ;;  %v3374_v63 = vadd.f32 %v756_v33, %v750_v19  ;;  %s3608_s19 = sld [smem:[#allocation2 + $0x702]] }
  0xa3   : > { %v3380_v4 = vadd.f32 %v757_v51, %v751_v22  ;;  %v847_v38 = vmul.f32 %v2853_v7, %v3363_v10  ;;  %v856_v58 = vmul.f32 %v2856_v8, %v3366_v40  ;;  %v3387_v33 = vadd.f32 %v812_v60, %v806_v16  ;;  %v3400_v60 = vld [vmem:[%s2831_s23 + $0x8] sm:$0xff]  ;;  %s3438_s23 = sld [smem:[#allocation2 + $0x600]] }
  0xa4   : > { %4852 = vst [vmem:[#allocation31_spill] sm:$0xff] %v3374_v63  ;;  %v805_v19 = vadd.f32 %v801_v13, %v795_v29  ;;  %v4790_v51 = vmov 29   ;;  %v3393_v32 = vadd.f32 %v813_v49, %v807_v2  ;;  %v3395_v7 = vadd.f32 %v810_v0, %v804_v39  ;;  %v3411_v13 = vld [vmem:[%s2821_s22] sm:$0xff]  ;;  %v3415_v0 = vld [vmem:[%s2821_s22 + $0x8] sm:$0xff] }
  0xa5   : > { %2502 = vset.pattern.permute.xlu0 %v4791_v28  ;;  %4853 = vst [vmem:[#allocation32_spill] sm:$0xff] %v3380_v4  ;;  %4854 = vst [vmem:[#allocation33_spill] sm:$0xff] %v3387_v33  ;;  %v851_v22 = vadd.f32 %v847_v38, %v841_v54  ;;  %v857_v8 = vmul.f32 %v2859_v9, %v3366_v40  ;;  %v866_v16 = vmul.f32 %v2873_v15, %v3390_v18  ;;  %v4792_v15 = vmov 30   ;;  %v3479_v63 = vld [vmem:[%s2821_s22 + $0x60] sm:$0xff] }
  0xa6   : > { %2483 = vset.pattern.permute.xlu1 %v2678_v47  ;;  %1835 = vperm.xlu0 %2502, %v2845_v5   ;;  %v846_v5 = vmul.f32 %v2850_v6, %v3363_v10  ;;  %4855 = vst [vmem:[#allocation34_spill] sm:$0xff] %v3393_v32  ;;  %4856 = vst [vmem:[#allocation35_spill] sm:$0xff] %v3395_v7  ;;  %v895_v29 = vstv %s3344_s29  ;;  %v3408_v2 = vstv %s3349_s30  ;;  %v3419_v47 = vld [vmem:[%s2821_s22 + $0x20] sm:$0xff]  ;;  %s3710_s29 = sld [smem:[#allocation2 + $0x780]] }
  0xa7   : > { %1215 = vperm.xlu1 %2483, %v3369_v57   ;;  %v896_v9 = vmul.f32 %v3411_v13, %v895_v29  ;;  %v902_v39 = vmul.f32 %v3419_v47, %v3408_v2  ;;  %v3424_v54 = vadd.f32 %v811_v46, %v805_v19  ;;  %v4859_v46 = vmov 17   ;;  %s3719_s30 = sld [smem:[#allocation2 + $0x781]] }
  0xa8   : > { %v850_v6 = vadd.f32 %v846_v5, %v840_v14  ;;  %v897_v14 = vmul.f32 %v3415_v0, %v895_v29  ;;  %v3427_v5 = vld [vmem:[%s2821_s22 + $0x28] sm:$0xff]  ;;  %v843_v4 = vmul.f32 %v3342_v17, %v2892_v31 }
  0xa9   : > { %4857 = vst [vmem:[#allocation36_spill] sm:$0xff] %v3424_v54  ;;  %4858 = vst [vmem:[#allocation37_spill] sm:$0xff] %v3427_v5  ;;  %v903_v38 = vmul.f32 %v3427_v5, %v3408_v2  ;;  %v906_v34 = vadd.f32 %v902_v39, %v896_v9  ;;  %v3448_v9 = vstv %s3378_s5  ;;  %v3469_v39 = vld [vmem:[%s2821_s22 + $0x30] sm:$0xff]  ;;  %s3752_s5 = sld [smem:[#allocation2 + $0x783]] }
  0xaa   : > { %2504 = vset.pattern.permute.xlu0 %v4790_v51  ;;  %v860_v49 = vadd.f32 %v856_v58, %v850_v6  ;;  %v911_v58 = vstv %s3357_s4  ;;  %v861_v6 = vadd.f32 %v857_v8, %v851_v22  ;;  %v867_v51 = vmul.f32 %v2881_v20, %v3390_v18  ;;  %v3444_v8 = vld [vmem:[%s2821_s22 + $0x48] sm:$0xff]  ;;  %s3742_s4 = sld [smem:[#allocation2 + $0x782]] }
  0xab   : > { %1219 = vperm.xlu1 %2483, %v3400_v60   ;;  %1943 = vperm.xlu0 %2504, %v3369_v57   ;;  %v912_v28 = vmul.f32 %v3435_v3, %v911_v58  ;;  %v907_v22 = vadd.f32 %v903_v38, %v897_v14  ;;  %v913_v20 = vmul.f32 %v3444_v8, %v911_v58  ;;  %v3462_v14 = vld [vmem:[%s2821_s22 + $0x10] sm:$0xff] }
  0xac   : > { %v842_v38 = vmul.f32 %v3462_v14, %v3342_v17  ;;  %v848_v19 = vmul.f32 %v3469_v39, %v3363_v10  ;;  %v922_v32 = vmul.f32 %v3479_v63, %v3448_v9  ;;  %v3484_v17 = vld [vmem:[%s2821_s22 + $0x68] sm:$0xff] }
  0xad   : > { %v916_v7 = vadd.f32 %v912_v28, %v906_v34  ;;  %v917_v31 = vadd.f32 %v913_v20, %v907_v22  ;;  %4862 = vst [vmem:[#allocation40_spill] sm:$0xff] %v3484_v17  ;;  %v923_v59 = vmul.f32 %v3484_v17, %v3448_v9  ;;  %v898_v34 = vmul.f32 %v3462_v14, %v895_v29 }
  0xae   : > { %v904_v22 = vmul.f32 %v3469_v39, %v3408_v2  ;;  %v4800_v20 = vmov 31   ;;  %v859_v28 = vmul.f32 %v2922_v52, %v3366_v40 }
  0xaf   : > { %2485 = vset.pattern.permute.xlu1 %v4859_v46  ;;  %2507 = vset.pattern.permute.xlu0 %v4792_v15  ;;  %v3456_v15 = vadd.f32 %v866_v16, %v860_v49  ;;  %v849_v16 = vmul.f32 %v2902_v37, %v3363_v10  ;;  %v3476_v46 = vadd.f32 %v867_v51, %v861_v6  ;;  %v4863_v10 = vmov 18   ;;  %v3496_v51 = vld [vmem:[%s2821_s22 + $0x18] sm:$0xff] }
  0xb0   : > { %1275 = vperm.xlu1 %2485, %v3400_v60   ;;  %2003 = vperm.xlu0 %2507, %v3400_v60   ;;  %v858_v37 = vmul.f32 %v2910_v42, %v3366_v40  ;;  %v899_v6 = vmul.f32 %v3496_v51, %v895_v29  ;;  %v852_v42 = vadd.f32 %v848_v19, %v842_v38  ;;  %v3506_v49 = vld [vmem:[%s2821_s22 + $0x38] sm:$0xff] }
  0xb1   : > { %4860 = vst [vmem:[#allocation38_spill] sm:$0xff] %v3456_v15  ;;  %4861 = vst [vmem:[#allocation39_spill] sm:$0xff] %v3476_v46  ;;  %v905_v29 = vmul.f32 %v3506_v49, %v3408_v2  ;;  %v3511_v54 = vadd.f32 %v922_v32, %v916_v7  ;;  %v914_v19 = vmul.f32 %v3514_v21, %v911_v58  ;;  %v951_v15 = vstv %s3438_s23  ;;  %s3784_s23 = sld [smem:[#allocation2 + $0x800]] }
  0xb2   : > { %v869_v40 = vmul.f32 %v2941_v61, %v3390_v18  ;;  %v3522_v2 = vadd.f32 %v923_v59, %v917_v31  ;;  %v957_v32 = vstv %s3450_s6  ;;  %v967_v7 = vstv %s3459_s7  ;;  %s3793_s6 = sld [smem:[#allocation2 + $0x801]] }
  0xb3   : > { %4864 = vst [vmem:[#allocation41_spill] sm:$0xff] %v3511_v54  ;;  %v909_v38 = vadd.f32 %v905_v29, %v899_v6  ;;  %v961_v31 = vmul.f32 %v3506_v49, %v957_v32  ;;  %s3815_s7 = sld [smem:[#allocation2 + $0x802]] }
  0xb4   : > { %2486 = vset.pattern.permute.xlu1 %v4863_v10  ;;  %2509 = vset.pattern.permute.xlu0 %v4800_v20  ;;  %v853_v10 = vadd.f32 %v849_v16, %v843_v4  ;;  %v908_v20 = vadd.f32 %v904_v22, %v898_v34  ;;  %v868_v4 = vmul.f32 %v2925_v53, %v3390_v18  ;;  %v2682_v34 = vmov 19   ;;  %v3530_v53 = vld [vmem:[%s2821_s22 + $0x70] sm:$0xff] }
  0xb5   : > { %1327 = vperm.xlu1 %2486, %v3369_v57   ;;  %v915_v16 = vmul.f32 %v2922_v52, %v911_v58  ;;  %4865 = vst [vmem:[#allocation42_spill] sm:$0xff] %v3522_v2  ;;  %v862_v22 = vadd.f32 %v858_v37, %v852_v42  ;;  %v924_v61 = vmul.f32 %v3530_v53, %v3448_v9  ;;  %v4872_v2 = vmax.f32 %v2932_v55, 0.0 }
  0xb6   : > { %v863_v46 = vadd.f32 %v859_v28, %v853_v10  ;;  %v954_v52 = vmul.f32 %v3462_v14, %v951_v15  ;;  %v918_v59 = vadd.f32 %v914_v19, %v908_v20  ;;  %v955_v18 = vmul.f32 %v3496_v51, %v951_v15  ;;  %v3544_v28 = vld [vmem:[%s2821_s22 + $0x78] sm:$0xff] }
  0xb7   : > { %v960_v58 = vmul.f32 %v3469_v39, %v957_v32  ;;  %v919_v37 = vadd.f32 %v915_v16, %v909_v38  ;;  %v925_v6 = vmul.f32 %v3544_v28, %v3448_v9  ;;  %v970_v42 = vmul.f32 %v3514_v21, %v967_v7  ;;  %v3551_v20 = vld [vmem:[%s2821_s22 + $0x58] sm:$0xff] }
  0xb8   : > { %v977_v10 = vstv %s3490_s9  ;;  %v971_v19 = vmul.f32 %v3551_v20, %v967_v7  ;;  %v3555_v44 = vadd.f32 %v868_v4, %v862_v22  ;;  %v3557_v45 = vadd.f32 %v869_v40, %v863_v46  ;;  %s3820_s9 = sld [smem:[#allocation2 + $0x880]] }
  0xb9   : > { %2488 = vset.pattern.permute.xlu1 %v2682_v34  ;;  %v964_v29 = vadd.f32 %v960_v58, %v954_v52  ;;  %v965_v34 = vadd.f32 %v961_v31, %v955_v18  ;;  %v980_v33 = vmul.f32 %v3530_v53, %v977_v10  ;;  %v952_v38 = vmul.f32 %v3411_v13, %v951_v15 }
  0xba   : > { %1383 = vperm.xlu1 %2488, %v3369_v57   ;;  %4866 = vst [vmem:[#allocation43_spill] sm:$0xff] %v3555_v44  ;;  %4867 = vst [vmem:[#allocation44_spill] sm:$0xff] %v3557_v45  ;;  %v953_v16 = vmul.f32 %v3415_v0, %v951_v15  ;;  %v3564_v9 = vadd.f32 %v924_v61, %v918_v59  ;;  %v958_v18 = vmul.f32 %v3419_v47, %v957_v32 }
  0xbb   : > { %v974_v52 = vadd.f32 %v970_v42, %v964_v29  ;;  %v959_v4 = vmul.f32 %v3427_v5, %v957_v32  ;;  %v3570_v22 = vadd.f32 %v925_v6, %v919_v37  ;;  %v981_v15 = vmul.f32 %v3544_v28, %v977_v10 }
  0xbc   : > { %4868 = vst [vmem:[#allocation45_spill] sm:$0xff] %v3564_v9  ;;  %v975_v58 = vadd.f32 %v971_v19, %v965_v34  ;;  %v968_v61 = vmul.f32 %v3435_v3, %v967_v7  ;;  %v969_v59 = vmul.f32 %v3444_v8, %v967_v7  ;;  %v962_v42 = vadd.f32 %v958_v18, %v952_v38 }
  0xbd   : > { %4869 = vst [vmem:[#allocation46_spill] sm:$0xff] %v3570_v22  ;;  %v3573_v31 = vadd.f32 %v980_v33, %v974_v52  ;;  %v963_v32 = vadd.f32 %v959_v4, %v953_v16  ;;  %v3580_v29 = vstv %s3527_s10  ;;  %v3583_v46 = vstv %s3535_s11  ;;  %s3827_s10 = sld [smem:[#allocation2 + $0x803]] }
  0xbe   : > { %1387 = vperm.xlu1 %2488, %v3400_v60   ;;  %v4871_v37 = vmov 20   ;;  %v3592_v19 = vstv %s3541_s17  ;;  %v1008_v16 = vmul.f32 %v3411_v13, %v3580_v29  ;;  %v1009_v52 = vmul.f32 %v3415_v0, %v3580_v29  ;;  %s3834_s11 = sld [smem:[#allocation2 + $0x881]] }
  0xbf   : > { %4870 = vst [vmem:[#allocation47_spill] sm:$0xff] %v3573_v31  ;;  %v1014_v18 = vmul.f32 %v3419_v47, %v3583_v46  ;;  %v1015_v4 = vmul.f32 %v3427_v5, %v3583_v46  ;;  %v3604_v34 = vadd.f32 %v981_v15, %v975_v58  ;;  %v978_v33 = vmul.f32 %v3479_v63, %v977_v10  ;;  %s3865_s17 = sld [smem:[#allocation2 + $0x882]] }
  0xc0   : > { %v979_v6 = vmul.f32 %v3484_v17, %v977_v10  ;;  %v972_v9 = vadd.f32 %v968_v61, %v962_v42  ;;  %v973_v45 = vadd.f32 %v969_v59, %v963_v32  ;;  %v3612_v44 = vstv %s3561_s8  ;;  %s3871_s8 = sld [smem:[#allocation2 + $0x883]] }
  0xc1   : > { %v1018_v15 = vadd.f32 %v1014_v18, %v1008_v16  ;;  %v1024_v58 = vmul.f32 %v3435_v3, %v3592_v19  ;;  %v4874_v10 = vmax.f32 %v2934_v56, 0.0  ;;  %v4875_v59 = vmax.f32 %v2962_v27, 0.0 }
  0xc2   : > { %2490 = vset.pattern.permute.xlu1 %v4871_v37  ;;  %v4876_v32 = vmov 21   ;;  %v1019_v26 = vadd.f32 %v1015_v4, %v1009_v52  ;;  %v4877_v16 = vmax.f32 %v2964_v30, 0.0  ;;  %v4878_v40 = vmax.f32 %v2988_v50, 0.0 }
  0xc3   : > { %1443 = vperm.xlu1 %2490, %v3400_v60   ;;  %v376_v7 = vpop.permute.xlu1 %375  ;;  %v319_v38 = vpop.permute.xlu0 %318  ;;  %v4879_v56 = vmax.f32 %v2994_v62, 0.0  ;;  %v4880_v27 = vmax.f32 %v3010_v24, 0.0  ;;  %v3640_v52 = vadd.f32 %v979_v6, %v973_v45  ;;  %v3643_v4 = vstv %s3577_s27  ;;  %s3974_s27 = sld [smem:[#allocation2 + $0x900]] }
  0xc4   : > { %v382_v54 = vmul.f32 %v376_v7, %v4872_v2  ;;  %v326_v37 = vmul.f32 %v319_v38, %v4873_v25  ;;  %v383_v61 = vmul.f32 %v376_v7, %v4874_v10  ;;  %v327_v42 = vmul.f32 %v319_v38, %v4875_v59 }
  0xc5   : > { %v1025_v25 = vmul.f32 %v3444_v8, %v3592_v19  ;;  %v3638_v10 = vadd.f32 %v978_v33, %v972_v9  ;;  %4881 = vst [vmem:[#allocation48_spill] sm:$0xff] %v3640_v52  ;;  %v3646_v59 = vstv %s3585_s26  ;;  %v1028_v50 = vadd.f32 %v1024_v58, %v1018_v15  ;;  %s3977_s26 = sld [smem:[#allocation2 + $0x901]] }
  0xc6   : > { %v386_v30 = vadd.f32 %v382_v54, %v326_v37  ;;  %v1034_v62 = vmul.f32 %v3479_v63, %v3612_v44  ;;  %v1035_v24 = vmul.f32 %v3484_v17, %v3612_v44  ;;  %v1064_v9 = vmul.f32 %v3411_v13, %v3643_v4 }
  0xc7   : > { %2491 = vset.pattern.permute.xlu1 %v4876_v32  ;;  %v380_v55 = vpop.permute.xlu1 %379  ;;  %v324_v2 = vpop.permute.xlu0 %323  ;;  %v1029_v32 = vadd.f32 %v1025_v25, %v1019_v26  ;;  %v1070_v45 = vmul.f32 %v3419_v47, %v3646_v59  ;;  %v2683_v33 = vmov 22   ;;  %v1065_v15 = vmul.f32 %v3415_v0, %v3643_v4 }
  0xc8   : > { %v384_v18 = vmul.f32 %v380_v55, %v4877_v16  ;;  %v385_v22 = vmul.f32 %v380_v55, %v4878_v40  ;;  %v328_v7 = vmul.f32 %v324_v2, %v4879_v56  ;;  %v329_v38 = vmul.f32 %v324_v2, %v4880_v27  ;;  %1495 = vperm.xlu1 %2491, %v3369_v57  }
  0xc9   : > { %v1071_v58 = vmul.f32 %v3427_v5, %v3646_v59  ;;  %v3661_v55 = vstv %s3608_s19  ;;  %v4882_v2 = vmax.f32 %v3026_v43, 0.0  ;;  %v4883_v25 = vmax.f32 %v3028_v36, 0.0  ;;  %s3984_s19 = sld [smem:[#allocation2 + $0x902]] }
  0xca   : > { %v388_v40 = vadd.f32 %v384_v18, %v328_v7  ;;  %v389_v6 = vadd.f32 %v385_v22, %v329_v38  ;;  %v4884_v22 = vmax.f32 %v3030_v48, 0.0  ;;  %v4885_v56 = vmax.f32 %v3050_v12, 0.0 }
  0xcb   : > { %v387_v27 = vadd.f32 %v383_v61, %v327_v42  ;;  %v3672_v38 = vadd.f32 %v1034_v62, %v1028_v50  ;;  %v1010_v43 = vmul.f32 %v3462_v14, %v3580_v29  ;;  %v1074_v36 = vadd.f32 %v1070_v45, %v1064_v9 }
  0xcc   : > { %2493 = vset.pattern.permute.xlu1 %v2683_v33  ;;  %v436_v54 = vpop.permute.xlu1 %435  ;;  %v432_v37 = vpop.permute.xlu0 %431  ;;  %v3675_v33 = vstv %s3620_s28  ;;  %v1011_v48 = vmul.f32 %v3496_v51, %v3580_v29  ;;  %v1075_v12 = vadd.f32 %v1071_v58, %v1065_v15  ;;  %v1080_v61 = vmul.f32 %v3435_v3, %v3661_v55  ;;  %s4002_s28 = sld [smem:[#allocation2 + $0x903]] }
  0xcd   : > { %v440_v26 = vmul.f32 %v436_v54, %v4882_v2  ;;  %v441_v16 = vmul.f32 %v436_v54, %v4883_v25  ;;  %v438_v18 = vmul.f32 %v432_v37, %v4884_v22  ;;  %v439_v7 = vmul.f32 %v432_v37, %v4885_v56  ;;  %1551 = vperm.xlu1 %2493, %v3369_v57  }
  0xce   : > { %4886 = vst [vmem:[#allocation49_spill] sm:$0xff] %v3672_v38  ;;  %v3681_v25 = vadd.f32 %v1035_v24, %v1029_v32  ;;  %v1081_v62 = vmul.f32 %v3444_v8, %v3661_v55  ;;  %v1017_v29 = vmul.f32 %v3506_v49, %v3583_v46  ;;  %v4889_v32 = vmax.f32 %v3082_v23, 0.0 }
  0xcf   : > { %v444_v2 = vadd.f32 %v440_v26, %v388_v40  ;;  %v445_v31 = vadd.f32 %v441_v16, %v389_v6  ;;  %v442_v54 = vadd.f32 %v438_v18, %v386_v30  ;;  %v443_v42 = vadd.f32 %v439_v7, %v387_v27 }
  0xd0   : > { %4887 = vst [vmem:[#allocation50_spill] sm:$0xff] %v3681_v25  ;;  %v1016_v40 = vmul.f32 %v3469_v39, %v3583_v46  ;;  %v4888_v30 = vmax.f32 %v3074_v11, 0.0  ;;  %v1090_v45 = vmul.f32 %v3479_v63, %v3675_v33  ;;  %v1026_v6 = vmul.f32 %v3514_v21, %v3592_v19  ;;  %v4914_v25 = vld [vmem:[#allocation24_spill] sm:$0xff] }
  0xd1   : > { %1555 = vperm.xlu1 %2493, %v3400_v60   ;;  %v488_v50 = vpop.permute.xlu1 %487  ;;  %v492_v37 = vpop.permute.xlu0 %491  ;;  %v1084_v15 = vadd.f32 %v1080_v61, %v1074_v36  ;;  %v1021_v26 = vadd.f32 %v1017_v29, %v1011_v48  ;;  %v1027_v16 = vmul.f32 %v3551_v20, %v3592_v19  ;;  %v4890_v18 = vmov 23   ;;  %v4891_v19 = vld [vmem:[#allocation14_spill] sm:$0xff] }
  0xd2   : > { %v494_v24 = vmul.f32 %v488_v50, %v4888_v30  ;;  %v495_v9 = vmul.f32 %v488_v50, %v4889_v32  ;;  %v1020_v58 = vadd.f32 %v1016_v40, %v1010_v43  ;;  %v1091_v43 = vmul.f32 %v3484_v17, %v3675_v33  ;;  %v4895_v30 = vld [vmem:[#allocation16_spill] sm:$0xff] }
  0xd3   : > { %v4892_v36 = vmax.f32 %v4891_v19, 0.0  ;;  %v1085_v40 = vadd.f32 %v1081_v62, %v1075_v12  ;;  %v3717_v29 = vadd.f32 %v1090_v45, %v1084_v15  ;;  %v1066_v12 = vmul.f32 %v3462_v14, %v3643_v4 }
  0xd4   : > { %v498_v46 = vadd.f32 %v494_v24, %v442_v54  ;;  %v499_v22 = vadd.f32 %v495_v9, %v443_v42  ;;  %v4893_v54 = vld [vmem:[#allocation15_spill] sm:$0xff]  ;;  %v4896_v24 = vmax.f32 %v4895_v30, 0.0  ;;  %v4897_v9 = vld [vmem:[#allocation17_spill] sm:$0xff]  ;;  %v1030_v19 = vadd.f32 %v1026_v6, %v1020_v58 }
  0xd5   : > { %2495 = vset.pattern.permute.xlu1 %v4890_v18  ;;  %v496_v48 = vmul.f32 %v492_v37, %v4892_v36  ;;  %v4894_v61 = vmax.f32 %v4893_v54, 0.0  ;;  %v4898_v18 = vmax.f32 %v4897_v9, 0.0  ;;  %v1031_v36 = vadd.f32 %v1027_v16, %v1021_v26  ;;  %v4899_v16 = vld [vmem:[#allocation18_spill] sm:$0xff] }
  0xd6   : > { %1611 = vperm.xlu1 %2495, %v3400_v60   ;;  %v544_v50 = vpop.permute.xlu1 %543  ;;  %v600_v7 = vpop.permute.xlu0 %599  ;;  %v1037_v54 = vmul.f32 %v3544_v28, %v3612_v44  ;;  %v1067_v62 = vmul.f32 %v3496_v51, %v3643_v4  ;;  %v1073_v6 = vmul.f32 %v3506_v49, %v3646_v59  ;;  %v3740_v9 = vadd.f32 %v1091_v43, %v1085_v40  ;;  %v4902_v4 = vld [vmem:[#allocation19_spill] sm:$0xff] }
  0xd7   : > { %v497_v42 = vmul.f32 %v492_v37, %v4894_v61  ;;  %v550_v32 = vmul.f32 %v544_v50, %v4896_v24  ;;  %v551_v27 = vmul.f32 %v544_v50, %v4898_v18  ;;  %v1036_v37 = vmul.f32 %v3530_v53, %v3612_v44 }
  0xd8   : > { %v1072_v61 = vmul.f32 %v3469_v39, %v3646_v59  ;;  %v500_v58 = vadd.f32 %v496_v48, %v444_v2  ;;  %v4900_v50 = vmax.f32 %v4899_v16, 0.0  ;;  %v4901_v44 = vmov 24   ;;  %v4906_v59 = vld [vmem:[#allocation21_spill] sm:$0xff] }
  0xd9   : > { %v554_v45 = vadd.f32 %v550_v32, %v498_v46  ;;  %v555_v15 = vadd.f32 %v551_v27, %v499_v22  ;;  %v501_v26 = vadd.f32 %v497_v42, %v445_v31  ;;  %v4903_v46 = vmax.f32 %v4902_v4, 0.0  ;;  %v4904_v27 = vld [vmem:[#allocation20_spill] sm:$0xff] }
  0xda   : > { %v606_v30 = vmul.f32 %v600_v7, %v4900_v50  ;;  %2496 = vset.pattern.permute.xlu1 %v4901_v44  ;;  %v548_v24 = vpop.permute.xlu1 %547  ;;  %v4905_v32 = vmax.f32 %v4904_v27, 0.0  ;;  %v4907_v2 = vmax.f32 %v4906_v59, 0.0  ;;  %v1076_v43 = vadd.f32 %v1072_v61, %v1066_v12 }
  0xdb   : > { %v607_v22 = vmul.f32 %v600_v7, %v4903_v46  ;;  %1663 = vperm.xlu1 %2496, %v3369_v57   ;;  %v1077_v42 = vadd.f32 %v1073_v6, %v1067_v62  ;;  %v1082_v40 = vmul.f32 %v3514_v21, %v3661_v55  ;;  %v1083_v7 = vmul.f32 %v3551_v20, %v3661_v55 }
  0xdc   : > { %v552_v18 = vmul.f32 %v548_v24, %v4905_v32  ;;  %v553_v31 = vmul.f32 %v548_v24, %v4907_v2  ;;  %v3758_v44 = vadd.f32 %v1036_v37, %v1030_v19  ;;  %v3760_v4 = vadd.f32 %v1037_v54, %v1031_v36  ;;  %v4910_v37 = vld [vmem:[#allocation22_spill] sm:$0xff] }
  0xdd   : > { %v1092_v24 = vmul.f32 %v3530_v53, %v3675_v33  ;;  %v1093_v46 = vmul.f32 %v3544_v28, %v3675_v33  ;;  %v1119_v12 = vstv %s3710_s29  ;;  %v1125_v62 = vstv %s3719_s30  ;;  %s4048_s29 = sld [smem:[#allocation2 + $0x980]] }
  0xde   : > { %v556_v16 = vadd.f32 %v552_v18, %v500_v58  ;;  %v557_v50 = vadd.f32 %v553_v31, %v501_v26  ;;  %4908 = vst [vmem:[#allocation14_spill] sm:$0xff] %v3758_v44  ;;  %4909 = vst [vmem:[#allocation15_spill] sm:$0xff] %v3760_v4  ;;  %v2684_v61 = vmov 25   ;;  %v1122_v27 = vmul.f32 %v3462_v14, %v1119_v12  ;;  %v4912_v26 = vld [vmem:[#allocation23_spill] sm:$0xff]  ;;  %v660_v18 = vpop.permute.xlu0 %659  ;;  %s4054_s30 = sld [smem:[#allocation2 + $0x981]] }
  0xdf   : > { %2498 = vset.pattern.permute.xlu1 %v2684_v61  ;;  %v604_v6 = vpop.permute.xlu1 %603  ;;  %v1123_v55 = vmul.f32 %v3496_v51, %v1119_v12  ;;  %v1128_v19 = vmul.f32 %v3469_v39, %v1125_v62  ;;  %v1129_v36 = vmul.f32 %v3506_v49, %v1125_v62  ;;  %v4911_v54 = vmax.f32 %v4910_v37, 0.0  ;;  %v4954_v61 = vld [vmem:[#allocation36_spill] sm:$0xff] }
  0xe0   : > { %v4913_v32 = vmax.f32 %v4912_v26, 0.0  ;;  %1719 = vperm.xlu1 %2498, %v3369_v57   ;;  %v1086_v59 = vadd.f32 %v1082_v40, %v1076_v43  ;;  %v1087_v2 = vadd.f32 %v1083_v7, %v1077_v42  ;;  %v610_v31 = vadd.f32 %v606_v30, %v554_v45 }
  0xe1   : > { %v608_v58 = vmul.f32 %v604_v6, %v4911_v54  ;;  %v1132_v54 = vadd.f32 %v1128_v19, %v1122_v27  ;;  %v1133_v11 = vadd.f32 %v1129_v36, %v1123_v55  ;;  %v611_v26 = vadd.f32 %v607_v22, %v555_v15 }
  0xe2   : > { %v609_v33 = vmul.f32 %v604_v6, %v4913_v32  ;;  %v4915_v6 = vmax.f32 %v4914_v25, 0.0  ;;  %v1135_v38 = vstv %s3742_s4  ;;  %v1145_v52 = vstv %s3752_s5  ;;  %s4064_s4 = sld [smem:[#allocation2 + $0x982]] }
  0xe3   : > { %v612_v48 = vadd.f32 %v608_v58, %v556_v16  ;;  %v3787_v30 = vadd.f32 %v1092_v24, %v1086_v59  ;;  %v3789_v43 = vadd.f32 %v1093_v46, %v1087_v2  ;;  %v1138_v42 = vmul.f32 %v3514_v21, %v1135_v38  ;;  %v768_v16 = vpop.permute.xlu0 %767  ;;  %s4071_s5 = sld [smem:[#allocation2 + $0xa00]] }
  0xe4   : > { %v613_v37 = vadd.f32 %v609_v33, %v557_v50  ;;  %v664_v32 = vmul.f32 %v660_v18, %v4915_v6  ;;  %1723 = vperm.xlu1 %2498, %v3400_v60   ;;  %v656_v45 = vpop.permute.xlu1 %655  ;;  %v1139_v40 = vmul.f32 %v3551_v20, %v1135_v38  ;;  %v4918_v25 = vmax.f32 %v3255_v35, 0.0  ;;  %v4922_v6 = vld [vmem:[#allocation27_spill] sm:$0xff] }
  0xe5   : > { %4916 = vst [vmem:[#allocation16_spill] sm:$0xff] %v3787_v30  ;;  %4917 = vst [vmem:[#allocation17_spill] sm:$0xff] %v3789_v43  ;;  %v4919_v22 = vmax.f32 %v3263_v1, 0.0  ;;  %v1120_v50 = vmul.f32 %v3411_v13, %v1119_v12  ;;  %v1121_v24 = vmul.f32 %v3415_v0, %v1119_v12  ;;  %v1142_v27 = vadd.f32 %v1138_v42, %v1132_v54  ;;  %v4924_v54 = vld [vmem:[#allocation28_spill] sm:$0xff] }
  0xe6   : > { %v662_v15 = vmul.f32 %v656_v45, %v4918_v25  ;;  %v1143_v46 = vadd.f32 %v1139_v40, %v1133_v11  ;;  %v1148_v55 = vmul.f32 %v3530_v53, %v1145_v52  ;;  %v1149_v19 = vmul.f32 %v3544_v28, %v1145_v52 }
  0xe7   : > { %v663_v7 = vmul.f32 %v656_v45, %v4919_v22  ;;  %v1126_v33 = vmul.f32 %v3419_v47, %v1125_v62  ;;  %v1127_v35 = vmul.f32 %v3427_v5, %v1125_v62  ;;  %v4920_v1 = vmax.f32 %v3223_v41, 0.0 }
  0xe8   : > { %v666_v36 = vadd.f32 %v662_v15, %v610_v31  ;;  %v4921_v2 = vmov 26   ;;  %v4923_v45 = vmax.f32 %v4922_v6, 0.0  ;;  %v4925_v11 = vmax.f32 %v4924_v54, 0.0  ;;  %v4926_v15 = vld [vmem:[#allocation25_spill] sm:$0xff]  ;;  %v828_v6 = vpop.permute.xlu0 %827 }
  0xe9   : > { %v667_v58 = vadd.f32 %v663_v7, %v611_v26  ;;  %v665_v59 = vmul.f32 %v660_v18, %v4920_v1  ;;  %2500 = vset.pattern.permute.xlu1 %v4921_v2  ;;  %v1136_v40 = vmul.f32 %v3435_v3, %v1135_v38  ;;  %v712_v31 = vpop.permute.xlu1 %711  ;;  %v1130_v41 = vadd.f32 %v1126_v33, %v1120_v50 }
  0xea   : > { %v774_v12 = vmul.f32 %v768_v16, %v4923_v45  ;;  %v3812_v42 = vmul.f32 %v768_v16, %v4925_v11  ;;  %1779 = vperm.xlu1 %2500, %v3400_v60   ;;  %v1131_v18 = vadd.f32 %v1127_v35, %v1121_v24  ;;  %v1137_v26 = vmul.f32 %v3444_v8, %v1135_v38  ;;  %v4928_v16 = vld [vmem:[#allocation26_spill] sm:$0xff] }
  0xeb   : > { %v668_v25 = vadd.f32 %v664_v32, %v612_v48  ;;  %v4927_v22 = vmax.f32 %v4926_v15, 0.0  ;;  %v4929_v1 = vmax.f32 %v4928_v16, 0.0  ;;  %v3829_v50 = vadd.f32 %v1148_v55, %v1142_v27 }
  0xec   : > { %v3831_v24 = vadd.f32 %v1149_v19, %v1143_v46  ;;  %v1140_v38 = vadd.f32 %v1136_v40, %v1130_v41  ;;  %v1146_v33 = vmul.f32 %v3479_v63, %v1145_v52  ;;  %v3837_v35 = vstv %s3784_s23  ;;  %v4933_v40 = vld [vmem:[#allocation29_spill] sm:$0xff]  ;;  %s4080_s23 = sld [smem:[#allocation2 + $0x983]] }
  0xed   : > { %v718_v7 = vmul.f32 %v712_v31, %v4927_v22  ;;  %v719_v2 = vmul.f32 %v712_v31, %v4929_v1  ;;  %v3840_v54 = vstv %s3793_s6  ;;  %v669_v11 = vadd.f32 %v665_v59, %v613_v37  ;;  %v716_v15 = vpop.permute.xlu1 %715  ;;  %v4931_v22 = vld [vmem:[#allocation33_spill] sm:$0xff]  ;;  %v4937_v1 = vld [vmem:[#allocation34_spill] sm:$0xff]  ;;  %s4086_s6 = sld [smem:[#allocation2 + $0xa01]] }
  0xee   : > { %v4930_v31 = vmov 27   ;;  %v4932_v27 = vmax.f32 %v4931_v22, 0.0  ;;  %v1141_v46 = vadd.f32 %v1137_v26, %v1131_v18  ;;  %v1147_v19 = vmul.f32 %v3484_v17, %v1145_v52 }
  0xef   : > { %v722_v48 = vadd.f32 %v718_v7, %v666_v36  ;;  %v723_v32 = vadd.f32 %v719_v2, %v667_v58  ;;  %2501 = vset.pattern.permute.xlu1 %v4930_v31  ;;  %v4934_v41 = vmax.f32 %v4933_v40, 0.0  ;;  %v4935_v36 = vld [vmem:[#allocation30_spill] sm:$0xff]  ;;  %v4938_v37 = vmax.f32 %v4937_v1, 0.0  ;;  %v936_v2 = vpop.permute.xlu0 %935 }
  0xf0   : > { %v3845_v55 = vmul.f32 %v828_v6, %v4932_v27  ;;  %v4936_v58 = vmax.f32 %v4935_v36, 0.0  ;;  %1831 = vperm.xlu1 %2501, %v3369_v57   ;;  %v1176_v31 = vmul.f32 %v3411_v13, %v3837_v35  ;;  %v3861_v26 = vadd.f32 %v1146_v33, %v1140_v38  ;;  %v4942_v36 = vld [vmem:[#allocation42_spill] sm:$0xff] }
  0xf1   : > { %v720_v16 = vmul.f32 %v716_v15, %v4934_v41  ;;  %v3855_v59 = vmul.f32 %v828_v6, %v4938_v37  ;;  %v1177_v27 = vmul.f32 %v3415_v0, %v3837_v35  ;;  %v1183_v40 = vmul.f32 %v3427_v5, %v3840_v54  ;;  %v4940_v41 = vld [vmem:[#allocation41_spill] sm:$0xff] }
  0xf2   : > { %v721_v7 = vmul.f32 %v716_v15, %v4936_v58  ;;  %4939 = vst [vmem:[#allocation18_spill] sm:$0xff] %v3861_v26  ;;  %v1182_v15 = vmul.f32 %v3419_v47, %v3840_v54  ;;  %v4941_v38 = vmax.f32 %v4940_v41, 0.0  ;;  %v4943_v58 = vmax.f32 %v4942_v36, 0.0  ;;  %v772_v37 = vpop.permute.xlu1 %771  ;;  %v4947_v36 = vld [vmem:[#allocation32_spill] sm:$0xff] }
  0xf3   : > { %v724_v22 = vadd.f32 %v720_v16, %v668_v25  ;;  %v3881_v25 = vadd.f32 %v1147_v19, %v1141_v46  ;;  %v778_v16 = vadd.f32 %v774_v12, %v722_v48  ;;  %v3889_v41 = vstv %s3827_s10  ;;  %v996_v19 = vpop.permute.xlu0 %995  ;;  %s4227_s10 = sld [smem:[#allocation2 + $0xa80]] }
  0xf4   : > { %v725_v6 = vadd.f32 %v721_v7, %v669_v11  ;;  %v3875_v33 = vmul.f32 %v936_v2, %v4941_v38  ;;  %v3879_v1 = vmul.f32 %v936_v2, %v4943_v58  ;;  %v3884_v11 = vstv %s3815_s7  ;;  %v4945_v38 = vld [vmem:[#allocation31_spill] sm:$0xff]  ;;  %s4104_s7 = sld [smem:[#allocation2 + $0xa02]] }
  0xf5   : > { %4944 = vst [vmem:[#allocation19_spill] sm:$0xff] %v3881_v25  ;;  %v2685_v7 = vmov 28   ;;  %v1186_v45 = vadd.f32 %v1182_v15, %v1176_v31  ;;  %v1192_v62 = vmul.f32 %v3435_v3, %v3884_v11  ;;  %v4946_v23 = vmax.f32 %v4945_v38, 0.0  ;;  %v4952_v31 = vld [vmem:[#allocation35_spill] sm:$0xff] }
  0xf6   : > { %2503 = vset.pattern.permute.xlu1 %v2685_v7  ;;  %v4948_v2 = vmax.f32 %v4947_v36, 0.0  ;;  %v3897_v46 = vstv %s3820_s9  ;;  %v3900_v12 = vstv %s3834_s11  ;;  %v779_v48 = vadd.f32 %v3812_v42, %v723_v32  ;;  %s4115_s9 = sld [smem:[#allocation2 + $0xa03]] }
  0xf7   : > { %v776_v56 = vmul.f32 %v772_v37, %v4946_v23  ;;  %1887 = vperm.xlu1 %2503, %v3369_v57   ;;  %v1187_v15 = vadd.f32 %v1183_v40, %v1177_v27  ;;  %v1193_v7 = vmul.f32 %v3444_v8, %v3884_v11  ;;  %v1233_v36 = vmul.f32 %v3415_v0, %v3897_v46  ;;  %s4239_s11 = sld [smem:[#allocation2 + $0xa81]] }
  0xf8   : > { %v777_v58 = vmul.f32 %v772_v37, %v4948_v2  ;;  %v1232_v37 = vmul.f32 %v3411_v13, %v3897_v46  ;;  %v1196_v2 = vadd.f32 %v1192_v62, %v1186_v45  ;;  %v1202_v42 = vmul.f32 %v3479_v63, %v3889_v41 }
  0xf9   : > { %v780_v23 = vadd.f32 %v776_v56, %v724_v22  ;;  %v1238_v32 = vmul.f32 %v3419_v47, %v3900_v12  ;;  %v1239_v27 = vmul.f32 %v3427_v5, %v3900_v12  ;;  %v824_v56 = vpop.permute.xlu1 %823  ;;  %v4949_v22 = vld [vmem:[#allocation47_spill] sm:$0xff]  ;;  %v1203_v62 = vmul.f32 %v3484_v17, %v3889_v41 }
  0xfa   : > { %v781_v38 = vadd.f32 %v777_v58, %v725_v6  ;;  %v4950_v6 = vmax.f32 %v4949_v22, 0.0  ;;  %v3925_v45 = vstv %s3865_s17  ;;  %v4953_v52 = vmax.f32 %v4952_v31, 0.0  ;;  %s4244_s17 = sld [smem:[#allocation2 + $0xa82]] }
  0xfb   : > { %1891 = vperm.xlu1 %2503, %v3400_v60   ;;  %v4955_v26 = vmax.f32 %v4954_v61, 0.0  ;;  %v1197_v30 = vadd.f32 %v1193_v7, %v1187_v15  ;;  %v3932_v4 = vstv %s3871_s8  ;;  %v1242_v44 = vadd.f32 %v1238_v32, %v1232_v37  ;;  %s4258_s8 = sld [smem:[#allocation2 + $0xa83]] }
  0xfc   : > { %v3919_v40 = vmul.f32 %v996_v19, %v4950_v6  ;;  %v830_v18 = vmul.f32 %v824_v56, %v4953_v52  ;;  %v1243_v22 = vadd.f32 %v1239_v27, %v1233_v36  ;;  %v1248_v6 = vmul.f32 %v3435_v3, %v3925_v45  ;;  %v1104_v52 = vpop.permute.xlu0 %1103 }
  0xfd   : > { %v831_v43 = vmul.f32 %v824_v56, %v4955_v26  ;;  %v1249_v58 = vmul.f32 %v3444_v8, %v3925_v45  ;;  %v4956_v5 = vmax.f32 %v3604_v34, 0.0  ;;  %v3942_v61 = vadd.f32 %v1202_v42, %v1196_v2  ;;  %v4960_v2 = vld [vmem:[#allocation39_spill] sm:$0xff] }
  0xfe   : > { %4951 = vst [vmem:[#allocation20_spill] sm:$0xff] %v3919_v40  ;;  %v834_v25 = vadd.f32 %v830_v18, %v778_v16  ;;  %v4957_v26 = vmov 29   ;;  %v1252_v15 = vadd.f32 %v1248_v6, %v1242_v44  ;;  %v1258_v37 = vmul.f32 %v3479_v63, %v3932_v4  ;;  %v4958_v16 = vld [vmem:[#allocation38_spill] sm:$0xff] }
  0xff   : > { %v835_v40 = vadd.f32 %v831_v43, %v779_v48  ;;  %v3940_v31 = vmul.f32 %v996_v19, %v4956_v5  ;;  %2505 = vset.pattern.permute.xlu1 %v4957_v26  ;;  %v1253_v7 = vadd.f32 %v1249_v58, %v1243_v22  ;;  %v1259_v36 = vmul.f32 %v3484_v17, %v3932_v4  ;;  %v880_v43 = vpop.permute.xlu1 %879 }
 0x100   : > { %1947 = vperm.xlu1 %2505, %v3400_v60   ;;  %v1178_v5 = vmul.f32 %v3462_v14, %v3837_v35  ;;  %v1179_v34 = vmul.f32 %v3496_v51, %v3837_v35  ;;  %v1184_v18 = vmul.f32 %v3469_v39, %v3840_v54  ;;  %v1185_v44 = vmul.f32 %v3506_v49, %v3840_v54  ;;  %v1164_v26 = vpop.permute.xlu0 %1163 }
 0x101   : > { %v4959_v48 = vmax.f32 %v4958_v16, 0.0  ;;  %v4961_v42 = vmax.f32 %v4960_v2, 0.0  ;;  %v3962_v27 = vadd.f32 %v1203_v62, %v1197_v30  ;;  %v1262_v56 = vadd.f32 %v1258_v37, %v1252_v15  ;;  %v4965_v16 = vld [vmem:[#allocation43_spill] sm:$0xff] }
 0x102   : > { %v4962_v58 = vmax.f32 %v3717_v29, 0.0  ;;  %v4963_v35 = vmax.f32 %v3740_v9, 0.0  ;;  %v1188_v17 = vadd.f32 %v1184_v18, %v1178_v5  ;;  %v1194_v54 = vmul.f32 %v3514_v21, %v3884_v11 }
 0x103   : > { %v886_v19 = vmul.f32 %v880_v43, %v4959_v48  ;;  %v887_v32 = vmul.f32 %v880_v43, %v4961_v42  ;;  %v836_v43 = vadd.f32 %v3845_v55, %v780_v23  ;;  %v1263_v15 = vadd.f32 %v1259_v36, %v1253_v7  ;;  %v884_v9 = vpop.permute.xlu1 %883  ;;  %v4967_v23 = vld [vmem:[#allocation44_spill] sm:$0xff] }
 0x104   : > { %v3966_v22 = vmul.f32 %v1104_v52, %v4962_v58  ;;  %v3970_v6 = vmul.f32 %v1104_v52, %v4963_v35  ;;  %v837_v29 = vadd.f32 %v3855_v59, %v781_v38  ;;  %v4964_v37 = vmov 30  }
 0x105   : > { %v890_v30 = vadd.f32 %v886_v19, %v834_v25  ;;  %v891_v62 = vadd.f32 %v887_v32, %v835_v40  ;;  %2506 = vset.pattern.permute.xlu1 %v4964_v37  ;;  %v1210_v52 = vmax.f32 %v3942_v61, 0.0  ;;  %v1189_v5 = vadd.f32 %v1185_v44, %v1179_v34  ;;  %v1272_v44 = vpop.permute.xlu0 %1271  ;;  %v4972_v37 = vld [vmem:[#allocation45_spill] sm:$0xff] }
 0x106   : > { %v1195_v18 = vmul.f32 %v3551_v20, %v3884_v11  ;;  %v4966_v55 = vmax.f32 %v4965_v16, 0.0  ;;  %v4968_v40 = vmax.f32 %v4967_v23, 0.0  ;;  %1999 = vperm.xlu1 %2506, %v3369_v57   ;;  %v1211_v59 = vmax.f32 %v3962_v27, 0.0 }
 0x107   : > { %v1266_v38 = vmax.f32 %v1262_v56, 0.0  ;;  %v4969_v36 = vmax.f32 %v3829_v50, 0.0  ;;  %v4970_v34 = vmax.f32 %v3831_v24, 0.0  ;;  %v1198_v19 = vadd.f32 %v1194_v54, %v1188_v17 }
 0x108   : > { %v888_v25 = vmul.f32 %v884_v9, %v4966_v55  ;;  %v889_v7 = vmul.f32 %v884_v9, %v4968_v40  ;;  %v1204_v2 = vmul.f32 %v3530_v53, %v3889_v41  ;;  %v1267_v58 = vmax.f32 %v1263_v15, 0.0  ;;  %v940_v15 = vpop.permute.xlu1 %939 }
 0x109   : > { %v3994_v48 = vmul.f32 %v1164_v26, %v4969_v36  ;;  %v3998_v11 = vmul.f32 %v1164_v26, %v4970_v34  ;;  %v1234_v56 = vmul.f32 %v3462_v14, %v3897_v46  ;;  %v1199_v50 = vadd.f32 %v1195_v18, %v1189_v5  ;;  %v4974_v18 = vld [vmem:[#allocation46_spill] sm:$0xff] }
 0x10a   : > { %v892_v42 = vadd.f32 %v888_v25, %v836_v43  ;;  %v893_v32 = vadd.f32 %v889_v7, %v837_v29  ;;  %v1235_v35 = vmul.f32 %v3496_v51, %v3897_v46  ;;  %v1240_v24 = vmul.f32 %v3469_v39, %v3900_v12 }
 0x10b   : > { %v1241_v17 = vmul.f32 %v3506_v49, %v3900_v12  ;;  %v946_v26 = vadd.f32 %v3875_v33, %v890_v30  ;;  %v4014_v54 = vadd.f32 %v3879_v1, %v891_v62  ;;  %v4971_v43 = vmov 31  }
 0x10c   : > { %2508 = vset.pattern.permute.xlu1 %v4971_v43  ;;  %v4017_v29 = vmul.f32 %v1272_v44, %v1266_v38  ;;  %v1205_v46 = vmul.f32 %v3544_v28, %v3889_v41  ;;  %v4973_v9 = vmax.f32 %v4972_v37, 0.0  ;;  %v4975_v16 = vmax.f32 %v4974_v18, 0.0 }
 0x10d   : > { %2055 = vperm.xlu1 %2508, %v3369_v57   ;;  %v4026_v33 = vadd.f32 %v1204_v2, %v1198_v19  ;;  %v1250_v1 = vmul.f32 %v3514_v21, %v3925_v45  ;;  %v1244_v30 = vadd.f32 %v1240_v24, %v1234_v56  ;;  %v1251_v62 = vmul.f32 %v3551_v20, %v3925_v45  ;;  %v992_v19 = vpop.permute.xlu1 %991  ;;  %v4977_v24 = vld [vmem:[#allocation48_spill] sm:$0xff] }
 0x10e   : > { %v944_v5 = vmul.f32 %v940_v15, %v4973_v9  ;;  %v945_v12 = vmul.f32 %v940_v15, %v4975_v16  ;;  %v1287_v55 = vstv %s3974_s27  ;;  %v1293_v41 = vstv %s3977_s26  ;;  %s4309_s27 = sld [smem:[#allocation2 + $0xb00]] }
 0x10f   : > { %v1245_v40 = vadd.f32 %v1241_v17, %v1235_v35  ;;  %v1303_v7 = vstv %s3984_s19  ;;  %v1290_v38 = vmul.f32 %v3462_v14, %v1287_v55  ;;  %v1291_v57 = vmul.f32 %v3496_v51, %v1287_v55  ;;  %s4313_s26 = sld [smem:[#allocation2 + $0xb01]] }
 0x110   : > { %v948_v25 = vadd.f32 %v944_v5, %v892_v42  ;;  %v949_v23 = vadd.f32 %v945_v12, %v893_v32  ;;  %v1296_v36 = vmul.f32 %v3469_v39, %v1293_v41  ;;  %v1297_v34 = vmul.f32 %v3506_v49, %v1293_v41  ;;  %v4979_v12 = vld [vmem:[#allocation37_spill] sm:$0xff]  ;;  %s4319_s19 = sld [smem:[#allocation2 + $0xb02]] }
 0x111   : > { %2059 = vperm.xlu1 %2508, %v3400_v60   ;;  %v4040_v2 = vmul.f32 %v1272_v44, %v1267_v58  ;;  %v4042_v45 = vadd.f32 %v1205_v46, %v1199_v50  ;;  %v1313_v32 = vstv %s4002_s28  ;;  %v1254_v56 = vadd.f32 %v1250_v1, %v1244_v30  ;;  %v1048_v5 = vpop.permute.xlu1 %1047  ;;  %s4327_s28 = sld [smem:[#allocation2 + $0xb80]] }
 0x112   : > { %v1260_v14 = vmul.f32 %v3530_v53, %v3932_v4  ;;  %v1300_v35 = vadd.f32 %v1296_v36, %v1290_v38  ;;  %v1301_v51 = vadd.f32 %v1297_v34, %v1291_v57  ;;  %v1255_v39 = vadd.f32 %v1251_v62, %v1245_v40  ;;  %v4982_v62 = vld [vmem:[#allocation50_spill] sm:$0xff]  ;;  %v4984_v36 = vld [vmem:[#allocation20_spill] sm:$0xff] }
 0x113   : > { %v1261_v60 = vmul.f32 %v3544_v28, %v3932_v4  ;;  %v1306_v49 = vmul.f32 %v3514_v21, %v1303_v7  ;;  %v1307_v44 = vmul.f32 %v3551_v20, %v1303_v7  ;;  %v4976_v58 = vmax.f32 %v3638_v10, 0.0 }
 0x114   : > { %v4978_v17 = vmax.f32 %v4977_v24, 0.0  ;;  %v1316_v15 = vmul.f32 %v3530_v53, %v1313_v32  ;;  %v1317_v46 = vmul.f32 %v3544_v28, %v1313_v32  ;;  %v1288_v4 = vmul.f32 %v3411_v13, %v1287_v55  ;;  %v4980_v53 = vld [vmem:[#allocation49_spill] sm:$0xff] }
 0x115   : > { %v998_v50 = vmul.f32 %v992_v19, %v4976_v58  ;;  %v1310_v37 = vadd.f32 %v1306_v49, %v1300_v35  ;;  %v1311_v9 = vadd.f32 %v1307_v44, %v1301_v51  ;;  %v1289_v21 = vmul.f32 %v3415_v0, %v1287_v55  ;;  %v4986_v58 = vld [vmem:[#allocation14_spill] sm:$0xff]  ;;  %v4223_v51 = vld [vmem:[%s2821_s22 + $0x50] sm:$0xff] }
 0x116   : > { %v999_v43 = vmul.f32 %v992_v19, %v4978_v17  ;;  %v4067_v10 = vadd.f32 %v1260_v14, %v1254_v56  ;;  %v1294_v16 = vmul.f32 %v3419_v47, %v1293_v41  ;;  %v1295_v1 = vmul.f32 %v4979_v12, %v1293_v41  ;;  %v4988_v17 = vld [vmem:[#allocation15_spill] sm:$0xff] }
 0x117   : > { %v4981_v28 = vmax.f32 %v4980_v53, 0.0  ;;  %v4983_v13 = vmax.f32 %v4982_v62, 0.0  ;;  %v4077_v0 = vadd.f32 %v1261_v60, %v1255_v39  ;;  %v1304_v55 = vmul.f32 %v3435_v3, %v1303_v7  ;;  %v4990_v62 = vld [vmem:[#allocation16_spill] sm:$0xff] }
 0x118   : > { %v1002_v38 = vadd.f32 %v998_v50, %v946_v26  ;;  %v4082_v57 = vadd.f32 %v1316_v15, %v1310_v37  ;;  %v4084_v47 = vadd.f32 %v1317_v46, %v1311_v9  ;;  %v1298_v41 = vadd.f32 %v1294_v16, %v1288_v4  ;;  %v1052_v26 = vpop.permute.xlu1 %1051  ;;  %v4111_v46 = vld [vmem:[%s2821_s22] sm:$0xff]  ;;  %v4119_v9 = vld [vmem:[%s2821_s22 + $0x8] sm:$0xff] }
 0x119   : > { %v1054_v30 = vmul.f32 %v1048_v5, %v4981_v28  ;;  %v1055_v40 = vmul.f32 %v1048_v5, %v4983_v13  ;;  %v1004_v34 = vadd.f32 %v4984_v36, %v948_v25  ;;  %v1003_v19 = vadd.f32 %v999_v43, %v4014_v54  ;;  %v4129_v16 = vld [vmem:[%s2821_s22 + $0x28] sm:$0xff] }
 0x11a   : > { %v1299_v56 = vadd.f32 %v1295_v1, %v1289_v21  ;;  %v1305_v14 = vmul.f32 %v3444_v8, %v1303_v7  ;;  %v1005_v3 = vadd.f32 %v3940_v31, %v949_v23  ;;  %v4094_v39 = vstv %s4048_s29  ;;  %v4985_v23 = vld [vmem:[#allocation40_spill] sm:$0xff]  ;;  %v4124_v21 = vld [vmem:[%s2821_s22 + $0x20] sm:$0xff]  ;;  %s4333_s29 = sld [smem:[#allocation2 + $0xb03]] }
 0x11b   : > { %v1058_v35 = vadd.f32 %v1054_v30, %v1002_v38  ;;  %v1059_v60 = vadd.f32 %v1055_v40, %v1003_v19  ;;  %v1308_v49 = vadd.f32 %v1304_v55, %v1298_v41  ;;  %v1314_v44 = vmul.f32 %v3479_v63, %v1313_v32 }
 0x11c   : > { %v4098_v25 = vstv %s4054_s30  ;;  %v1324_v8 = vmax.f32 %v4082_v57, 0.0  ;;  %v1315_v7 = vmul.f32 %v4985_v23, %v1313_v32  ;;  %v4987_v50 = vmax.f32 %v4986_v58, 0.0  ;;  %v4163_v58 = vld [vmem:[%s2821_s22 + $0x60] sm:$0xff]  ;;  %s4337_s30 = sld [smem:[#allocation2 + $0xb81]] }
 0x11d   : > { %v4989_v43 = vmax.f32 %v4988_v17, 0.0  ;;  %v1309_v15 = vadd.f32 %v1305_v14, %v1299_v56  ;;  %v1344_v37 = vmul.f32 %v4111_v46, %v4094_v39  ;;  %v1114_v32 = vadd.f32 %v3966_v22, %v1058_v35  ;;  %v1108_v22 = vpop.permute.xlu1 %1107  ;;  %v4992_v56 = vld [vmem:[#allocation17_spill] sm:$0xff]  ;;  %v4151_v35 = vld [vmem:[%s2821_s22 + $0x40] sm:$0xff] }
 0x11e   : > { %v1056_v24 = vmul.f32 %v1052_v26, %v4987_v50  ;;  %v1345_v4 = vmul.f32 %v4119_v9, %v4094_v39  ;;  %v1350_v5 = vmul.f32 %v4124_v21, %v4098_v25  ;;  %v1351_v12 = vmul.f32 %v4129_v16, %v4098_v25 }
 0x11f   : > { %v1057_v63 = vmul.f32 %v1052_v26, %v4989_v43  ;;  %v1115_v1 = vadd.f32 %v3970_v6, %v1059_v60  ;;  %v4134_v53 = vadd.f32 %v1314_v44, %v1308_v49  ;;  %v1359_v28 = vstv %s4064_s4  ;;  %v4155_v49 = vld [vmem:[%s2821_s22 + $0x48] sm:$0xff]  ;;  %s4350_s4 = sld [smem:[#allocation2 + $0xb82]] }
 0x120   : > { %v4138_v30 = vstv %s4071_s5  ;;  %v4991_v13 = vmax.f32 %v4990_v62, 0.0  ;;  %v1354_v55 = vadd.f32 %v1350_v5, %v1344_v37  ;;  %v4143_v38 = vstv %s4080_s23  ;;  %v4994_v62 = vld [vmem:[#allocation18_spill] sm:$0xff]  ;;  %s4356_s5 = sld [smem:[#allocation2 + $0xb83]] }
 0x121   : > { %v4146_v41 = vstv %s4086_s6  ;;  %v1060_v36 = vadd.f32 %v1056_v24, %v1004_v34  ;;  %v1061_v19 = vadd.f32 %v1057_v63, %v1005_v3  ;;  %v4993_v14 = vmax.f32 %v4992_v56, 0.0  ;;  %v1160_v63 = vpop.permute.xlu1 %1159  ;;  %v4996_v56 = vld [vmem:[#allocation19_spill] sm:$0xff]  ;;  %s4398_s23 = sld [smem:[#allocation2 + $0xc00]] }
 0x122   : > { %v1112_v40 = vmul.f32 %v1108_v22, %v4991_v13  ;;  %v1360_v26 = vmul.f32 %v4151_v35, %v1359_v28  ;;  %v1355_v60 = vadd.f32 %v1351_v12, %v1345_v4  ;;  %v1361_v44 = vmul.f32 %v4155_v49, %v1359_v28  ;;  %v4174_v4 = vld [vmem:[%s2821_s22 + $0x68] sm:$0xff]  ;;  %s4404_s6 = sld [smem:[#allocation2 + $0xc01]] }
 0x123   : > { %v1113_v6 = vmul.f32 %v1108_v22, %v4993_v14  ;;  %v1400_v23 = vmul.f32 %v4111_v46, %v4138_v30  ;;  %v1401_v34 = vmul.f32 %v4119_v9, %v4138_v30  ;;  %v1370_v50 = vmul.f32 %v4163_v58, %v4143_v38 }
 0x124   : > { %v1364_v3 = vadd.f32 %v1360_v26, %v1354_v55  ;;  %v1406_v24 = vmul.f32 %v4124_v21, %v4146_v41  ;;  %v1407_v17 = vmul.f32 %v4129_v16, %v4146_v41  ;;  %v1116_v43 = vadd.f32 %v1112_v40, %v1060_v36 }
 0x125   : > { %v4171_v37 = vadd.f32 %v1315_v7, %v1309_v15  ;;  %v1371_v5 = vmul.f32 %v4174_v4, %v4143_v38  ;;  %v4179_v12 = vstv %s4104_s7  ;;  %v1117_v22 = vadd.f32 %v1113_v6, %v1061_v19  ;;  %s4415_s7 = sld [smem:[#allocation2 + $0xc02]] }
 0x126   : > { %v4995_v13 = vmax.f32 %v4994_v62, 0.0  ;;  %v4997_v14 = vmax.f32 %v4996_v56, 0.0  ;;  %v4186_v54 = vstv %s4115_s9  ;;  %v1410_v40 = vadd.f32 %v1406_v24, %v1400_v23  ;;  %v1216_v24 = vpop.permute.xlu1 %1215  ;;  %s4421_s9 = sld [smem:[#allocation2 + $0xc03]] }
 0x127   : > { %v1411_v7 = vadd.f32 %v1407_v17, %v1401_v34  ;;  %v1416_v15 = vmul.f32 %v4151_v35, %v4179_v12  ;;  %v1417_v36 = vmul.f32 %v4155_v49, %v4179_v12  ;;  %v1365_v62 = vadd.f32 %v1361_v44, %v1355_v60  ;;  %v1332_v17 = vpop.permute.xlu0 %1331  ;;  %v4209_v44 = vld [vmem:[%s2821_s22 + $0x30] sm:$0xff] }
 0x128   : > { %v1166_v55 = vmul.f32 %v1160_v63, %v4995_v13  ;;  %v1167_v26 = vmul.f32 %v1160_v63, %v4997_v14  ;;  %v4192_v13 = vadd.f32 %v1370_v50, %v1364_v3  ;;  %v1426_v23 = vmul.f32 %v4163_v58, %v4186_v54  ;;  %v4199_v14 = vld [vmem:[%s2821_s22 + $0x10] sm:$0xff]  ;;  %v4214_v50 = vld [vmem:[%s2821_s22 + $0x38] sm:$0xff] }
 0x129   : > { %v1420_v63 = vadd.f32 %v1416_v15, %v1410_v40  ;;  %v1421_v56 = vadd.f32 %v1417_v36, %v1411_v7  ;;  %v1427_v34 = vmul.f32 %v4174_v4, %v4186_v54  ;;  %v1352_v3 = vmul.f32 %v4209_v44, %v4098_v25 }
 0x12a   : > { %v1170_v19 = vadd.f32 %v1166_v55, %v1114_v32  ;;  %v1171_v6 = vadd.f32 %v1167_v26, %v1115_v1  ;;  %v1346_v32 = vmul.f32 %v4199_v14, %v4094_v39  ;;  %v4204_v1 = vld [vmem:[%s2821_s22 + $0x18] sm:$0xff]  ;;  %v1353_v55 = vmul.f32 %v4214_v50, %v4098_v25 }
 0x12b   : > { %v1347_v60 = vmul.f32 %v4204_v1, %v4094_v39  ;;  %v1222_v26 = vmul.f32 %v1216_v24, %v1210_v52  ;;  %v1223_v40 = vmul.f32 %v1216_v24, %v1211_v59  ;;  %v1430_v7 = vadd.f32 %v1426_v23, %v1420_v63 }
 0x12c   : > { %v1431_v15 = vadd.f32 %v1427_v34, %v1421_v56  ;;  %v1356_v36 = vadd.f32 %v1352_v3, %v1346_v32  ;;  %v1362_v18 = vmul.f32 %v4223_v51, %v1359_v28  ;;  %v1363_v42 = vmul.f32 %v3551_v20, %v1359_v28  ;;  %v1220_v28 = vpop.permute.xlu1 %1219  ;;  %v4249_v34 = vld [vmem:[%s2821_s22 + $0x70] sm:$0xff] }
 0x12d   : > { %v1357_v39 = vadd.f32 %v1353_v55, %v1347_v60  ;;  %v1226_v31 = vadd.f32 %v1222_v26, %v1170_v19  ;;  %v4231_v61 = vmul.f32 %v1332_v17, %v1324_v8  ;;  %v4998_v27 = vmax.f32 %v4084_v47, 0.0 }
 0x12e   : > { %v4237_v59 = vadd.f32 %v1371_v5, %v1365_v62  ;;  %v1172_v25 = vadd.f32 %v3994_v48, %v1116_v43  ;;  %v1227_v20 = vadd.f32 %v1223_v40, %v1171_v6  ;;  %v1322_v19 = vmax.f32 %v4134_v53, 0.0  ;;  %v1440_v62 = vpop.permute.xlu0 %1439  ;;  %v4254_v43 = vld [vmem:[%s2821_s22 + $0x78] sm:$0xff] }
 0x12f   : > { %v4235_v52 = vmul.f32 %v1332_v17, %v4998_v27  ;;  %v1323_v57 = vmax.f32 %v4171_v37, 0.0  ;;  %v1173_v47 = vadd.f32 %v3998_v11, %v1117_v22  ;;  %v1378_v8 = vmax.f32 %v4192_v13, 0.0  ;;  %v4288_v40 = vld [vmem:[%s2821_s22 + $0x58] sm:$0xff] }
 0x130   : > { %v1434_v63 = vmax.f32 %v1430_v7, 0.0  ;;  %v1435_v5 = vmax.f32 %v1431_v15, 0.0  ;;  %v1366_v56 = vadd.f32 %v1362_v18, %v1356_v36  ;;  %v1367_v23 = vadd.f32 %v1363_v42, %v1357_v39  ;;  %v1276_v60 = vpop.permute.xlu1 %1275 }
 0x131   : > { %v1372_v48 = vmul.f32 %v4249_v34, %v4143_v38  ;;  %v1373_v53 = vmul.f32 %v4254_v43, %v4143_v38  ;;  %v1282_v11 = vadd.f32 %v4017_v29, %v1226_v31  ;;  %v1379_v22 = vmax.f32 %v4237_v59, 0.0 }
 0x132   : > { %v1402_v42 = vmul.f32 %v4199_v14, %v4138_v30  ;;  %v1403_v18 = vmul.f32 %v4204_v1, %v4138_v30  ;;  %v4267_v6 = vadd.f32 %v4040_v2, %v1227_v20  ;;  %v4999_v24 = vmax.f32 %v4026_v33, 0.0 }
 0x133   : > { %v1408_v29 = vmul.f32 %v4209_v44, %v4146_v41  ;;  %v1409_v31 = vmul.f32 %v4214_v50, %v4146_v41  ;;  %v5000_v17 = vmax.f32 %v4042_v45, 0.0  ;;  %v4277_v30 = vmul.f32 %v1440_v62, %v1434_v63 }
 0x134   : > { %v1224_v38 = vmul.f32 %v1220_v28, %v4999_v24  ;;  %v4279_v2 = vmul.f32 %v1440_v62, %v1435_v5  ;;  %v1418_v33 = vmul.f32 %v4223_v51, %v4179_v12  ;;  %v4283_v3 = vadd.f32 %v1372_v48, %v1366_v56 }
 0x135   : > { %v1225_v32 = vmul.f32 %v1220_v28, %v5000_v17  ;;  %v4285_v55 = vadd.f32 %v1373_v53, %v1367_v23  ;;  %v1412_v26 = vadd.f32 %v1408_v29, %v1402_v42  ;;  %v1419_v45 = vmul.f32 %v4288_v40, %v4179_v12  ;;  %v1328_v42 = vpop.permute.xlu1 %1327 }
 0x136   : > { %v1413_v41 = vadd.f32 %v1409_v31, %v1403_v18  ;;  %v1428_v7 = vmul.f32 %v4249_v34, %v4186_v54  ;;  %v1455_v15 = vstv %s4227_s10  ;;  %v1461_v36 = vstv %s4239_s11  ;;  %s4431_s10 = sld [smem:[#allocation2 + $0xc80]] }
 0x137   : > { %v5001_v39 = vmax.f32 %v4067_v10, 0.0  ;;  %v5002_v20 = vmax.f32 %v4077_v0, 0.0  ;;  %v1422_v63 = vadd.f32 %v1418_v33, %v1412_v26  ;;  %v1471_v5 = vstv %s4244_s17  ;;  %s4435_s11 = sld [smem:[#allocation2 + $0xc81]] }
 0x138   : > { %v1458_v62 = vmul.f32 %v4199_v14, %v1455_v15  ;;  %v1459_v56 = vmul.f32 %v4204_v1, %v1455_v15  ;;  %v1464_v12 = vmul.f32 %v4209_v44, %v1461_v36  ;;  %v1465_v23 = vmul.f32 %v4214_v50, %v1461_v36  ;;  %s4440_s17 = sld [smem:[#allocation2 + $0xc82]] }
 0x139   : > { %v1280_v27 = vmul.f32 %v1276_v60, %v5001_v39  ;;  %v1281_v28 = vmul.f32 %v1276_v60, %v5002_v20  ;;  %v1228_v48 = vadd.f32 %v1224_v38, %v1172_v25  ;;  %v1229_v53 = vadd.f32 %v1225_v32, %v1173_v47  ;;  %v1384_v39 = vpop.permute.xlu1 %1383 }
 0x13a   : > { %v1380_v18 = vmax.f32 %v4283_v3, 0.0  ;;  %v1481_v10 = vstv %s4258_s8  ;;  %v1423_v24 = vadd.f32 %v1419_v45, %v1413_v41  ;;  %v1429_v0 = vmul.f32 %v4254_v43, %v4186_v54  ;;  %s4448_s8 = sld [smem:[#allocation2 + $0xc83]] }
 0x13b   : > { %v1468_v29 = vadd.f32 %v1464_v12, %v1458_v62  ;;  %v1469_v31 = vadd.f32 %v1465_v23, %v1459_v56  ;;  %v1284_v17 = vadd.f32 %v1280_v27, %v1228_v48  ;;  %v1334_v60 = vmul.f32 %v1328_v42, %v1322_v19 }
 0x13c   : > { %v1474_v33 = vmul.f32 %v4223_v51, %v1471_v5  ;;  %v1475_v26 = vmul.f32 %v4288_v40, %v1471_v5  ;;  %v1285_v25 = vadd.f32 %v1281_v28, %v1229_v53  ;;  %v1432_v47 = vadd.f32 %v1428_v7, %v1422_v63 }
 0x13d   : > { %v1484_v38 = vmul.f32 %v4249_v34, %v1481_v10  ;;  %v1485_v32 = vmul.f32 %v4254_v43, %v1481_v10  ;;  %v1456_v45 = vmul.f32 %v4111_v46, %v1455_v15  ;;  %v1457_v41 = vmul.f32 %v4119_v9, %v1455_v15  ;;  %v1388_v48 = vpop.permute.xlu1 %1387 }
 0x13e   : > { %v1478_v3 = vadd.f32 %v1474_v33, %v1468_v29  ;;  %v1479_v54 = vadd.f32 %v1475_v26, %v1469_v31  ;;  %v1335_v19 = vmul.f32 %v1328_v42, %v1323_v57  ;;  %v4323_v27 = vadd.f32 %v1429_v0, %v1423_v24 }
 0x13f   : > { %v1462_v7 = vmul.f32 %v4124_v21, %v1461_v36  ;;  %v1463_v20 = vmul.f32 %v4129_v16, %v1461_v36  ;;  %v1338_v28 = vadd.f32 %v1334_v60, %v1282_v11  ;;  %v1390_v63 = vmul.f32 %v1384_v39, %v1378_v8 }
 0x140   : > { %v1472_v15 = vmul.f32 %v4151_v35, %v1471_v5  ;;  %v1473_v62 = vmul.f32 %v4155_v49, %v1471_v5  ;;  %v1391_v37 = vmul.f32 %v1384_v39, %v1379_v22  ;;  %v1488_v57 = vadd.f32 %v1484_v38, %v1478_v3 }
 0x141   : > { %v1466_v56 = vadd.f32 %v1462_v7, %v1456_v45  ;;  %v1467_v36 = vadd.f32 %v1463_v20, %v1457_v41  ;;  %v1340_v11 = vadd.f32 %v4231_v61, %v1284_v17  ;;  %v1341_v13 = vadd.f32 %v4235_v52, %v1285_v25 }
 0x142   : > { %v1381_v8 = vmax.f32 %v4285_v55, 0.0  ;;  %v1489_v12 = vadd.f32 %v1485_v32, %v1479_v54  ;;  %v1339_v5 = vadd.f32 %v1335_v19, %v4267_v6  ;;  %v1394_v23 = vadd.f32 %v1390_v63, %v1338_v28 }
 0x143   : > { %v1436_v53 = vmax.f32 %v1432_v47, 0.0  ;;  %v4344_v59 = vstv %s4309_s27  ;;  %v1437_v22 = vmax.f32 %v4323_v27, 0.0  ;;  %v1476_v42 = vadd.f32 %v1472_v15, %v1466_v56  ;;  %v1444_v47 = vpop.permute.xlu1 %1443  ;;  %v1500_v27 = vpop.permute.xlu0 %1499  ;;  %s4454_s27 = sld [smem:[#allocation2 + $0xd00]] }
 0x144   : > { %v1482_v24 = vmul.f32 %v4163_v58, %v1481_v10  ;;  %v1517_v0 = vstv %s4313_s26  ;;  %v1395_v29 = vadd.f32 %v1391_v37, %v1339_v5  ;;  %v1492_v61 = vmax.f32 %v1488_v57, 0.0  ;;  %s4460_s26 = sld [smem:[#allocation2 + $0xd01]] }
 0x145   : > { %v1477_v52 = vadd.f32 %v1473_v62, %v1467_v36  ;;  %v1483_v55 = vmul.f32 %v4174_v4, %v1481_v10  ;;  %v1392_v6 = vmul.f32 %v1388_v48, %v1380_v18  ;;  %v1493_v31 = vmax.f32 %v1489_v12, 0.0 }
 0x146   : > { %v1512_v17 = vmul.f32 %v4111_v46, %v4344_v59  ;;  %v1513_v60 = vmul.f32 %v4119_v9, %v4344_v59  ;;  %v4359_v33 = vadd.f32 %v4277_v30, %v1394_v23  ;;  %v1393_v26 = vmul.f32 %v1388_v48, %v1381_v8 }
 0x147   : > { %v1518_v25 = vmul.f32 %v4124_v21, %v1517_v0  ;;  %v1519_v10 = vmul.f32 %v4129_v16, %v1517_v0  ;;  %v1486_v18 = vadd.f32 %v1482_v24, %v1476_v42  ;;  %v1527_v38 = vstv %s4319_s19  ;;  %s4468_s19 = sld [smem:[#allocation2 + $0xd02]] }
 0x148   : > { %v1537_v32 = vstv %s4333_s29  ;;  %v4366_v3 = vstv %s4327_s28  ;;  %v1487_v54 = vadd.f32 %v1483_v55, %v1477_v52  ;;  %v4369_v19 = vstv %s4337_s30  ;;  %s4474_s28 = sld [smem:[#allocation2 + $0xd03]] }
 0x149   : > { %v1522_v45 = vadd.f32 %v1518_v25, %v1512_v17  ;;  %v1523_v41 = vadd.f32 %v1519_v10, %v1513_v60  ;;  %v1396_v39 = vadd.f32 %v1392_v6, %v1340_v11  ;;  %v1448_v30 = vmul.f32 %v1444_v47, %v1436_v53  ;;  %v1496_v25 = vpop.permute.xlu1 %1495  ;;  %s4512_s29 = sld [smem:[#allocation2 + $0xd80]] }
 0x14a   : > { %v1528_v7 = vmul.f32 %v4151_v35, %v1527_v38  ;;  %v1529_v20 = vmul.f32 %v4155_v49, %v1527_v38  ;;  %v1538_v28 = vmul.f32 %v4163_v58, %v1537_v32  ;;  %v1539_v63 = vmul.f32 %v4174_v4, %v1537_v32  ;;  %s4514_s30 = sld [smem:[#allocation2 + $0xd81]] }
 0x14b   : > { %v1568_v15 = vmul.f32 %v4111_v46, %v4366_v3  ;;  %v1569_v62 = vmul.f32 %v4119_v9, %v4366_v3  ;;  %v1574_v56 = vmul.f32 %v4124_v21, %v4369_v19  ;;  %v1575_v36 = vmul.f32 %v4129_v16, %v4369_v19 }
 0x14c   : > { %v1532_v37 = vadd.f32 %v1528_v7, %v1522_v45  ;;  %v1533_v57 = vadd.f32 %v1529_v20, %v1523_v41  ;;  %v1451_v11 = vadd.f32 %v4279_v2, %v1395_v29  ;;  %v1504_v8 = vmul.f32 %v1500_v27, %v1492_v61 }
 0x14d   : > { %v1490_v12 = vmax.f32 %v1486_v18, 0.0  ;;  %v1583_v5 = vstv %s4350_s4  ;;  %v1449_v23 = vmul.f32 %v1444_v47, %v1437_v22  ;;  %v1452_v48 = vadd.f32 %v1448_v30, %v1396_v39  ;;  %s4520_s4 = sld [smem:[#allocation2 + $0xd82]] }
 0x14e   : > { %v1491_v53 = vmax.f32 %v1487_v54, 0.0  ;;  %v1593_v42 = vstv %s4356_s5  ;;  %v1578_v24 = vadd.f32 %v1574_v56, %v1568_v15  ;;  %v1579_v52 = vadd.f32 %v1575_v36, %v1569_v62  ;;  %v1552_v15 = vpop.permute.xlu1 %1551  ;;  %s4526_s5 = sld [smem:[#allocation2 + $0xd83]] }
 0x14f   : > { %v1584_v55 = vmul.f32 %v4151_v35, %v1583_v5  ;;  %v1585_v6 = vmul.f32 %v4155_v49, %v1583_v5  ;;  %v1397_v17 = vadd.f32 %v1393_v26, %v1341_v13  ;;  %v4388_v60 = vmul.f32 %v1500_v27, %v1493_v31 }
 0x150   : > { %v1542_v10 = vadd.f32 %v1538_v28, %v1532_v37  ;;  %v1543_v45 = vadd.f32 %v1539_v63, %v1533_v57  ;;  %v1594_v61 = vmul.f32 %v4163_v58, %v1593_v42  ;;  %v1595_v22 = vmul.f32 %v4174_v4, %v1593_v42 }
 0x151   : > { %v1588_v2 = vadd.f32 %v1584_v55, %v1578_v24  ;;  %v1589_v29 = vadd.f32 %v1585_v6, %v1579_v52  ;;  %v1514_v47 = vmul.f32 %v4199_v14, %v4344_v59  ;;  %v1515_v18 = vmul.f32 %v4204_v1, %v4344_v59  ;;  %v1608_v6 = vpop.permute.xlu0 %1607 }
 0x152   : > { %v1520_v54 = vmul.f32 %v4209_v44, %v1517_v0  ;;  %v1521_v13 = vmul.f32 %v4214_v50, %v1517_v0  ;;  %v4400_v31 = vadd.f32 %v1449_v23, %v1397_v17  ;;  %v4402_v26 = vadd.f32 %v1504_v8, %v1452_v48 }
 0x153   : > { %v1502_v41 = vmul.f32 %v1496_v25, %v1490_v12  ;;  %v1503_v39 = vmul.f32 %v1496_v25, %v1491_v53  ;;  %v1530_v7 = vmul.f32 %v4223_v51, %v1527_v38  ;;  %v1531_v59 = vmul.f32 %v4288_v40, %v1527_v38 }
 0x154   : > { %v1524_v30 = vadd.f32 %v1520_v54, %v1514_v47  ;;  %v1525_v27 = vadd.f32 %v1521_v13, %v1515_v18  ;;  %v1546_v20 = vmax.f32 %v1542_v10, 0.0  ;;  %v1547_v28 = vmax.f32 %v1543_v45, 0.0  ;;  %v1556_v13 = vpop.permute.xlu1 %1555 }
 0x155   : > { %v1598_v63 = vadd.f32 %v1594_v61, %v1588_v2  ;;  %v1599_v0 = vadd.f32 %v1595_v22, %v1589_v29  ;;  %v1540_v57 = vmul.f32 %v4249_v34, %v1537_v32  ;;  %v1541_v56 = vmul.f32 %v4254_v43, %v1537_v32 }
 0x156   : > { %v1534_v62 = vadd.f32 %v1530_v7, %v1524_v30  ;;  %v1535_v37 = vadd.f32 %v1531_v59, %v1525_v27  ;;  %v1506_v36 = vadd.f32 %v1502_v41, %v4359_v33  ;;  %v1507_v8 = vadd.f32 %v1503_v39, %v1451_v11 }
 0x157   : > { %v1570_v12 = vmul.f32 %v4199_v14, %v4366_v3  ;;  %v1571_v38 = vmul.f32 %v4204_v1, %v4366_v3  ;;  %v1576_v53 = vmul.f32 %v4209_v44, %v4369_v19  ;;  %v1577_v32 = vmul.f32 %v4214_v50, %v4369_v19 }
 0x158   : > { %v1544_v23 = vadd.f32 %v1540_v57, %v1534_v62  ;;  %v1545_v48 = vadd.f32 %v1541_v56, %v1535_v37  ;;  %v1558_v33 = vmul.f32 %v1552_v15, %v1546_v20  ;;  %v1602_v11 = vmax.f32 %v1598_v63, 0.0 }
 0x159   : > { %v1586_v24 = vmul.f32 %v4223_v51, %v1583_v5  ;;  %v1587_v3 = vmul.f32 %v4288_v40, %v1583_v5  ;;  %v1559_v52 = vmul.f32 %v1552_v15, %v1547_v28  ;;  %v1603_v55 = vmax.f32 %v1599_v0, 0.0 }
 0x15a   : > { %v1580_v17 = vadd.f32 %v1576_v53, %v1570_v12  ;;  %v1581_v25 = vadd.f32 %v1577_v32, %v1571_v38  ;;  %v1596_v10 = vmul.f32 %v4249_v34, %v1593_v42  ;;  %v1597_v45 = vmul.f32 %v4254_v43, %v1593_v42 }
 0x15b   : > { %v1623_v2 = vstv %s4398_s23  ;;  %v1629_v29 = vstv %s4404_s6  ;;  %v1548_v19 = vmax.f32 %v1544_v23, 0.0  ;;  %v1549_v61 = vmax.f32 %v1545_v48, 0.0  ;;  %v1612_v48 = vpop.permute.xlu1 %1611  ;;  %s4535_s23 = sld [smem:[#allocation2 + $0xe00]] }
 0x15c   : > { %v1590_v22 = vadd.f32 %v1586_v24, %v1580_v17  ;;  %v1591_v47 = vadd.f32 %v1587_v3, %v1581_v25  ;;  %v1562_v18 = vadd.f32 %v1558_v33, %v1506_v36  ;;  %v1614_v54 = vmul.f32 %v1608_v6, %v1602_v11  ;;  %s4540_s6 = sld [smem:[#allocation2 + $0xe01]] }
 0x15d   : > { %v1626_v5 = vmul.f32 %v4199_v14, %v1623_v2  ;;  %v1632_v41 = vmul.f32 %v4209_v44, %v1629_v29  ;;  %v1627_v42 = vmul.f32 %v4204_v1, %v1623_v2  ;;  %v1633_v27 = vmul.f32 %v4214_v50, %v1629_v29 }
 0x15e   : > { %v1600_v39 = vadd.f32 %v1596_v10, %v1590_v22  ;;  %v1601_v30 = vadd.f32 %v1597_v45, %v1591_v47  ;;  %v1563_v7 = vadd.f32 %v1559_v52, %v1507_v8  ;;  %v1615_v59 = vmul.f32 %v1608_v6, %v1603_v55 }
 0x15f   : > { %v1636_v20 = vadd.f32 %v1632_v41, %v1626_v5  ;;  %v1639_v28 = vstv %s4415_s7  ;;  %v1560_v63 = vmul.f32 %v1556_v13, %v1548_v19  ;;  %v1561_v0 = vmul.f32 %v1556_v13, %v1549_v61  ;;  %s4549_s7 = sld [smem:[#allocation2 + $0xe02]] }
 0x160   : > { %v1642_v15 = vmul.f32 %v4223_v51, %v1639_v28  ;;  %v1649_v62 = vstv %s4421_s9  ;;  %v1509_v37 = vadd.f32 %v4388_v60, %v4400_v31  ;;  %v4444_v57 = vadd.f32 %v1614_v54, %v1562_v18  ;;  %s4555_s9 = sld [smem:[#allocation2 + $0xe03]] }
 0x161   : > { %v1624_v56 = vmul.f32 %v4111_v46, %v1623_v2  ;;  %v1625_v36 = vmul.f32 %v4119_v9, %v1623_v2  ;;  %v1604_v8 = vmax.f32 %v1600_v39, 0.0  ;;  %v1605_v12 = vmax.f32 %v1601_v30, 0.0 }
 0x162   : > { %v1637_v38 = vadd.f32 %v1633_v27, %v1627_v42  ;;  %v1643_v23 = vmul.f32 %v4288_v40, %v1639_v28  ;;  %v1646_v53 = vadd.f32 %v1642_v15, %v1636_v20  ;;  %v1652_v32 = vmul.f32 %v4249_v34, %v1649_v62 }
 0x163   : > { %v1630_v60 = vmul.f32 %v4124_v21, %v1629_v29  ;;  %v1631_v31 = vmul.f32 %v4129_v16, %v1629_v29  ;;  %v4456_v33 = vadd.f32 %v1615_v59, %v1563_v7  ;;  %v1564_v11 = vadd.f32 %v1560_v63, %v4402_v26 }
 0x164   : > { %v1565_v24 = vadd.f32 %v1561_v0, %v1509_v37  ;;  %v1653_v3 = vmul.f32 %v4254_v43, %v1649_v62  ;;  %v1640_v6 = vmul.f32 %v4151_v35, %v1639_v28  ;;  %v1641_v17 = vmul.f32 %v4155_v49, %v1639_v28  ;;  %v4486_v0 = vpop.permute.xlu0 %1667 }
 0x165   : > { %v1634_v52 = vadd.f32 %v1630_v60, %v1624_v56  ;;  %v1635_v55 = vadd.f32 %v1631_v31, %v1625_v36  ;;  %v1616_v25 = vmul.f32 %v1612_v48, %v1604_v8  ;;  %v1617_v10 = vmul.f32 %v1612_v48, %v1605_v12 }
 0x166   : > { %v1679_v45 = vstv %s4431_s10  ;;  %v1685_v2 = vstv %s4435_s11  ;;  %v1647_v29 = vadd.f32 %v1643_v23, %v1637_v38  ;;  %v1656_v19 = vadd.f32 %v1652_v32, %v1646_v53  ;;  %v1664_v23 = vpop.permute.xlu1 %1663  ;;  %s4561_s10 = sld [smem:[#allocation2 + $0xe80]] }
 0x167   : > { %v1680_v26 = vmul.f32 %v4111_v46, %v1679_v45  ;;  %v1681_v61 = vmul.f32 %v4119_v9, %v1679_v45  ;;  %v1650_v22 = vmul.f32 %v4163_v58, %v1649_v62  ;;  %v1651_v47 = vmul.f32 %v4174_v4, %v1649_v62  ;;  %s4566_s11 = sld [smem:[#allocation2 + $0xe81]] }
 0x168   : > { %v1686_v18 = vmul.f32 %v4124_v21, %v1685_v2  ;;  %v1687_v54 = vmul.f32 %v4129_v16, %v1685_v2  ;;  %v1644_v13 = vadd.f32 %v1640_v6, %v1634_v52  ;;  %v1645_v5 = vadd.f32 %v1641_v17, %v1635_v55 }
 0x169   : > { %v1695_v41 = vstv %s4440_s17  ;;  %v1705_v39 = vstv %s4448_s8  ;;  %v4478_v30 = vadd.f32 %v1616_v25, %v1564_v11  ;;  %v4480_v42 = vadd.f32 %v1617_v10, %v1565_v24  ;;  %s4575_s17 = sld [smem:[#allocation2 + $0xe82]] }
 0x16a   : > { %v1690_v27 = vadd.f32 %v1686_v18, %v1680_v26  ;;  %v1691_v7 = vadd.f32 %v1687_v54, %v1681_v61  ;;  %v4482_v59 = vadd.f32 %v1653_v3, %v1647_v29  ;;  %v1660_v20 = vmax.f32 %v1656_v19, 0.0  ;;  %s4579_s8 = sld [smem:[#allocation2 + $0xe83]] }
 0x16b   : > { %v1696_v28 = vmul.f32 %v4151_v35, %v1695_v41  ;;  %v1697_v63 = vmul.f32 %v4155_v49, %v1695_v41  ;;  %v1706_v15 = vmul.f32 %v4163_v58, %v1705_v39  ;;  %v1707_v62 = vmul.f32 %v4174_v4, %v1705_v39 }
 0x16c   : > { %v1735_v37 = vstv %s4454_s27  ;;  %v1741_v56 = vstv %s4460_s26  ;;  %v1654_v36 = vadd.f32 %v1650_v22, %v1644_v13  ;;  %v1655_v8 = vadd.f32 %v1651_v47, %v1645_v5  ;;  %s4616_s27 = sld [smem:[#allocation2 + $0xf00]] }
 0x16d   : > { %v1700_v12 = vadd.f32 %v1696_v28, %v1690_v27  ;;  %v1701_v38 = vadd.f32 %v1697_v63, %v1691_v7  ;;  %v1736_v48 = vmul.f32 %v4111_v46, %v1735_v37  ;;  %v1737_v53 = vmul.f32 %v4119_v9, %v1735_v37  ;;  %v1720_v27 = vpop.permute.xlu1 %1719  ;;  %s4618_s26 = sld [smem:[#allocation2 + $0xf01]] }
 0x16e   : > { %v1742_v32 = vmul.f32 %v4124_v21, %v1741_v56  ;;  %v1743_v60 = vmul.f32 %v4129_v16, %v1741_v56  ;;  %v1661_v31 = vmax.f32 %v4482_v59, 0.0  ;;  %v4498_v11 = vmul.f32 %v4486_v0, %v1660_v20 }
 0x16f   : > { %v1710_v24 = vadd.f32 %v1706_v15, %v1700_v12  ;;  %v1711_v3 = vadd.f32 %v1707_v62, %v1701_v38  ;;  %v1751_v6 = vstv %s4468_s19  ;;  %v1761_v17 = vstv %s4474_s28  ;;  %s4622_s19 = sld [smem:[#allocation2 + $0xf02]] }
 0x170   : > { %v1746_v52 = vadd.f32 %v1742_v32, %v1736_v48  ;;  %v1747_v55 = vadd.f32 %v1743_v60, %v1737_v53  ;;  %v1658_v25 = vmax.f32 %v1654_v36, 0.0  ;;  %v1659_v10 = vmax.f32 %v1655_v8, 0.0  ;;  %s4628_s28 = sld [smem:[#allocation2 + $0xf03]] }
 0x171   : > { %v1752_v29 = vmul.f32 %v4151_v35, %v1751_v6  ;;  %v1753_v19 = vmul.f32 %v4155_v49, %v1751_v6  ;;  %v1762_v26 = vmul.f32 %v4163_v58, %v1761_v17  ;;  %v1763_v61 = vmul.f32 %v4174_v4, %v1761_v17 }
 0x172   : > { %v1682_v22 = vmul.f32 %v4199_v14, %v1679_v45  ;;  %v1683_v47 = vmul.f32 %v4204_v1, %v1679_v45  ;;  %v1714_v18 = vmax.f32 %v1710_v24, 0.0  ;;  %v1715_v54 = vmax.f32 %v1711_v3, 0.0 }
 0x173   : > { %v1756_v13 = vadd.f32 %v1752_v29, %v1746_v52  ;;  %v1757_v5 = vadd.f32 %v1753_v19, %v1747_v55  ;;  %v1688_v7 = vmul.f32 %v4209_v44, %v1685_v2  ;;  %v1689_v59 = vmul.f32 %v4214_v50, %v1685_v2 }
 0x174   : > { %v1698_v20 = vmul.f32 %v4223_v51, %v1695_v41  ;;  %v1699_v28 = vmul.f32 %v4288_v40, %v1695_v41  ;;  %v1670_v63 = vmul.f32 %v1664_v23, %v1658_v25  ;;  %v1671_v15 = vmul.f32 %v1664_v23, %v1659_v10  ;;  %v1776_v25 = vpop.permute.xlu0 %1775 }
 0x175   : > { %v1766_v62 = vadd.f32 %v1762_v26, %v1756_v13  ;;  %v1767_v36 = vadd.f32 %v1763_v61, %v1757_v5  ;;  %v1692_v45 = vadd.f32 %v1688_v7, %v1682_v22  ;;  %v1693_v8 = vadd.f32 %v1689_v59, %v1683_v47 }
 0x176   : > { %v1708_v12 = vmul.f32 %v4249_v34, %v1705_v39  ;;  %v1709_v38 = vmul.f32 %v4254_v43, %v1705_v39  ;;  %v1726_v48 = vmul.f32 %v1720_v27, %v1714_v18  ;;  %v1727_v2 = vmul.f32 %v1720_v27, %v1715_v54  ;;  %v1724_v18 = vpop.permute.xlu1 %1723 }
 0x177   : > { %v1738_v53 = vmul.f32 %v4199_v14, %v1735_v37  ;;  %v1739_v41 = vmul.f32 %v4204_v1, %v1735_v37  ;;  %v1702_v32 = vadd.f32 %v1698_v20, %v1692_v45  ;;  %v1703_v23 = vadd.f32 %v1699_v28, %v1693_v8 }
 0x178   : > { %v1744_v60 = vmul.f32 %v4209_v44, %v1741_v56  ;;  %v1745_v24 = vmul.f32 %v4214_v50, %v1741_v56  ;;  %v1770_v3 = vmax.f32 %v1766_v62, 0.0  ;;  %v1771_v52 = vmax.f32 %v1767_v36, 0.0 }
 0x179   : > { %v1754_v55 = vmul.f32 %v4223_v51, %v1751_v6  ;;  %v1755_v39 = vmul.f32 %v4288_v40, %v1751_v6  ;;  %v1712_v10 = vadd.f32 %v1708_v12, %v1702_v32  ;;  %v1713_v29 = vadd.f32 %v1709_v38, %v1703_v23 }
 0x17a   : > { %v1748_v37 = vadd.f32 %v1744_v60, %v1738_v53  ;;  %v1749_v19 = vadd.f32 %v1745_v24, %v1739_v41  ;;  %v1673_v26 = vmul.f32 %v4486_v0, %v1661_v31  ;;  %v1674_v61 = vadd.f32 %v1670_v63, %v4444_v57 }
 0x17b   : > { %v1675_v56 = vadd.f32 %v1671_v15, %v4456_v33  ;;  %v1764_v22 = vmul.f32 %v4249_v34, %v1761_v17  ;;  %v1716_v47 = vmax.f32 %v1712_v10, 0.0  ;;  %v1765_v13 = vmul.f32 %v4254_v43, %v1761_v17 }
 0x17c   : > { %v1758_v6 = vadd.f32 %v1754_v55, %v1748_v37  ;;  %v1759_v54 = vadd.f32 %v1755_v39, %v1749_v19  ;;  %v1730_v5 = vadd.f32 %v1726_v48, %v1674_v61  ;;  %v1782_v27 = vmul.f32 %v1776_v25, %v1770_v3 }
 0x17d   : > { %v1791_v7 = vstv %s4512_s29  ;;  %v1797_v59 = vstv %s4514_s30  ;;  %v1731_v20 = vadd.f32 %v1727_v2, %v1675_v56  ;;  %v1783_v28 = vmul.f32 %v1776_v25, %v1771_v52  ;;  %v1780_v2 = vpop.permute.xlu1 %1779  ;;  %s4639_s29 = sld [smem:[#allocation2 + $0xf80]] }
 0x17e   : > { %v1717_v0 = vmax.f32 %v1713_v29, 0.0  ;;  %v1768_v31 = vadd.f32 %v1764_v22, %v1758_v6  ;;  %v1728_v57 = vmul.f32 %v1724_v18, %v1716_v47  ;;  %v1794_v33 = vmul.f32 %v4199_v14, %v1791_v7  ;;  %s4657_s30 = sld [smem:[#allocation2 + $0xf81]] }
 0x17f   : > { %v1800_v63 = vmul.f32 %v4209_v44, %v1797_v59  ;;  %v1807_v15 = vstv %s4520_s4  ;;  %v1769_v17 = vadd.f32 %v1765_v13, %v1759_v54  ;;  %v1795_v62 = vmul.f32 %v4204_v1, %v1791_v7  ;;  %s4669_s4 = sld [smem:[#allocation2 + $0xf82]] }
 0x180   : > { %v1801_v36 = vmul.f32 %v4214_v50, %v1797_v59  ;;  %v1676_v45 = vadd.f32 %v4498_v11, %v4478_v30  ;;  %v1677_v8 = vadd.f32 %v1673_v26, %v4480_v42  ;;  %v4547_v12 = vadd.f32 %v1782_v27, %v1730_v5 }
 0x181   : > { %v1772_v38 = vmax.f32 %v1768_v31, 0.0  ;;  %v4551_v48 = vadd.f32 %v1783_v28, %v1731_v20  ;;  %v1804_v53 = vadd.f32 %v1800_v63, %v1794_v33  ;;  %v1810_v41 = vmul.f32 %v4223_v51, %v1807_v15 }
 0x182   : > { %v1817_v32 = vstv %s4526_s5  ;;  %v1729_v23 = vmul.f32 %v1724_v18, %v1717_v0  ;;  %v1732_v60 = vadd.f32 %v1728_v57, %v1676_v45  ;;  %v1792_v30 = vmul.f32 %v4111_v46, %v1791_v7  ;;  %s4675_s5 = sld [smem:[#allocation2 + $0xf83]] }
 0x183   : > { %v1793_v42 = vmul.f32 %v4119_v9, %v1791_v7  ;;  %v1773_v11 = vmax.f32 %v1769_v17, 0.0  ;;  %v1805_v24 = vadd.f32 %v1801_v36, %v1795_v62  ;;  %v1798_v3 = vmul.f32 %v4124_v21, %v1797_v59 }
 0x184   : > { %v1799_v52 = vmul.f32 %v4129_v16, %v1797_v59  ;;  %v1784_v55 = vmul.f32 %v1780_v2, %v1772_v38  ;;  %v1811_v39 = vmul.f32 %v4288_v40, %v1807_v15  ;;  %v1808_v25 = vmul.f32 %v4151_v35, %v1807_v15  ;;  %v1832_v38 = vpop.permute.xlu1 %1831 }
 0x185   : > { %v1809_v10 = vmul.f32 %v4155_v49, %v1807_v15  ;;  %v1814_v29 = vadd.f32 %v1810_v41, %v1804_v53  ;;  %v1820_v37 = vmul.f32 %v4249_v34, %v1817_v32  ;;  %v1802_v19 = vadd.f32 %v1798_v3, %v1792_v30 }
 0x186   : > { %v1803_v26 = vadd.f32 %v1799_v52, %v1793_v42  ;;  %v1818_v61 = vmul.f32 %v4163_v58, %v1817_v32  ;;  %v1819_v56 = vmul.f32 %v4174_v4, %v1817_v32  ;;  %v1847_v22 = vstv %s4535_s23 }
 0x187   : > { %v1853_v47 = vstv %s4540_s6  ;;  %v1812_v18 = vadd.f32 %v1808_v25, %v1802_v19  ;;  %v1848_v54 = vmul.f32 %v4111_v46, %v1847_v22  ;;  %v1849_v13 = vmul.f32 %v4119_v9, %v1847_v22 }
 0x188   : > { %v1813_v6 = vadd.f32 %v1809_v10, %v1803_v26  ;;  %v1733_v5 = vadd.f32 %v1729_v23, %v1677_v8  ;;  %v1785_v27 = vmul.f32 %v1780_v2, %v1773_v11  ;;  %v1854_v7 = vmul.f32 %v4124_v21, %v1853_v47 }
 0x189   : > { %v1855_v59 = vmul.f32 %v4129_v16, %v1853_v47  ;;  %v1815_v20 = vadd.f32 %v1811_v39, %v1805_v24  ;;  %v1821_v28 = vmul.f32 %v4254_v43, %v1817_v32  ;;  %v1863_v0 = vstv %s4549_s7  ;;  %s2355_s7 = sshll.u32 %s2730_s16, 9  ;;  %s2080_s16 = scalar_lea.sflag [#allocation4], %s2817_s20 }
 0x18a   : > { %v1873_v31 = vstv %s4555_s9  ;;  %v4584_v57 = vadd.f32 %v1784_v55, %v1732_v60  ;;  %v4586_v33 = vadd.f32 %v1820_v37, %v1814_v29  ;;  %v1858_v63 = vadd.f32 %v1854_v7, %v1848_v54 }
 0x18b   : > { %v1859_v15 = vadd.f32 %v1855_v59, %v1849_v13  ;;  %v1822_v17 = vadd.f32 %v1818_v61, %v1812_v18  ;;  %v1823_v62 = vadd.f32 %v1819_v56, %v1813_v6  ;;  %v1864_v36 = vmul.f32 %v4151_v35, %v1863_v0 }
 0x18c   : > { %v1865_v45 = vmul.f32 %v4155_v49, %v1863_v0  ;;  %v4590_v8 = vadd.f32 %v1785_v27, %v1733_v5  ;;  %v1874_v2 = vmul.f32 %v4163_v58, %v1873_v31  ;;  %v1903_v53 = vstv %s4561_s10 }
 0x18d   : > { %v1909_v41 = vstv %s4566_s11  ;;  %v4595_v32 = vadd.f32 %v1821_v28, %v1815_v20  ;;  %v1868_v23 = vadd.f32 %v1864_v36, %v1858_v63  ;;  %v1875_v30 = vmul.f32 %v4174_v4, %v1873_v31  ;;  %s4719_s11 = scalar_lea.hbm %s4765_s3, %s2355_s7 }
 0x18e   : > { %v1869_v60 = vadd.f32 %v1865_v45, %v1859_v15  ;;  %v1904_v42 = vmul.f32 %v4111_v46, %v1903_v53  ;;  %v1905_v11 = vmul.f32 %v4119_v9, %v1903_v53  ;;  %v1910_v24 = vmul.f32 %v4124_v21, %v1909_v41  ;;  %v1888_v21 = vpop.permute.xlu1 %1887 }
 0x18f   : > { %v1911_v3 = vmul.f32 %v4129_v16, %v1909_v41  ;;  %v1828_v52 = vmax.f32 %v4586_v33, 0.0  ;;  %v1826_v55 = vmax.f32 %v1822_v17, 0.0  ;;  %v1827_v39 = vmax.f32 %v1823_v62, 0.0 }
 0x190   : > { %v1878_v25 = vadd.f32 %v1874_v2, %v1868_v23  ;;  %v1914_v10 = vadd.f32 %v1910_v24, %v1904_v42  ;;  %v1919_v37 = vstv %s4575_s17  ;;  %v1929_v19 = vstv %s4579_s8  ;;  %s2686_s8 = smov [#allocation7]  }
 0x191   : > { %v1915_v29 = vadd.f32 %v1911_v3, %v1905_v11  ;;  %v1879_v26 = vadd.f32 %v1875_v30, %v1869_v60  ;;  %v1920_v56 = vmul.f32 %v4151_v35, %v1919_v37  ;;  %v1921_v46 = vmul.f32 %v4155_v49, %v1919_v37 }
 0x192   : > { %v1882_v61 = vmax.f32 %v1878_v25, 0.0  ;;  %v1829_v9 = vmax.f32 %v4595_v32, 0.0  ;;  %v1930_v16 = vmul.f32 %v4163_v58, %v1929_v19  ;;  %v1850_v18 = vmul.f32 %v4199_v14, %v1847_v22  ;;  %v1836_v58 = vpop.permute.xlu0 %1835  ;;  %v1892_v3 = vpop.permute.xlu1 %1891 }
 0x193   : > { %v1851_v6 = vmul.f32 %v4204_v1, %v1847_v22  ;;  %v1838_v54 = vmul.f32 %v1832_v38, %v1826_v55  ;;  %v1924_v13 = vadd.f32 %v1920_v56, %v1914_v10  ;;  %v1925_v5 = vadd.f32 %v1921_v46, %v1915_v29  ;;  %v4642_v56 = vld [vmem:[%s2821_s22 + $0x10] sm:$0xff] }
 0x194   : > { %v1931_v27 = vmul.f32 %v4174_v4, %v1929_v19  ;;  %v1856_v7 = vmul.f32 %v4209_v44, %v1853_v47  ;;  %v1857_v35 = vmul.f32 %v4214_v50, %v1853_v47  ;;  %v1866_v49 = vmul.f32 %v4223_v51, %v1863_v0 }
 0x195   : > { %v1867_v59 = vmul.f32 %v4288_v40, %v1863_v0  ;;  %v1839_v20 = vmul.f32 %v1832_v38, %v1827_v39  ;;  %v1883_v28 = vmax.f32 %v1879_v26, 0.0  ;;  %v1894_v33 = vmul.f32 %v1888_v21, %v1882_v61 }
 0x196   : > { %v1934_v22 = vadd.f32 %v1930_v16, %v1924_v13  ;;  %v1860_v63 = vadd.f32 %v1856_v7, %v1850_v18  ;;  %v1861_v15 = vadd.f32 %v1857_v35, %v1851_v6  ;;  %v1876_v4 = vmul.f32 %v4249_v34, %v1873_v31  ;;  %v4665_v7 = vld [vmem:[%s2821_s22 + $0x50] sm:$0xff] }
 0x197   : > { %v1877_v17 = vmul.f32 %v4254_v43, %v1873_v31  ;;  %v1935_v47 = vadd.f32 %v1931_v27, %v1925_v5  ;;  %v1906_v0 = vmul.f32 %v4199_v14, %v1903_v53  ;;  %v1907_v36 = vmul.f32 %v4204_v1, %v1903_v53  ;;  %v1944_v31 = vpop.permute.xlu0 %1943 }
 0x198   : > { %v1938_v62 = vmax.f32 %v1934_v22, 0.0  ;;  %v1870_v45 = vadd.f32 %v1866_v49, %v1860_v63  ;;  %v1871_v38 = vadd.f32 %v1867_v59, %v1861_v15  ;;  %v1912_v2 = vmul.f32 %v4209_v44, %v1909_v41  ;;  %v1948_v15 = vpop.permute.xlu1 %1947 }
 0x199   : > { %v1913_v32 = vmul.f32 %v4214_v50, %v1909_v41  ;;  %v1840_v23 = vmul.f32 %v1836_v58, %v1828_v52  ;;  %v1842_v60 = vadd.f32 %v1838_v54, %v4547_v12  ;;  %v1922_v30 = vmul.f32 %v4223_v51, %v1919_v37 }
 0x19a   : > { %v1923_v42 = vmul.f32 %v4288_v40, %v1919_v37  ;;  %v1880_v14 = vadd.f32 %v1876_v4, %v1870_v45  ;;  %v1881_v1 = vadd.f32 %v1877_v17, %v1871_v38  ;;  %v1916_v53 = vadd.f32 %v1912_v2, %v1906_v0  ;;  %v4682_v4 = vld [vmem:[%s2821_s22 + $0x70] sm:$0xff]  ;;  %v2553_v0 = vld [vmem:[%s2821_s22 + $0x20] sm:$0xff]  ;;  %v2554_v45 = vld [vmem:[%s2821_s22 + $0x28] sm:$0xff] }
 0x19b   : > { %v1917_v11 = vadd.f32 %v1913_v32, %v1907_v36  ;;  %v1841_v24 = vmul.f32 %v1836_v58, %v1829_v9  ;;  %v1843_v44 = vadd.f32 %v1839_v20, %v4551_v48  ;;  %v1895_v50 = vmul.f32 %v1888_v21, %v1883_v28  ;;  %v4646_v9 = vld [vmem:[%s2821_s22 + $0x18] sm:$0xff]  ;;  %v4650_v21 = vld [vmem:[%s2821_s22 + $0x30] sm:$0xff] }
 0x19c   : > { %v1898_v41 = vadd.f32 %v1894_v33, %v1842_v60  ;;  %v1939_v12 = vmax.f32 %v1935_v47, 0.0  ;;  %v1950_v52 = vmul.f32 %v1944_v31, %v1938_v62  ;;  %v1884_v51 = vmax.f32 %v1880_v14, 0.0  ;;  %v2549_v33 = vld [vmem:[%s2821_s22] sm:$0xff]  ;;  %v4686_v47 = vld [vmem:[%s2821_s22 + $0x78] sm:$0xff] }
 0x19d   : > { %v1932_v55 = vmul.f32 %v4249_v34, %v1929_v19  ;;  %v1885_v39 = vmax.f32 %v1881_v1, 0.0  ;;  %v1933_v25 = vmul.f32 %v4254_v43, %v1929_v19  ;;  %v1959_v10 = vstv %s4616_s27  ;;  %v4654_v19 = vld [vmem:[%s2821_s22 + $0x38] sm:$0xff]  ;;  %v2557_v1 = vld [vmem:[%s2821_s22 + $0x60] sm:$0xff]  ;;  %s2579_s27 = sshll.u32 %s2686_s8, 4  ;;  %s2580_s27 = int_to_ptr.vmem [resolvable:$false] %s2579_s27 }
 0x19e   : > { %v1965_v29 = vstv %s4618_s26  ;;  %v1896_v37 = vmul.f32 %v1892_v3, %v1884_v51  ;;  %v1926_v26 = vadd.f32 %v1922_v30, %v1916_v53  ;;  %v1927_v48 = vadd.f32 %v1923_v42, %v1917_v11  ;;  %v2558_v11 = vld [vmem:[%s2821_s22 + $0x68] sm:$0xff]  ;;  %s2581_s26 = scalar_lea.vmem %s2580_s27, 1024 }
 0x19f   : > { %v1975_v61 = vstv %s4622_s19  ;;  %v1962_v46 = vmul.f32 %v4642_v56, %v1959_v10  ;;  %v1963_v34 = vmul.f32 %v4646_v9, %v1959_v10  ;;  %v1968_v43 = vmul.f32 %v4650_v21, %v1965_v29 }
 0x1a0   : > { %v1969_v16 = vmul.f32 %v4654_v19, %v1965_v29  ;;  %v1844_v18 = vadd.f32 %v1840_v23, %v4584_v57  ;;  %v1845_v6 = vadd.f32 %v1841_v24, %v4590_v8  ;;  %v4661_v54 = vadd.f32 %v1895_v50, %v1843_v44  ;;  %v2555_v23 = vld [vmem:[%s2821_s22 + $0x40] sm:$0xff] }
 0x1a1   : > { %v1985_v13 = vstv %s4628_s28  ;;  %v1972_v5 = vadd.f32 %v1968_v43, %v1962_v46  ;;  %v1978_v35 = vmul.f32 %v4665_v7, %v1975_v61  ;;  %v1979_v49 = vmul.f32 %v4288_v40, %v1975_v61  ;;  %v2550_v40 = vld [vmem:[%s2821_s22 + $0x8] sm:$0xff] }
 0x1a2   : > { %v1973_v27 = vadd.f32 %v1969_v16, %v1963_v34  ;;  %v4671_v57 = vmul.f32 %v1944_v31, %v1939_v12  ;;  %v4673_v8 = vadd.f32 %v1950_v52, %v1898_v41  ;;  %v1897_v59 = vmul.f32 %v1892_v3, %v1885_v39  ;;  %v2556_v31 = vld [vmem:[%s2821_s22 + $0x48] sm:$0xff] }
 0x1a3   : > { %v1936_v58 = vadd.f32 %v1932_v55, %v1926_v26  ;;  %v4677_v20 = vadd.f32 %v1896_v37, %v1844_v18  ;;  %v1937_v28 = vadd.f32 %v1933_v25, %v1927_v48  ;;  %v1960_v22 = vmul.f32 %v2549_v33, %v1959_v10  ;;  %v2000_v48 = vpop.permute.xlu1 %1999 }
 0x1a4   : > { %v1961_v63 = vmul.f32 %v2550_v40, %v1959_v10  ;;  %v1988_v17 = vmul.f32 %v4682_v4, %v1985_v13  ;;  %v1989_v62 = vmul.f32 %v4686_v47, %v1985_v13  ;;  %v1966_v36 = vmul.f32 %v2553_v0, %v1965_v29 }
 0x1a5   : > { %v1967_v38 = vmul.f32 %v2554_v45, %v1965_v29  ;;  %v1982_v2 = vadd.f32 %v1978_v35, %v1972_v5  ;;  %v1983_v32 = vadd.f32 %v1979_v49, %v1973_v27  ;;  %v1976_v60 = vmul.f32 %v2555_v23, %v1975_v61 }
 0x1a6   : > { %v1977_v30 = vmul.f32 %v2556_v31, %v1975_v61  ;;  %v1970_v42 = vadd.f32 %v1966_v36, %v1960_v22  ;;  %v1986_v53 = vmul.f32 %v2557_v1, %v1985_v13  ;;  %v1987_v24 = vmul.f32 %v2558_v11, %v1985_v13 }
 0x1a7   : > { %v1971_v14 = vadd.f32 %v1967_v38, %v1961_v63  ;;  %v1940_v44 = vmax.f32 %v1936_v58, 0.0  ;;  %v1941_v50 = vmax.f32 %v1937_v28, 0.0  ;;  %v2015_v41 = vstv %s4639_s29 }
 0x1a8   : > { %v2021_v3 = vstv %s4657_s30  ;;  %v1980_v12 = vadd.f32 %v1976_v60, %v1970_v42  ;;  %v2016_v51 = vmul.f32 %v2549_v33, %v2015_v41  ;;  %v2017_v55 = vmul.f32 %v2550_v40, %v2015_v41 }
 0x1a9   : > { %v1981_v52 = vadd.f32 %v1977_v30, %v1971_v14  ;;  %v1992_v39 = vadd.f32 %v1988_v17, %v1982_v2  ;;  %v1993_v25 = vadd.f32 %v1989_v62, %v1983_v32  ;;  %v2022_v10 = vmul.f32 %v2553_v0, %v2021_v3  ;;  %v2056_v2 = vpop.permute.xlu1 %2055 }
 0x1aa   : > { %v2023_v29 = vmul.f32 %v2554_v45, %v2021_v3  ;;  %v1990_v37 = vadd.f32 %v1986_v53, %v1980_v12  ;;  %v2031_v61 = vstv %s4669_s4  ;;  %v2041_v46 = vstv %s4675_s5 }
 0x1ab   : > { %v1991_v26 = vadd.f32 %v1987_v24, %v1981_v52  ;;  %v1901_v34 = vadd.f32 %v1897_v59, %v1845_v6  ;;  %v1952_v43 = vmul.f32 %v1948_v15, %v1940_v44  ;;  %v2026_v16 = vadd.f32 %v2022_v10, %v2016_v51 }
 0x1ac   : > { %v2027_v18 = vadd.f32 %v2023_v29, %v2017_v55  ;;  %v1994_v13 = vmax.f32 %v1990_v37, 0.0  ;;  %v2032_v27 = vmul.f32 %v2555_v23, %v2031_v61  ;;  %v2033_v35 = vmul.f32 %v2556_v31, %v2031_v61  ;;  %v2559_v23 = vld [vmem:[%s2821_s22 + $0x58] sm:$0xff]  ;;  %s2204_s22 = sshll.u32 %s2817_s20, 5 }
 0x1ad   : > { %v1995_v5 = vmax.f32 %v1991_v26, 0.0  ;;  %v1953_v49 = vmul.f32 %v1948_v15, %v1941_v50  ;;  %v2042_v58 = vmul.f32 %v2557_v1, %v2041_v46  ;;  %v2043_v28 = vmul.f32 %v2558_v11, %v2041_v46  ;;  %v2060_v52 = vpop.permute.xlu1 %2059  ;;  %s246_s23 = scalar_lea.vmem [#allocation7], %s2204_s22 }
 0x1ae   : > { %v2018_v33 = vmul.f32 %v4642_v56, %v2015_v41  ;;  %v1996_v22 = vmax.f32 %v1992_v39, 0.0  ;;  %v1997_v40 = vmax.f32 %v1993_v25, 0.0  ;;  %v2036_v63 = vadd.f32 %v2032_v27, %v2026_v16  ;;  %s2094_s6 = sshll.u32 %s246_s23, 4  ;;  %s4714_s6 = int_to_ptr.vmem [resolvable:$true] %s2094_s6 }
 0x1af   : > { %v2037_v17 = vadd.f32 %v2033_v35, %v2027_v18  ;;  %v2019_v62 = vmul.f32 %v4646_v9, %v2015_v41  ;;  %v2024_v6 = vmul.f32 %v4650_v21, %v2021_v3  ;;  %v2025_v59 = vmul.f32 %v4654_v19, %v2021_v3  ;;  %v2004_v21 = vpop.permute.xlu0 %2003  ;;  %s2575_s17 = scalar_lea.vmem %s4714_s6, 512  ;;  %p2582_p13 = scmp.lt.s32.totalorder %s4714_s6, %s2580_s27 }
 0x1b0   : > { %v2034_v0 = vmul.f32 %v4665_v7, %v2031_v61  ;;  %v2006_v36 = vmul.f32 %v2000_v48, %v1994_v13  ;;  %v2007_v45 = vmul.f32 %v2000_v48, %v1995_v5  ;;  %v2046_v15 = vadd.f32 %v2042_v58, %v2036_v63  ;;  %p2576_p5 = scmp.ne.s32.totalorder %s4714_s6, %s2575_s17  ;;  %p2583_p0 = scmp.lt.s32.totalorder %s2581_s26, %s2575_s17 }
 0x1b1   : > { %v2047_v38 = vadd.f32 %v2043_v28, %v2037_v17  ;;  %v2028_v32 = vadd.f32 %v2024_v6, %v2018_v33  ;;  %v2029_v56 = vadd.f32 %v2025_v59, %v2019_v62  ;;  %v2035_v60 = vmul.f32 %v2559_v23, %v2031_v61 }
 0x1b2   : > { %v2044_v31 = vmul.f32 %v4682_v4, %v2041_v46  ;;  %v1955_v9 = vadd.f32 %v4671_v57, %v4661_v54  ;;  %v2050_v30 = vmax.f32 %v2046_v15, 0.0  ;;  %v2045_v7 = vmul.f32 %v4686_v47, %v2041_v46  ;;  %p2577_p11 = pnand %p2576_p5, %p5003_p6  ;;  %p2584_p2 = por %p2583_p0, %p2582_p13 }
 0x1b3   : > { %v2051_v19 = vmax.f32 %v2047_v38, 0.0  ;;  %v1956_v42 = vadd.f32 %v1952_v43, %v4677_v20  ;;  %v1957_v14 = vadd.f32 %v1953_v49, %v1901_v34  ;;  %v2038_v1 = vadd.f32 %v2034_v0, %v2028_v32 }
 0x1b4   : > { %v2039_v53 = vadd.f32 %v2035_v60, %v2029_v56  ;;  %v2010_v11 = vadd.f32 %v2006_v36, %v4673_v8  ;;  %v2011_v24 = vadd.f32 %v2007_v45, %v1955_v9  ;;  %v2062_v44 = vmul.f32 %v2056_v2, %v2050_v30  ;;  %p2578_p12 = pneg %p2577_p11 }
 0x1b5   : > { %v2063_v50 = vmul.f32 %v2056_v2, %v2051_v19  ;;  %v2008_v4 = vmul.f32 %v2004_v21, %v1996_v22  ;;  %v2009_v41 = vmul.f32 %v2004_v21, %v1997_v40  ;;  %v2048_v3 = vadd.f32 %v2044_v31, %v2038_v1 }
 0x1b6   : > { %v2049_v54 = vadd.f32 %v2045_v7, %v2039_v53  ;;  %v2066_v57 = vadd.f32 %v2062_v44, %v2010_v11  ;;  %p2585_p3 = pnand %p2584_p2, %p2578_p12 }
 0x1b7   : > { %v2067_v12 = vadd.f32 %v2063_v50, %v2011_v24  ;;  %v2052_v47 = vmax.f32 %v2048_v3, 0.0  ;;  %v2012_v8 = vadd.f32 %v2008_v4, %v1956_v42  ;;  %v2013_v39 = vadd.f32 %v2009_v41, %v1957_v14 }
 0x1b8   : > { %v2053_v20 = vmax.f32 %v2049_v54, 0.0  ;;  %v2070_v51 = vmax.f32 %v2066_v57, 0.0 }
 0x1b9   : > { %v2071_v55 = vmax.f32 %v2067_v12, 0.0  ;;  %v2064_v25 = vmul.f32 %v2060_v52, %v2052_v47 }
 0x1ba   : > { %v2065_v10 = vmul.f32 %v2060_v52, %v2053_v20  ;;  %2074 = vst [vmem:[%s246_s23] sm:$0xff] %v2070_v51 }
 0x1bb   : > { %2076 = vst.msk [vmem:[%s246_s23 + $0x8] sm:$0xff] %vm2075_vm0, %v2071_v55  ;;  %v2068_v29 = vadd.f32 %v2064_v25, %v2012_v8 }
 0x1bc   : > { %v2069_v37 = vadd.f32 %v2065_v10, %v2013_v39 }
 0x1bd   : > { %v2072_v26 = vmax.f32 %v2068_v29, 0.0 }
 0x1be   : > { %v2073_v48 = vmax.f32 %v2069_v37, 0.0 }
 0x1bf   : > { %2077 = vst [vmem:[%s246_s23 + $0x10] sm:$0xff] %v2072_v26 }
 0x1c0   : > { %2078 = vst.msk [vmem:[%s246_s23 + $0x18] sm:$0xff] %vm2075_vm0, %v2073_v48 }
 0x1c1   : > { %2588 = shalt.err (!%p2585_p3)
}
 0x1c2   : > { %s2589_s19 = scalar_lea.hbm %s4719_s11, 512  ;;  %s2593_s30 = scalar_lea.hbm %s4765_s3, 4608 }
 0x1c3   : > { %p2590_p7 = scmp.ne.s32.totalorder %s4719_s11, %s2589_s19  ;;  %p2594_p10 = scmp.lt.s32.totalorder %s4719_s11, %s4765_s3 }
 0x1c4   : > { %p2595_p1 = scmp.lt.s32.totalorder %s2593_s30, %s2589_s19 }
 0x1c5   : > { %p2591_p8 = pnand %p2590_p7, %p5003_p6 }
 0x1c6   : > { %p2596_p4 = por %p2595_p1, %p2594_p10 }
 0x1c7   : > { %p2592_p9 = pneg %p2591_p8 }
 0x1c9   : > { %p2597_p5 = pnand %p2596_p4, %p2592_p9 }
 0x1cb   : > { %2600 = shalt.err (!%p2597_p5)
}
 0x1cc   : > { %s2687_s22 = smov 256   ;;  %s2688_s23 = smov 16  }
 0x1cd   : > { %2369 = dma.vmem_to_hbm [thread:$0]  (%p5003_p6), %s4714_s6, 512, %s4719_s11, %s2080_s16, %s2687_s22, %s2687_s22, %s2688_s23  }
 0x1ce PF: > { %p2381_p11 = scmp.ge.s32.totalorder %s2643_s15, 2  ;;  %s2109_s7 = sand.u32 1, %s2631_s12  }
 0x1cf   : > { %p5004_p12 = scmp.ne.s32.totalorder %s4828_s25, 0  ;;  %s2110_s9 = scalar_lea.sflag [#allocation4], %s2109_s7 }
 0x1d1   : > { %p2376_p13 = pnand %p2381_p11, %p5004_p12 }
 0x1d3   : > { %p2377_p0 = pneg %p2376_p13 }
 0x1d5   : > { %2626 = dma.done.wait (%p2377_p0), %s2110_s9, 512  }
 0x1d6   : > { %2628 = vsyncadd (%p2377_p0), %s2110_s9, 4294966784  ;;  %p17_p2 = scmp.ge.s32.totalorder %s2734_s18, 11   ;;  %s5005_s12 = smov %s2635_s13 }
 0x1d7   : > { %s5006_s13 = smov %s2639_s14  ;;  %s5007_s14 = smov %s2746_s21 }
 0x1d8   : > { %s5008_s15 = smov %s2734_s18  ;;  %19 = sbr.rel (!%p17_p2) target bundleno = 6 (0x6), region = 93 }
 0x1dd   :  { %2115 = vsyncpa [#allocation3], 1 }
 0x1de   :  { %2117 = vsyncpa [#allocation3 + $0x1], 1 }
 0x1df   :  { %2118 = vsyncpa [#allocation4], 1 }
 0x1e0   :  { %2120 = vsyncpa [#allocation4 + $0x1], 1 }
 0x1e1   :  { %2121 = vsyncpa [#allocation5], 1 }
 0x1e2   :  { %2123 = vsyncpa [#allocation5 + $0x1], 1 }

</bundles_post_ra>
